<compile_context>
chip_gen: v6e
topology: v6e:2x2x1
jax: 0.10.0
libtpu: 0.0.40
codegen_flags: <defaults>
</compile_context>

<pallas_src>
import functools

import jax
import jax.numpy as jnp
from jax.experimental import pallas as pl
from jax.experimental.pallas import tpu as pltpu


def _tpu_generation():
    """Best-effort TPU generation (7 for v7x, 6 for v6e, 5 for v5e/v5p, ...)."""
    try:
        kind = jax.devices()[0].device_kind.lower()
    except Exception:
        return 6
    for gen in (7, 6, 5, 4, 3):
        if f"v{gen}" in kind:
            return gen
    return 6


def _pick_s_chunk(s_pad):
    """Largest chunk <= 512 that divides the padded key length (S_pad % 128 == 0)."""
    for sc in (512, 384, 256, 128):
        if s_pad % sc == 0:
            return sc
    return s_pad


def _vmem_step_bytes(bb, s_pad, h, s_chunk, out_bytes):
    """Rough per-grid-step VMEM footprint used for block sizing."""
    keys = 2 * bb * s_pad * h * 4               # f32 keys block, double-buffered
    query = 2 * bb * h * 4                      # query block
    weights = 2 * (2 * h * h * 2 + 3 * h * 4)   # Wa^T/Ua^T (bf16) + biases/Va
    outs = 2 * bb * (h + s_pad) * out_bytes     # context + attention-weight blocks
    scores = bb * s_pad * 4                     # f32 score scratch
    interm = 4 * bb * s_chunk * h * 4           # kU / tanh / product headroom
    return keys + query + weights + outs + scores + interm


def _pick_batch_block(batch, s_pad, h, s_chunk, gen, out_bytes):
    keys_per_row = s_pad * h * 4
    # Target ~2 MiB keys blocks (1-4 MiB band): amortizes the ~0.35 us/step
    # pipeline overhead and keeps DMAs long (DMA/VMEM driven, not MXU rows).
    bb = min(batch, max(1, (2 * 1024 * 1024) // keys_per_row))
    if bb > 8:
        bb -= bb % 8
    # Per-generation VMEM budget: v7x has 64 MiB physical, v5e/v6e have 128 MiB.
    budget = (40 if gen >= 7 else 80) * 1024 * 1024
    while bb > 8 and _vmem_step_bytes(bb, s_pad, h, s_chunk, out_bytes) > budget:
        bb -= 8
    # v7x only: keep >= 2 grid steps so dimension_semantics=("parallel",) can
    # shard across both TensorCores.  On 1-TC chips a forced split would just
    # halve the block for no benefit.
    if gen >= 7 and batch >= 16:
        bb = min(bb, -(-batch // 2))
    # Mosaic block constraint + store density: the 2D (BB, H)/(BB, S) output
    # blocks need BB % 8 == 0 unless the block spans the whole (padded) batch.
    if bb < batch:
        bb = batch if batch <= 8 else max(8, bb - bb % 8)
    return max(1, min(bb, batch))


def _bahdanau_kernel(q_ref, k_ref, wa_wT_ref, wa_b_ref, ua_wT_ref, ua_b_ref,
                     va_ref, ctx_ref, w_ref, s_ref, *, s_chunk, s_valid,
                     elem_dtype):
    # q_ref:   (BB, H)        query (orig dtype)
    # k_ref:   (BB, S, H) f32 keys (S lane-padded to a multiple of 128)
    # wa_wT:   (H, H) bf16    Wa.weight.T       wa_b: (1, H) f32
    # ua_wT:   (H, H) bf16    Ua.weight.T       ua_b: (1, H) f32
    # va_ref:  (1, H) f32     Va.weight as a row (Va.bias cancels in softmax)
    # ctx_ref: (BB, H)        w_ref: (BB, S)    s_ref: (BB, S) f32 scratch
    BB, S, H = k_ref.shape
    n_chunks = S // s_chunk

    # Fused Wa(query): one small (BB,H)@(H,H) MXU matmul; fold both biases.
    qw = jnp.dot(q_ref[...].astype(jnp.bfloat16), wa_wT_ref[...],
                 preferred_element_type=jnp.float32)
    qb = qw + wa_b_ref[...] + ua_b_ref[...]                      # (BB, H) f32
    va = va_ref[...].astype(elem_dtype)                          # (1, H)

    # Pass 1 -- scores, chunked over S so the (BB, s_chunk, H) intermediates
    # never exist at full (BB, S, H) size.  n_chunks is a trace-time constant,
    # so every slice offset below is static.
    for c in range(n_chunks):
        off = c * s_chunk
        kc = k_ref[:, off:off + s_chunk, :]                      # (BB, SC, H) f32
        kU = jnp.dot(kc.reshape(BB * s_chunk, H).astype(jnp.bfloat16),
                     ua_wT_ref[...], preferred_element_type=jnp.float32)
        kU = kU.reshape(BB, s_chunk, H) + qb[:, None, :]         # (BB, SC, H) f32
        t = jnp.tanh(kU.astype(elem_dtype))                      # EUP; bf16 on v6e/v7x
        # Va scoring: VPU multiply + lane reduce (f32 accumulation).
        s_ref[:, off:off + s_chunk] = jnp.sum(t * va, axis=-1, dtype=jnp.float32)

    # Numerically stable softmax over the key (lane) axis; padded lanes -> -1e30.
    s = s_ref[...]                                               # (BB, S) f32
    if s_valid < S:
        col = jax.lax.broadcasted_iota(jnp.int32, (BB, S), 1)
        s = jnp.where(col < s_valid, s, -1e30)
    m = jnp.max(s, axis=-1, keepdims=True)                       # (BB, 1)
    e = jnp.exp(s - m)                                           # (BB, S)
    # Exact divide: `weights` is a user-visible output and must sum to 1.
    w = e * (1.0 / jnp.sum(e, axis=-1, keepdims=True))           # (BB, S) f32
    w_ref[...] = w.astype(w_ref.dtype)

    # Pass 2 -- context[b, h] = sum_s w[b, s] * keys[b, s, h], against f32 keys
    # (VPU multiply + sublane reduce), chunked to bound intermediates.
    ctx = jnp.zeros((BB, H), jnp.float32)
    for c in range(n_chunks):
        off = c * s_chunk
        kc = k_ref[:, off:off + s_chunk, :]                      # (BB, SC, H) f32
        wc = w[:, off:off + s_chunk]                             # (BB, SC) f32
        ctx = ctx + jnp.sum(wc[:, :, None] * kc, axis=1)         # (BB, H) f32
    ctx_ref[...] = ctx.astype(ctx_ref.dtype)


def bahdanau_attention(query, keys, wa_w, wa_b, ua_w, ua_b, va_w, va_b,
                       *, block_b=None):
    """query: (B, 1, H), keys: (B, S, H). Weights follow nn.Linear (out, in)."""
    B, one, H = query.shape
    assert one == 1
    S = keys.shape[1]
    # TODO(synk): pad H (keys / weights / biases / Va row with zeros) to support
    # hidden sizes that are not a multiple of the 128-lane width.
    assert H % 128 == 0, "hidden size must be a multiple of 128 (TPU lane width)"

    gen = _tpu_generation()
    elem_dtype = jnp.bfloat16 if gen >= 6 else jnp.float32  # v5e: f32 VPU/EUP only
    out_dtype = query.dtype
    out_bytes = jnp.dtype(out_dtype).itemsize

    # Pad S to a lane-dense multiple of 128; padded scores are masked in-kernel.
    S_pad = -(-S // 128) * 128
    SC = _pick_s_chunk(S_pad)

    BB = block_b if block_b is not None else _pick_batch_block(
        B, S_pad, H, SC, gen, out_bytes)
    Bp = -(-B // BB) * BB

    pad_b, pad_s = Bp - B, S_pad - S
    q2 = query.reshape(B, H)
    k3 = keys
    if pad_b or pad_s:
        k3 = jnp.pad(k3, ((0, pad_b), (0, pad_s), (0, 0)))
    if pad_b:
        q2 = jnp.pad(q2, ((0, pad_b), (0, 0)))

    # Weight prep: bf16 only for the MXU operands; biases / Va row stay f32.
    wa_wT = wa_w.T.astype(jnp.bfloat16)                          # (H, H)
    ua_wT = ua_w.T.astype(jnp.bfloat16)                          # (H, H)
    wa_b2 = wa_b.reshape(1, H).astype(jnp.float32)
    ua_b2 = ua_b.reshape(1, H).astype(jnp.float32)
    va_row = va_w.reshape(1, H).astype(jnp.float32)
    del va_b  # uniform additive score shift; cancels in softmax (intentional)

    kernel = functools.partial(_bahdanau_kernel, s_chunk=SC, s_valid=S,
                               elem_dtype=elem_dtype)

    vmem_est = _vmem_step_bytes(BB, S_pad, H, SC, out_bytes)
    vmem_cap = (56 if gen >= 7 else 100) * 1024 * 1024
    vmem_limit = int(min(vmem_cap, max(32 * 1024 * 1024, int(vmem_est * 1.25))))

    # NOTE: the invariant weight operands (Wa^T/Ua^T/biases/Va) could use
    # pipeline_mode=pl.Buffered(1) to save VMEM at large H on v7x; left at the
    # default for broad compiler compatibility.
    grid_spec = pltpu.PrefetchScalarGridSpec(
        num_scalar_prefetch=0,
        grid=(Bp // BB,),
        in_specs=[
            pl.BlockSpec((BB, H), lambda b: (b, 0)),             # query
            pl.BlockSpec((BB, S_pad, H), lambda b: (b, 0, 0)),   # keys (f32)
            pl.BlockSpec((H, H), lambda b: (0, 0)),              # Wa^T (bf16)
            pl.BlockSpec((1, H), lambda b: (0, 0)),              # Wa bias
            pl.BlockSpec((H, H), lambda b: (0, 0)),              # Ua^T (bf16)
            pl.BlockSpec((1, H), lambda b: (0, 0)),              # Ua bias
            pl.BlockSpec((1, H), lambda b: (0, 0)),              # Va row
        ],
        out_specs=[
            pl.BlockSpec((BB, H), lambda b: (b, 0)),             # context
            pl.BlockSpec((BB, S_pad), lambda b: (b, 0)),         # weights
        ],
        scratch_shapes=[pltpu.VMEM((BB, S_pad), jnp.float32)],   # raw scores
    )

    context, weights = pl.pallas_call(
        kernel,
        out_shape=(
            jax.ShapeDtypeStruct((Bp, H), out_dtype),
            jax.ShapeDtypeStruct((Bp, S_pad), out_dtype),
        ),
        grid_spec=grid_spec,
        compiler_params=pltpu.CompilerParams(
            dimension_semantics=("parallel",),
            vmem_limit_bytes=vmem_limit),
    )(q2, k3, wa_wT, wa_b2, ua_wT, ua_b2, va_row)

    context = context[:B].reshape(B, 1, H)
    weights = weights[:B, :S].reshape(B, 1, S)
    return context, weights


def _reference(query, keys, wa_w, wa_b, ua_w, ua_b, va_w, va_b):
    qW = query @ wa_w.T + wa_b                      # (B, 1, H)
    kU = keys @ ua_w.T + ua_b                       # (B, S, H)
    scores = jnp.tanh(qW + kU) @ va_w.T + va_b      # (B, S, 1)
    scores = jnp.transpose(scores, (0, 2, 1))       # (B, 1, S)
    weights = jax.nn.softmax(scores, axis=-1)
    context = weights @ keys                        # (B, 1, H)
    return context, weights


if __name__ == "__main__":
    # Small but TPU-tile-friendly shapes: 128-lane hidden, 128 keys, 8 batches.
    B, S, H = 8, 128, 128
    key = jax.random.PRNGKey(0)
    k_q, k_k, k1, k2, k3, k4, k5, k6 = jax.random.split(key, 8)

    query = jax.random.normal(k_q, (B, 1, H), dtype=jnp.float32)
    keys = jax.random.normal(k_k, (B, S, H), dtype=jnp.float32)

    # Deterministic nn.Linear-style init: uniform(-1/sqrt(H), 1/sqrt(H)).
    bound = 1.0 / (H ** 0.5)
    wa_w = jax.random.uniform(k1, (H, H), jnp.float32, -bound, bound)
    wa_b = jax.random.uniform(k2, (H,), jnp.float32, -bound, bound)
    ua_w = jax.random.uniform(k3, (H, H), jnp.float32, -bound, bound)
    ua_b = jax.random.uniform(k4, (H,), jnp.float32, -bound, bound)
    va_w = jax.random.uniform(k5, (1, H), jnp.float32, -bound, bound)
    va_b = jax.random.uniform(k6, (1,), jnp.float32, -bound, bound)

    context, weights = bahdanau_attention(query, keys, wa_w, wa_b,
                                          ua_w, ua_b, va_w, va_b)
    jax.block_until_ready((context, weights))

    ctx_expected, w_expected = _reference(query, keys, wa_w, wa_b,
                                          ua_w, ua_b, va_w, va_b)
    assert context.shape == (B, 1, H) and weights.shape == (B, 1, S)
    # bf16 MXU operands (+ bf16 tanh on v6e/v7x) -> looser tolerance than f32.
    assert jnp.allclose(context, ctx_expected, atol=2e-2, rtol=2e-2)
    assert jnp.allclose(weights, w_expected, atol=2e-2, rtol=2e-2)

    print("KERNEL_OK")
</pallas_src>

<mosaic_0001>
module attributes {stable_mosaic.version = 11 : i64} {
  func.func @_bahdanau_kernel(%arg0: i32, %arg1: memref<8x128xf32, #tpu.memory_space<vmem>>, %arg2: memref<8x128x128xf32, #tpu.memory_space<vmem>>, %arg3: memref<128x128xbf16, #tpu.memory_space<vmem>>, %arg4: memref<1x128xf32, #tpu.memory_space<vmem>>, %arg5: memref<128x128xbf16, #tpu.memory_space<vmem>>, %arg6: memref<1x128xf32, #tpu.memory_space<vmem>>, %arg7: memref<1x128xf32, #tpu.memory_space<vmem>>, %arg8: memref<8x128xf32, #tpu.memory_space<vmem>>, %arg9: memref<8x128xf32, #tpu.memory_space<vmem>>, %arg10: memref<8x128xf32, #tpu.memory_space<vmem>>) attributes {dimension_semantics = [#tpu.dimension_semantics<parallel>], iteration_bounds = array<i64: 1>, scalar_prefetch = 0 : i64, scratch_operands = 1 : i64, tpu.core_type = #tpu.core_type<tc>, window_params = [{transform_indices = @transform_0, window_bounds = array<i64: 8, 128>}, {transform_indices = @transform_1, window_bounds = array<i64: 8, 128, 128>}, {pipeline_mode = #tpu.pipeline_mode<synchronous>, transform_indices = @transform_2, window_bounds = array<i64: 128, 128>}, {pipeline_mode = #tpu.pipeline_mode<synchronous>, transform_indices = @transform_3, window_bounds = array<i64: 1, 128>}, {pipeline_mode = #tpu.pipeline_mode<synchronous>, transform_indices = @transform_4, window_bounds = array<i64: 128, 128>}, {pipeline_mode = #tpu.pipeline_mode<synchronous>, transform_indices = @transform_5, window_bounds = array<i64: 1, 128>}, {pipeline_mode = #tpu.pipeline_mode<synchronous>, transform_indices = @transform_6, window_bounds = array<i64: 1, 128>}, {transform_indices = @transform_7, window_bounds = array<i64: 8, 128>}, {transform_indices = @transform_8, window_bounds = array<i64: 8, 128>}]} {
    %c0 = arith.constant 0 : index
    %c0_0 = arith.constant 0 : index
    %0 = vector.load %arg1[%c0, %c0_0] : memref<8x128xf32, #tpu.memory_space<vmem>>, vector<8x128xf32>
    %1 = arith.truncf %0 : vector<8x128xf32> to vector<8x128xbf16>
    %c0_1 = arith.constant 0 : index
    %c0_2 = arith.constant 0 : index
    %2 = vector.load %arg3[%c0_1, %c0_2] : memref<128x128xbf16, #tpu.memory_space<vmem>>, vector<128x128xbf16>
    %cst = arith.constant dense<0.000000e+00> : vector<8x128xf32>
    %3 = tpu.matmul %1, %2, %cst {dimension_numbers = #tpu.dot_dimension_numbers<[1], [0], [0], [1], [0, 0, 1, 1], [], []>} : vector<8x128xbf16>, vector<128x128xbf16>, vector<8x128xf32> -> vector<8x128xf32>
    %c0_3 = arith.constant 0 : index
    %c0_4 = arith.constant 0 : index
    %4 = vector.load %arg4[%c0_3, %c0_4] : memref<1x128xf32, #tpu.memory_space<vmem>>, vector<1x128xf32>
    %5 = vector.broadcast %4 : vector<1x128xf32> to vector<8x128xf32>
    %6 = arith.addf %3, %5 : vector<8x128xf32>
    %c0_5 = arith.constant 0 : index
    %c0_6 = arith.constant 0 : index
    %7 = vector.load %arg6[%c0_5, %c0_6] : memref<1x128xf32, #tpu.memory_space<vmem>>, vector<1x128xf32>
    %8 = vector.broadcast %7 : vector<1x128xf32> to vector<8x128xf32>
    %9 = arith.addf %6, %8 : vector<8x128xf32>
    %c0_7 = arith.constant 0 : index
    %c0_8 = arith.constant 0 : index
    %10 = vector.load %arg7[%c0_7, %c0_8] : memref<1x128xf32, #tpu.memory_space<vmem>>, vector<1x128xf32>
    %11 = arith.truncf %10 : vector<1x128xf32> to vector<1x128xbf16>
    %c0_9 = arith.constant 0 : index
    %c0_10 = arith.constant 0 : index
    %c0_11 = arith.constant 0 : index
    %12 = vector.load %arg2[%c0_9, %c0_10, %c0_11] : memref<8x128x128xf32, #tpu.memory_space<vmem>>, vector<8x128x128xf32>
    %13 = vector.shape_cast %12 : vector<8x128x128xf32> to vector<1024x128xf32>
    %14 = arith.truncf %13 : vector<1024x128xf32> to vector<1024x128xbf16>
    %c0_12 = arith.constant 0 : index
    %c0_13 = arith.constant 0 : index
    %15 = vector.load %arg5[%c0_12, %c0_13] : memref<128x128xbf16, #tpu.memory_space<vmem>>, vector<128x128xbf16>
    %cst_14 = arith.constant dense<0.000000e+00> : vector<1024x128xf32>
    %16 = tpu.matmul %14, %15, %cst_14 {dimension_numbers = #tpu.dot_dimension_numbers<[1], [0], [0], [1], [0, 0, 1, 1], [], []>} : vector<1024x128xbf16>, vector<128x128xbf16>, vector<1024x128xf32> -> vector<1024x128xf32>
    %17 = vector.shape_cast %16 : vector<1024x128xf32> to vector<8x128x128xf32>
    %18 = vector.shape_cast %9 : vector<8x128xf32> to vector<8x1x128xf32>
    %19 = vector.broadcast %18 : vector<8x1x128xf32> to vector<8x128x128xf32>
    %20 = arith.addf %17, %19 : vector<8x128x128xf32>
    %21 = arith.truncf %20 : vector<8x128x128xf32> to vector<8x128x128xbf16>
    %22 = math.tanh %21 : vector<8x128x128xbf16>
    %23 = vector.shape_cast %11 : vector<1x128xbf16> to vector<1x1x128xbf16>
    %24 = vector.broadcast %23 : vector<1x1x128xbf16> to vector<8x128x128xbf16>
    %25 = arith.mulf %22, %24 : vector<8x128x128xbf16>
    %26 = arith.extf %25 : vector<8x128x128xbf16> to vector<8x128x128xf32>
    %cst_15 = arith.constant dense<0.000000e+00> : vector<8x128xf32>
    %27 = vector.multi_reduction <add>, %26, %cst_15 [2] : vector<8x128x128xf32> to vector<8x128xf32>
    %c0_16 = arith.constant 0 : index
    %c0_17 = arith.constant 0 : index
    %28 = vector.load %arg10[%c0_16, %c0_17] : memref<8x128xf32, #tpu.memory_space<vmem>>, vector<8x128xf32>
    tpu.vector_store %arg10[%c0_16, %c0_17], %27 {strides = array<i32>} : memref<8x128xf32, #tpu.memory_space<vmem>>, vector<8x128xf32>,
    %c0_18 = arith.constant 0 : index
    %c0_19 = arith.constant 0 : index
    %29 = vector.load %arg10[%c0_18, %c0_19] : memref<8x128xf32, #tpu.memory_space<vmem>>, vector<8x128xf32>
    %cst_20 = arith.constant dense<0xFF800000> : vector<8xf32>
    %30 = vector.multi_reduction <maximumf>, %29, %cst_20 [1] : vector<8x128xf32> to vector<8xf32>
    %31 = vector.shape_cast %30 : vector<8xf32> to vector<8x1xf32>
    %32 = vector.broadcast %31 : vector<8x1xf32> to vector<8x128xf32>
    %33 = arith.subf %29, %32 : vector<8x128xf32>
    %34 = math.exp %33 : vector<8x128xf32>
    %cst_21 = arith.constant dense<0.000000e+00> : vector<8xf32>
    %35 = vector.multi_reduction <add>, %34, %cst_21 [1] : vector<8x128xf32> to vector<8xf32>
    %36 = vector.shape_cast %35 : vector<8xf32> to vector<8x1xf32>
    %cst_22 = arith.constant 1.000000e+00 : f32
    %37 = vector.broadcast %cst_22 : f32 to vector<8x1xf32>
    %38 = arith.divf %37, %36 : vector<8x1xf32>
    %39 = vector.broadcast %38 : vector<8x1xf32> to vector<8x128xf32>
    %40 = arith.mulf %34, %39 : vector<8x128xf32>
    %c0_23 = arith.constant 0 : index
    %c0_24 = arith.constant 0 : index
    %41 = vector.load %arg9[%c0_23, %c0_24] : memref<8x128xf32, #tpu.memory_space<vmem>>, vector<8x128xf32>
    tpu.vector_store %arg9[%c0_23, %c0_24], %40 {strides = array<i32>} : memref<8x128xf32, #tpu.memory_space<vmem>>, vector<8x128xf32>,
    %cst_25 = arith.constant 0.000000e+00 : f32
    %42 = vector.broadcast %cst_25 : f32 to vector<8x128xf32>
    %c0_26 = arith.constant 0 : index
    %c0_27 = arith.constant 0 : index
    %c0_28 = arith.constant 0 : index
    %43 = vector.load %arg2[%c0_26, %c0_27, %c0_28] : memref<8x128x128xf32, #tpu.memory_space<vmem>>, vector<8x128x128xf32>
    %44 = vector.shape_cast %40 : vector<8x128xf32> to vector<8x128x1xf32>
    %45 = vector.broadcast %44 : vector<8x128x1xf32> to vector<8x128x128xf32>
    %46 = arith.mulf %45, %43 : vector<8x128x128xf32>
    %cst_29 = arith.constant dense<0.000000e+00> : vector<8x128xf32>
    %47 = vector.multi_reduction <add>, %46, %cst_29 [1] : vector<8x128x128xf32> to vector<8x128xf32>
    %48 = arith.addf %42, %47 : vector<8x128xf32>
    %c0_30 = arith.constant 0 : index
    %c0_31 = arith.constant 0 : index
    %49 = vector.load %arg8[%c0_30, %c0_31] : memref<8x128xf32, #tpu.memory_space<vmem>>, vector<8x128xf32>
    tpu.vector_store %arg8[%c0_30, %c0_31], %48 {strides = array<i32>} : memref<8x128xf32, #tpu.memory_space<vmem>>, vector<8x128xf32>,
    return
  }
  func.func @transform_0(%arg0: i32) -> (i32, i32) {
    %c0_i32 = arith.constant 0 : i32
    %c0_i32_0 = arith.constant 0 : i32
    return %arg0, %c0_i32 : i32, i32
  }
  func.func @transform_1(%arg0: i32) -> (i32, i32, i32) {
    %c0_i32 = arith.constant 0 : i32
    %c0_i32_0 = arith.constant 0 : i32
    %c0_i32_1 = arith.constant 0 : i32
    return %arg0, %c0_i32, %c0_i32_0 : i32, i32, i32
  }
  func.func @transform_2(%arg0: i32) -> (i32, i32) {
    %c0_i32 = arith.constant 0 : i32
    %c0_i32_0 = arith.constant 0 : i32
    %c0_i32_1 = arith.constant 0 : i32
    return %c0_i32, %c0_i32_0 : i32, i32
  }
  func.func @transform_3(%arg0: i32) -> (i32, i32) {
    %c0_i32 = arith.constant 0 : i32
    %c0_i32_0 = arith.constant 0 : i32
    %c0_i32_1 = arith.constant 0 : i32
    return %c0_i32, %c0_i32_0 : i32, i32
  }
  func.func @transform_4(%arg0: i32) -> (i32, i32) {
    %c0_i32 = arith.constant 0 : i32
    %c0_i32_0 = arith.constant 0 : i32
    %c0_i32_1 = arith.constant 0 : i32
    return %c0_i32, %c0_i32_0 : i32, i32
  }
  func.func @transform_5(%arg0: i32) -> (i32, i32) {
    %c0_i32 = arith.constant 0 : i32
    %c0_i32_0 = arith.constant 0 : i32
    %c0_i32_1 = arith.constant 0 : i32
    return %c0_i32, %c0_i32_0 : i32, i32
  }
  func.func @transform_6(%arg0: i32) -> (i32, i32) {
    %c0_i32 = arith.constant 0 : i32
    %c0_i32_0 = arith.constant 0 : i32
    %c0_i32_1 = arith.constant 0 : i32
    return %c0_i32, %c0_i32_0 : i32, i32
  }
  func.func @transform_7(%arg0: i32) -> (i32, i32) {
    %c0_i32 = arith.constant 0 : i32
    %c0_i32_0 = arith.constant 0 : i32
    return %arg0, %c0_i32 : i32, i32
  }
  func.func @transform_8(%arg0: i32) -> (i32, i32) {
    %c0_i32 = arith.constant 0 : i32
    %c0_i32_0 = arith.constant 0 : i32
    return %arg0, %c0_i32 : i32, i32
  }
}

</mosaic_0001>

<bundles_post_ra>
// kernel: tpu_custom_call.1
= control target key start
LH: loop header
LB: loop body
LE: loop exit
PB: predicated region body
PF: predicated region fallthrough
CT: control target
= control target key end

     0   :  { %14 = vsyncpa [#allocation4], 0  ;;  %s5741_s0 = inlined_call_operand.hbm [shape: f32[8,128], index: 0, kind: input, shape index: {}]   ;;  %s5742_s1 = inlined_call_operand.hbm [shape: f32[8,128,128], index: 1, kind: input, shape index: {}]   ;;  %s5743_s2 = inlined_call_operand.hbm [shape: bf16[128,128], index: 2, kind: input, shape index: {}]   ;;  %s5744_s3 = inlined_call_operand.vmem [shape: f32[1,128], index: 3, kind: input, shape index: {}]   ;;  %s5745_s4 = inlined_call_operand.hbm [shape: bf16[128,128], index: 4, kind: input, shape index: {}]   ;;  %s5746_s5 = inlined_call_operand.vmem [shape: f32[1,128], index: 5, kind: input, shape index: {}]   ;;  %s5747_s6 = inlined_call_operand.vmem [shape: f32[1,128], index: 6, kind: input, shape index: {}]   ;;  %s5748_s7 = inlined_call_operand.hbm [shape: f32[8,128], index: 7, kind: output, shape index: {0}]   ;;  %s5749_s8 = inlined_call_operand.hbm [shape: f32[8,128], index: 8, kind: output, shape index: {1}]  }
   0x1   :  { %15 = vsyncpa [#allocation7], 0 }
   0x2   :  { %16 = vsyncpa [#allocation10], 0 }
   0x3   :  { %17 = vsyncpa [#allocation5], 0 }
   0x4   :  { %18 = vsyncpa [#allocation13], 0  ;;  %s4215_s27 = smov [#allocation6]  }
   0x5   :  { %s34_s28 = sshll.u32 %s4215_s27, 4  ;;  %s35_s28 = int_to_ptr.vmem [resolvable:$true] %s34_s28 }
   0x6   :  { %s4093_s29 = scalar_lea.vmem %s35_s28, 16384  ;;  %p4098_p1 = scmp.lt.s32.totalorder %s35_s28, %s35_s28 }
   0x7   :  { %p4094_p0 = scmp.ne.s32.totalorder %s35_s28, %s4093_s29  ;;  %p4099_p2 = scmp.lt.s32.totalorder %s4093_s29, %s4093_s29 }
   0x9   :  { %p4100_p3 = por %p4099_p2, %p4098_p1 }
   0xb   :  { %p4101_p4 = pnand %p4100_p3, %p4094_p0 }
   0xd   :  { %4104 = shalt.err (!%p4101_p4)
}
   0xe   :  { %s4216_s30 = smov 128   ;;  %s4217_s9 = smov 8  }
   0xf   :  { %40 = dma.hbm_to_vmem [thread:$0]  %s5742_s1, 16384, %s35_s28, [#allocation7], %s4216_s30, %s4216_s30, %s4217_s9  }
  0x10   :  { %s4218_s12 = smov [#allocation3]   ;;  %s4219_s14 = smov [#allocation8]  }
  0x11   :  { %s25_s13 = sshll.u32 %s4218_s12, 4  ;;  %s46_s15 = sshll.u32 %s4219_s14, 4  ;;  %s26_s13 = int_to_ptr.vmem [resolvable:$true] %s25_s13  ;;  %s47_s15 = int_to_ptr.vmem [resolvable:$true] %s46_s15 }
  0x12   :  { %s4113_s16 = scalar_lea.vmem %s26_s13, 128  ;;  %p4118_p6 = scmp.lt.s32.totalorder %s26_s13, %s26_s13 }
  0x13   :  { %p4114_p5 = scmp.ne.s32.totalorder %s26_s13, %s4113_s16  ;;  %p4119_p7 = scmp.lt.s32.totalorder %s4113_s16, %s4113_s16 }
  0x15   :  { %p4120_p8 = por %p4119_p7, %p4118_p6 }
  0x17   :  { %p4121_p9 = pnand %p4120_p8, %p4114_p5 }
  0x19   :  { %4124 = shalt.err (!%p4121_p9)
}
  0x1a   :  { %28 = dma.hbm_to_vmem [thread:$0]  %s5741_s0, 128, %s26_s13, [#allocation4]  }
  0x1b   :  { %s4133_s19 = scalar_lea.vmem %s47_s15, 1024  ;;  %p4138_p11 = scmp.lt.s32.totalorder %s47_s15, %s47_s15 }
  0x1c   :  { %p4134_p10 = scmp.ne.s32.totalorder %s47_s15, %s4133_s19  ;;  %p4139_p12 = scmp.lt.s32.totalorder %s4133_s19, %s4133_s19 }
  0x1e   :  { %p4140_p13 = por %p4139_p12, %p4138_p11 }
  0x20   :  { %p4141_p0 = pnand %p4140_p13, %p4134_p10 }
  0x22   :  { %4144 = shalt.err (!%p4141_p0)
}
  0x23   :  { %s4220_s1 = smov 64   ;;  %s4221_s20 = smov 4  }
  0x24   :  { %52 = dma.hbm_to_vmem [thread:$0]  %s5743_s2, 1024, %s47_s15, [#allocation7], %s4220_s1, %s4220_s1, %s4221_s20  }
  0x25   :  { %s4222_s23 = smov [#allocation9]  }
  0x26   :  { %s60_s24 = sshll.u32 %s4222_s23, 4  ;;  %s61_s24 = int_to_ptr.vmem [resolvable:$true] %s60_s24 }
  0x27   :  { %s4153_s25 = scalar_lea.vmem %s61_s24, 1024  ;;  %p4158_p2 = scmp.lt.s32.totalorder %s61_s24, %s61_s24 }
  0x28   :  { %p4154_p1 = scmp.ne.s32.totalorder %s61_s24, %s4153_s25  ;;  %p4159_p3 = scmp.lt.s32.totalorder %s4153_s25, %s4153_s25 }
  0x2a   :  { %p4160_p4 = por %p4159_p3, %p4158_p2 }
  0x2c   :  { %p4161_p5 = pnand %p4160_p4, %p4154_p1 }
  0x2e   :  { %4164 = shalt.err (!%p4161_p5)
}
  0x2f   :  { %66 = dma.hbm_to_vmem [thread:$0]  %s5745_s4, 1024, %s61_s24, [#allocation10], %s4220_s1, %s4220_s1, %s4221_s20  }
  0x30   :  { %4205 = dma.done.wait [#allocation4], 128  }
  0x31   :  { %4206 = vsyncadd [#allocation4], 4294967168 }
  0x32   :  { %4207 = dma.done.wait [#allocation7], 17408  }
  0x33   :  { %4208 = vsyncadd [#allocation7], 4294949888 }
  0x34   :  { %4209 = dma.done.wait [#allocation10], 1024  }
  0x35   :  { %4210 = vsyncadd [#allocation10], 4294966272  ;;  %v4223_v0 = vmov 0.0   ;;  %vm4224_vm0 = vmmov 0   ;;  %v3937_v1 = vld [vmem:[#allocation8 + $0x38] sm:$0xff]   ;;  %v3939_v3 = vld [vmem:[#allocation8 + $0x30] sm:$0xff]  }
  0x36   :  { %3744 = vmatprep.subr.bf16.mxu0 %v4223_v0  ;;  %3760 = vmatprep.mubr.msk.bf16.mxu0 %vm4224_vm0, %v4223_v0  ;;  %v3938_v2 = vld [vmem:[#allocation9 + $0x38] sm:$0xff]   ;;  %v4285_v4 = vld [vmem:[#allocation9 + $0x30] sm:$0xff]   ;;  %v4288_v5 = vld [vmem:[#allocation9 + $0x28] sm:$0xff]   ;;  %vm1948_vm1 = vcmask 130112   ;;  %vm1955_vm2 = vcmask 195712   ;;  %vm1962_vm3 = vcmask 261312  }
  0x37   :  { %3745 = vmatpush3.bf16.msra.mxu0 %v3937_v1  ;;  %3908 = vmatprep.subr.bf16.mxu1 %v3938_v2  ;;  %v3941_v6 = vld [vmem:[#allocation8 + $0x28] sm:$0xff]   ;;  %v4292_v7 = vld [vmem:[#allocation9 + $0x20] sm:$0xff]   ;;  %v4296_v9 = vld [vmem:[#allocation9 + $0x18] sm:$0xff]   ;;  %vm1969_vm4 = vcmask 326912   ;;  %vm1976_vm5 = vcmask 392512   ;;  %vm1983_vm6 = vcmask 458112  }
  0x38   :  { %3746 = vmatprep.subr.bf16.mxu0 %v4223_v0  ;;  %3916 = vmatpush3.bf16.msra.mxu1 %v3938_v2  ;;  %v3943_v8 = vld [vmem:[#allocation8 + $0x20] sm:$0xff]   ;;  %v3945_v10 = vld [vmem:[#allocation8 + $0x18] sm:$0xff]   ;;  %v264_v12 = vld [vmem:[#allocation6 + $0x1c8] sm:$0xff]  ;;  %vm1990_vm7 = vcmask 523712   ;;  %vm1997_vm8 = vcmask 589312   ;;  %vm2004_vm9 = vcmask 654912  }
  0x39   :  { %3909 = vmatprep.subr.bf16.mxu1 %v4285_v4  ;;  %v263_v11 = vld [vmem:[#allocation6 + $0x1c0] sm:$0xff]  ;;  %v4300_v13 = vld [vmem:[#allocation9 + $0x10] sm:$0xff]   ;;  %v4304_v16 = vld [vmem:[#allocation9 + $0x8] sm:$0xff]   ;;  %vm2011_vm10 = vcmask 720512   ;;  %vm2018_vm11 = vcmask 786112   ;;  %vm2025_vm12 = vcmask 851712  }
  0x3a   :  { %v363_v14 = vpack.c.bf16 %v264_v12, %v263_v11  ;;  %v3947_v15 = vld [vmem:[#allocation8 + $0x10] sm:$0xff]   ;;  %v3949_v17 = vld [vmem:[#allocation8 + $0x8] sm:$0xff]   ;;  %v4308_v18 = vld [vmem:[#allocation9] sm:$0xff]   ;;  %vm2032_vm13 = vcmask 917312   ;;  %vm2039_vm14 = vcmask 982912   ;;  %vm2046_vm15 = vcmask 1048512  }
  0x3b   :  { %3747 = vmatpush3.bf16.msra.mxu0 %v3939_v3  ;;  %v3951_v19 = vld [vmem:[#allocation8] sm:$0xff]   ;;  %v84_v20 = vld [vmem:[#allocation3] sm:$0xff]  ;;  %v208_v22 = vld [vmem:[#allocation6 + $0x8] sm:$0xff]  ;;  %vm2601_vm0 = vcmask 1041409  }
  0x3c   :  { %3748 = vmatprep.subr.bf16.mxu0 %v4223_v0  ;;  %3917 = vmatpush3.bf16.msra.mxu1 %v4285_v4  ;;  %v207_v21 = vld [vmem:[#allocation6] sm:$0xff]  ;;  %v265_v23 = vld [vmem:[#allocation6 + $0x1d0] sm:$0xff]  ;;  %v266_v24 = vld [vmem:[#allocation6 + $0x1d8] sm:$0xff]  ;;  %v85_v25 = vpack.c.bf16 %v84_v20, %v84_v20 }
  0x3d   :  { %3910 = vmatprep.subr.bf16.mxu1 %v4288_v5  ;;  %3836 = vmatprep.mubr.bf16.mxu1 %v363_v14  ;;  %v267_v26 = vld [vmem:[#allocation6 + $0x1e0] sm:$0xff]  ;;  %v268_v27 = vld [vmem:[#allocation6 + $0x1e8] sm:$0xff]  ;;  %v335_v28 = vpack.c.bf16 %v208_v22, %v207_v21  ;;  %v364_v29 = vpack.c.bf16 %v266_v24, %v265_v23  ;;  %v269_v31 = vld [vmem:[#allocation6 + $0x1f0] sm:$0xff] }
  0x3e   :  { %v365_v30 = vpack.c.bf16 %v268_v27, %v267_v26  ;;  %v270_v32 = vld [vmem:[#allocation6 + $0x1f8] sm:$0xff]  ;;  %v271_v33 = vld [vmem:[#allocation6 + $0x200] sm:$0xff]  ;;  %v272_v34 = vld [vmem:[#allocation6 + $0x208] sm:$0xff] }
  0x3f   :  { %3749 = vmatpush3.bf16.msra.mxu0 %v3941_v6  ;;  %v366_v35 = vpack.c.bf16 %v270_v32, %v269_v31  ;;  %v367_v36 = vpack.c.bf16 %v272_v34, %v271_v33  ;;  %v273_v37 = vld [vmem:[#allocation6 + $0x210] sm:$0xff]  ;;  %v274_v38 = vld [vmem:[#allocation6 + $0x218] sm:$0xff]  ;;  %v275_v39 = vld [vmem:[#allocation6 + $0x220] sm:$0xff] }
  0x40   :  { %3750 = vmatprep.subr.bf16.mxu0 %v4223_v0  ;;  %3918 = vmatpush3.bf16.msra.mxu1 %v4288_v5  ;;  %v276_v40 = vld [vmem:[#allocation6 + $0x228] sm:$0xff]  ;;  %v368_v41 = vpack.c.bf16 %v274_v38, %v273_v37  ;;  %v277_v43 = vld [vmem:[#allocation6 + $0x230] sm:$0xff]  ;;  %v278_v44 = vld [vmem:[#allocation6 + $0x238] sm:$0xff] }
  0x41   :  { %3911 = vmatprep.subr.bf16.mxu1 %v4292_v7  ;;  %v369_v42 = vpack.c.bf16 %v276_v40, %v275_v39  ;;  %v279_v45 = vld [vmem:[#allocation6 + $0x240] sm:$0xff]  ;;  %v280_v46 = vld [vmem:[#allocation6 + $0x248] sm:$0xff]  ;;  %v370_v47 = vpack.c.bf16 %v278_v44, %v277_v43  ;;  %v209_v49 = vld [vmem:[#allocation6 + $0x10] sm:$0xff] }
  0x42   :  { %v371_v48 = vpack.c.bf16 %v280_v46, %v279_v45  ;;  %v210_v50 = vld [vmem:[#allocation6 + $0x18] sm:$0xff]  ;;  %v211_v51 = vld [vmem:[#allocation6 + $0x20] sm:$0xff]  ;;  %v212_v52 = vld [vmem:[#allocation6 + $0x28] sm:$0xff] }
  0x43   :  { %3751 = vmatpush3.bf16.msra.mxu0 %v3943_v8  ;;  %v281_v53 = vld [vmem:[#allocation6 + $0x250] sm:$0xff]  ;;  %v282_v54 = vld [vmem:[#allocation6 + $0x258] sm:$0xff]  ;;  %v336_v55 = vpack.c.bf16 %v210_v50, %v209_v49  ;;  %v283_v56 = vld [vmem:[#allocation6 + $0x260] sm:$0xff]  ;;  %v337_v58 = vpack.c.bf16 %v212_v52, %v211_v51 }
  0x44   :  { %3752 = vmatprep.subr.bf16.mxu0 %v4223_v0  ;;  %3919 = vmatpush3.bf16.msra.mxu1 %v4292_v7  ;;  %v284_v57 = vld [vmem:[#allocation6 + $0x268] sm:$0xff]  ;;  %v372_v59 = vpack.c.bf16 %v282_v54, %v281_v53  ;;  %v213_v61 = vld [vmem:[#allocation6 + $0x30] sm:$0xff]  ;;  %v214_v62 = vld [vmem:[#allocation6 + $0x38] sm:$0xff] }
  0x45   :  { %3912 = vmatprep.subr.bf16.mxu1 %v4296_v9  ;;  %v373_v60 = vpack.c.bf16 %v284_v57, %v283_v56  ;;  %v215_v63 = vld [vmem:[#allocation6 + $0x40] sm:$0xff]  ;;  %v285_v1 = vld [vmem:[#allocation6 + $0x270] sm:$0xff]  ;;  %v338_v3 = vpack.c.bf16 %v214_v62, %v213_v61  ;;  %v220_v12 = vld [vmem:[#allocation6 + $0x68] sm:$0xff] }
  0x46   :  { %v219_v11 = vld [vmem:[#allocation6 + $0x60] sm:$0xff]  ;;  %v290_v14 = vld [vmem:[#allocation6 + $0x298] sm:$0xff]  ;;  %v221_v21 = vld [vmem:[#allocation6 + $0x70] sm:$0xff] }
  0x47   :  { %3753 = vmatpush3.bf16.msra.mxu0 %v3945_v10  ;;  %v218_v10 = vld [vmem:[#allocation6 + $0x58] sm:$0xff]  ;;  %v223_v23 = vld [vmem:[#allocation6 + $0x80] sm:$0xff]  ;;  %v224_v24 = vld [vmem:[#allocation6 + $0x88] sm:$0xff] }
  0x48   :  { %3754 = vmatprep.subr.bf16.mxu0 %v4223_v0  ;;  %3920 = vmatpush3.bf16.msra.mxu1 %v4296_v9  ;;  %v222_v22 = vld [vmem:[#allocation6 + $0x78] sm:$0xff]  ;;  %v225_v33 = vld [vmem:[#allocation6 + $0x90] sm:$0xff]  ;;  %v299_v40 = vld [vmem:[#allocation6 + $0x2e0] sm:$0xff] }
  0x49   :  { %3913 = vmatprep.subr.bf16.mxu1 %v4300_v13  ;;  %v294_v26 = vld [vmem:[#allocation6 + $0x2b8] sm:$0xff]  ;;  %v342_v27 = vpack.c.bf16 %v222_v22, %v221_v21  ;;  %v297_v37 = vld [vmem:[#allocation6 + $0x2d0] sm:$0xff]  ;;  %v303_v52 = vld [vmem:[#allocation6 + $0x300] sm:$0xff] }
  0x4a   :  { %v226_v34 = vld [vmem:[#allocation6 + $0x98] sm:$0xff]  ;;  %v229_v45 = vld [vmem:[#allocation6 + $0xb0] sm:$0xff]  ;;  %v304_v53 = vld [vmem:[#allocation6 + $0x308] sm:$0xff] }
  0x4b   :  { %3755 = vmatpush3.bf16.msra.mxu0 %v3947_v15  ;;  %v298_v38 = vld [vmem:[#allocation6 + $0x2d8] sm:$0xff]  ;;  %v344_v39 = vpack.c.bf16 %v226_v34, %v225_v33  ;;  %v301_v49 = vld [vmem:[#allocation6 + $0x2f0] sm:$0xff]  ;;  %v383_v56 = vpack.c.bf16 %v304_v53, %v303_v52 }
  0x4c   :  { %3756 = vmatprep.subr.bf16.mxu0 %v4223_v0  ;;  %3921 = vmatpush3.bf16.msra.mxu1 %v4300_v13  ;;  %v380_v43 = vpack.c.bf16 %v298_v38, %v297_v37  ;;  %v230_v46 = vld [vmem:[#allocation6 + $0xb8] sm:$0xff]  ;;  %v233_v57 = vld [vmem:[#allocation6 + $0xd0] sm:$0xff]  ;;  %v320_v37 = vld [vmem:[#allocation6 + $0x388] sm:$0xff] }
  0x4d   :  { %3914 = vmatprep.subr.bf16.mxu1 %v4304_v16  ;;  %v302_v50 = vld [vmem:[#allocation6 + $0x2f8] sm:$0xff]  ;;  %v346_v51 = vpack.c.bf16 %v230_v46, %v229_v45  ;;  %v305_v61 = vld [vmem:[#allocation6 + $0x310] sm:$0xff] }
  0x4e   :  { %v306_v62 = vld [vmem:[#allocation6 + $0x318] sm:$0xff]  ;;  %v313_v21 = vld [vmem:[#allocation6 + $0x350] sm:$0xff] }
  0x4f   :  { %3757 = vmatpush3.bf16.msra.mxu0 %v3949_v17  ;;  %v292_v17 = vld [vmem:[#allocation6 + $0x2a8] sm:$0xff]  ;;  %v314_v22 = vld [vmem:[#allocation6 + $0x358] sm:$0xff]  ;;  %v317_v33 = vld [vmem:[#allocation6 + $0x370] sm:$0xff] }
  0x50   :  { %3758 = vmatprep.subr.bf16.mxu0 %v4223_v0  ;;  %3922 = vmatpush3.bf16.msra.mxu1 %v4304_v16  ;;  %v216_v0 = vld [vmem:[#allocation6 + $0x48] sm:$0xff]  ;;  %v318_v34 = vld [vmem:[#allocation6 + $0x378] sm:$0xff]  ;;  %v321_v45 = vld [vmem:[#allocation6 + $0x390] sm:$0xff] }
  0x51   :  { %3915 = vmatprep.subr.bf16.mxu1 %v4308_v18  ;;  %v339_v6 = vpack.c.bf16 %v216_v0, %v215_v63  ;;  %v307_v0 = vld [vmem:[#allocation6 + $0x320] sm:$0xff]  ;;  %v322_v46 = vld [vmem:[#allocation6 + $0x398] sm:$0xff]  ;;  %v253_v53 = vld [vmem:[#allocation6 + $0x170] sm:$0xff] }
  0x53   :  { %3759 = vmatpush3.bf16.msra.mxu0 %v3951_v19 }
  0x54   :  { %3764 = vmatprep.subr.bf16.mxu0 %v3938_v2  ;;  %3923 = vmatpush3.bf16.msra.mxu1 %v4308_v18 }
  0x56   :  { %3761 = vmatmul.mubr.bf16.vlgmr.msra.gmra.mxu0 %v85_v25  ;;  %v293_v25 = vld [vmem:[#allocation6 + $0x2b0] sm:$0xff] }
  0x57   :  { %3765 = vmatpush3.bf16.msra.mxu0 %v3938_v2  ;;  %3780 = vmatprep.mubr.bf16.mxu0 %v335_v28  ;;  %v286_v2 = vld [vmem:[#allocation6 + $0x278] sm:$0xff]  ;;  %v295_v28 = vld [vmem:[#allocation6 + $0x2c0] sm:$0xff]  ;;  %v378_v31 = vpack.c.bf16 %v294_v26, %v293_v25  ;;  %v316_v25 = vld [vmem:[#allocation6 + $0x368] sm:$0xff] }
  0x58   :  { %3837 = vmatmul.mubr.bf16.vlgmr.msra.gmra.mxu1 %v364_v29  ;;  %3766 = vmatprep.subr.bf16.mxu0 %v4285_v4  ;;  %v296_v29 = vld [vmem:[#allocation6 + $0x2c8] sm:$0xff] }
  0x59   :  { %3840 = vmatprep.mubr.bf16.mxu1 %v365_v30  ;;  %v343_v30 = vpack.c.bf16 %v224_v24, %v223_v23  ;;  %v379_v32 = vpack.c.bf16 %v296_v29, %v295_v28  ;;  %v315_v24 = vld [vmem:[#allocation6 + $0x360] sm:$0xff]  ;;  %v245_v29 = vld [vmem:[#allocation6 + $0x130] sm:$0xff] }
  0x5a   :  { %v389_v28 = vpack.c.bf16 %v316_v25, %v315_v24  ;;  %v3645_v24 = vld [vmem:[%s5744_s3] ss:$0 sm:$0xff] }
  0x5b   :  { %3767 = vmatpush3.bf16.msra.mxu0 %v4285_v4  ;;  %v287_v4 = vld [vmem:[#allocation6 + $0x280] sm:$0xff] }
  0x5c   :  { %3768 = vmatprep.subr.bf16.mxu0 %v4288_v5 }
  0x5f   :  { %3769 = vmatpush3.bf16.msra.mxu0 %v4288_v5  ;;  %v288_v5 = vld [vmem:[#allocation6 + $0x288] sm:$0xff] }
  0x60   :  { %3841 = vmatmul.mubr.bf16.gmra.mxu1 %v366_v35  ;;  %3770 = vmatprep.subr.bf16.mxu0 %v4292_v7  ;;  %v375_v8 = vpack.c.bf16 %v288_v5, %v287_v4  ;;  %v227_v35 = vld [vmem:[#allocation6 + $0xa0] sm:$0xff]  ;;  %v237_v5 = vld [vmem:[#allocation6 + $0xf0] sm:$0xff] }
  0x61   :  { %3844 = vmatprep.mubr.bf16.mxu1 %v367_v36  ;;  %v228_v36 = vld [vmem:[#allocation6 + $0xa8] sm:$0xff] }
  0x63   :  { %3771 = vmatpush3.bf16.msra.mxu0 %v4292_v7  ;;  %v374_v7 = vpack.c.bf16 %v286_v2, %v285_v1  ;;  %v308_v1 = vld [vmem:[#allocation6 + $0x328] sm:$0xff] }
  0x64   :  { %3772 = vmatprep.subr.bf16.mxu0 %v4296_v9  ;;  %v385_v4 = vpack.c.bf16 %v308_v1, %v307_v0  ;;  %v257_v1 = vld [vmem:[#allocation6 + $0x190] sm:$0xff] }
  0x67   :  { %3773 = vmatpush3.bf16.msra.mxu0 %v4296_v9  ;;  %v217_v9 = vld [vmem:[#allocation6 + $0x50] sm:$0xff] }
  0x68   :  { %3845 = vmatmul.mubr.bf16.gmra.mxu1 %v368_v41  ;;  %3774 = vmatprep.subr.bf16.mxu0 %v4300_v13  ;;  %v340_v15 = vpack.c.bf16 %v218_v10, %v217_v9  ;;  %v300_v41 = vld [vmem:[#allocation6 + $0x2e8] sm:$0xff]  ;;  %v309_v9 = vld [vmem:[#allocation6 + $0x330] sm:$0xff]  ;;  %v310_v10 = vld [vmem:[#allocation6 + $0x338] sm:$0xff] }
  0x69   :  { %3848 = vmatprep.mubr.bf16.mxu1 %v369_v42  ;;  %v345_v42 = vpack.c.bf16 %v228_v36, %v227_v35  ;;  %v381_v44 = vpack.c.bf16 %v300_v41, %v299_v40  ;;  %v319_v36 = vld [vmem:[#allocation6 + $0x380] sm:$0xff]  ;;  %v249_v41 = vld [vmem:[#allocation6 + $0x150] sm:$0xff] }
  0x6a   :  { %v391_v40 = vpack.c.bf16 %v320_v37, %v319_v36 }
  0x6b   :  { %3775 = vmatpush3.bf16.msra.mxu0 %v4300_v13  ;;  %v289_v13 = vld [vmem:[#allocation6 + $0x290] sm:$0xff] }
  0x6c   :  { %3776 = vmatprep.subr.bf16.mxu0 %v4304_v16  ;;  %v376_v19 = vpack.c.bf16 %v290_v14, %v289_v13  ;;  %v312_v13 = vld [vmem:[#allocation6 + $0x348] sm:$0xff] }
  0x6f   :  { %3777 = vmatpush3.bf16.msra.mxu0 %v4304_v16  ;;  %v291_v16 = vld [vmem:[#allocation6 + $0x2a0] sm:$0xff] }
  0x70   :  { %3849 = vmatmul.mubr.bf16.gmra.mxu1 %v370_v47  ;;  %3778 = vmatprep.subr.bf16.mxu0 %v4308_v18  ;;  %v377_v20 = vpack.c.bf16 %v292_v17, %v291_v16  ;;  %v231_v47 = vld [vmem:[#allocation6 + $0xc0] sm:$0xff]  ;;  %v241_v17 = vld [vmem:[#allocation6 + $0x110] sm:$0xff] }
  0x71   :  { %3852 = vmatprep.mubr.bf16.mxu1 %v371_v48  ;;  %v232_v48 = vld [vmem:[#allocation6 + $0xc8] sm:$0xff] }
  0x72   :  { %v347_v54 = vpack.c.bf16 %v232_v48, %v231_v47  ;;  %v323_v48 = vld [vmem:[#allocation6 + $0x3a0] sm:$0xff] }
  0x73   :  { %3779 = vmatpush3.bf16.msra.mxu0 %v4308_v18  ;;  %v341_v18 = vpack.c.bf16 %v220_v12, %v219_v11  ;;  %v311_v12 = vld [vmem:[#allocation6 + $0x340] sm:$0xff] }
  0x74   :  { %v387_v16 = vpack.c.bf16 %v312_v13, %v311_v12  ;;  %v261_v13 = vld [vmem:[#allocation6 + $0x1b0] sm:$0xff] }
  0x76   :  { %3781 = vmatmul.mubr.bf16.vlgmr.msra.gmra.mxu0 %v336_v55  ;;  %v382_v55 = vpack.c.bf16 %v302_v50, %v301_v49  ;;  %v324_v49 = vld [vmem:[#allocation6 + $0x3a8] sm:$0xff] }
  0x77   :  { %3784 = vmatprep.mubr.bf16.mxu0 %v337_v58  ;;  %v234_v58 = vld [vmem:[#allocation6 + $0xd8] sm:$0xff]  ;;  %v393_v52 = vpack.c.bf16 %v324_v49, %v323_v48 }
  0x78   :  { %3853 = vmatmul.mubr.bf16.gmra.mxu1 %v372_v59  ;;  %v235_v59 = vld [vmem:[#allocation6 + $0xe0] sm:$0xff]  ;;  %v348_v63 = vpack.c.bf16 %v234_v58, %v233_v57  ;;  %v325_v57 = vld [vmem:[#allocation6 + $0x3b0] sm:$0xff]  ;;  %v326_v58 = vld [vmem:[#allocation6 + $0x3b8] sm:$0xff] }
  0x79   :  { %3856 = vmatprep.mubr.bf16.mxu1 %v373_v60  ;;  %v236_v60 = vld [vmem:[#allocation6 + $0xe8] sm:$0xff] }
  0x7a   :  { %v349_v2 = vpack.c.bf16 %v236_v60, %v235_v59  ;;  %v327_v60 = vld [vmem:[#allocation6 + $0x3c0] sm:$0xff] }
  0x7e   :  { %3785 = vmatmul.mubr.bf16.gmra.mxu0 %v338_v3  ;;  %v384_v3 = vpack.c.bf16 %v306_v62, %v305_v61  ;;  %v328_v61 = vld [vmem:[#allocation6 + $0x3c8] sm:$0xff] }
  0x7f   :  { %3788 = vmatprep.mubr.bf16.mxu0 %v339_v6  ;;  %v238_v6 = vld [vmem:[#allocation6 + $0xf8] sm:$0xff]  ;;  %v395_v0 = vpack.c.bf16 %v328_v61, %v327_v60 }
  0x80   :  { %3857 = vmatmul.mubr.bf16.gmra.mxu1 %v374_v7  ;;  %v239_v7 = vld [vmem:[#allocation6 + $0x100] sm:$0xff]  ;;  %v350_v11 = vpack.c.bf16 %v238_v6, %v237_v5  ;;  %v329_v5 = vld [vmem:[#allocation6 + $0x3d0] sm:$0xff]  ;;  %v330_v6 = vld [vmem:[#allocation6 + $0x3d8] sm:$0xff] }
  0x81   :  { %3860 = vmatprep.mubr.bf16.mxu1 %v375_v8  ;;  %v240_v8 = vld [vmem:[#allocation6 + $0x108] sm:$0xff] }
  0x82   :  { %v351_v14 = vpack.c.bf16 %v240_v8, %v239_v7  ;;  %v331_v8 = vld [vmem:[#allocation6 + $0x3e0] sm:$0xff] }
  0x86   :  { %3789 = vmatmul.mubr.bf16.gmra.mxu0 %v340_v15  ;;  %v386_v15 = vpack.c.bf16 %v310_v10, %v309_v9  ;;  %v332_v9 = vld [vmem:[#allocation6 + $0x3e8] sm:$0xff] }
  0x87   :  { %3792 = vmatprep.mubr.bf16.mxu0 %v341_v18  ;;  %v242_v18 = vld [vmem:[#allocation6 + $0x118] sm:$0xff]  ;;  %v397_v12 = vpack.c.bf16 %v332_v9, %v331_v8 }
  0x88   :  { %3861 = vmatmul.mubr.bf16.gmra.mxu1 %v376_v19  ;;  %v243_v19 = vld [vmem:[#allocation6 + $0x120] sm:$0xff]  ;;  %v352_v23 = vpack.c.bf16 %v242_v18, %v241_v17 }
  0x89   :  { %3864 = vmatprep.mubr.bf16.mxu1 %v377_v20  ;;  %v244_v20 = vld [vmem:[#allocation6 + $0x128] sm:$0xff] }
  0x8a   :  { %v353_v26 = vpack.c.bf16 %v244_v20, %v243_v19  ;;  %v4225_v19 = vmov 1966171168  }
  0x8b   :  { %v1011_v20 = vunpack.c.l.s4 %v4225_v19 }
  0x8e   :  { %3793 = vmatmul.mubr.bf16.gmra.mxu0 %v342_v27  ;;  %v388_v27 = vpack.c.bf16 %v314_v22, %v313_v21  ;;  %v1013_v21 = vlaneseq  ;;  %v1012_v22 = vunpack.c.0.s8 %v1011_v20 }
  0x8f   :  { %3796 = vmatprep.mubr.bf16.mxu0 %v343_v30  ;;  %v246_v30 = vld [vmem:[#allocation6 + $0x138] sm:$0xff] }
  0x90   :  { %3865 = vmatmul.mubr.bf16.gmra.mxu1 %v378_v31  ;;  %v247_v31 = vld [vmem:[#allocation6 + $0x140] sm:$0xff]  ;;  %v354_v35 = vpack.c.bf16 %v246_v30, %v245_v29 }
  0x91   :  { %3868 = vmatprep.mubr.bf16.mxu1 %v379_v32  ;;  %v248_v32 = vld [vmem:[#allocation6 + $0x148] sm:$0xff] }
  0x92   :  { %v355_v38 = vpack.c.bf16 %v248_v32, %v247_v31 }
  0x96   :  { %3797 = vmatmul.mubr.bf16.gmra.mxu0 %v344_v39  ;;  %v390_v39 = vpack.c.bf16 %v318_v34, %v317_v33 }
  0x97   :  { %3800 = vmatprep.mubr.bf16.mxu0 %v345_v42  ;;  %v250_v42 = vld [vmem:[#allocation6 + $0x158] sm:$0xff] }
  0x98   :  { %3869 = vmatmul.mubr.bf16.gmra.mxu1 %v380_v43  ;;  %v251_v43 = vld [vmem:[#allocation6 + $0x160] sm:$0xff]  ;;  %v356_v47 = vpack.c.bf16 %v250_v42, %v249_v41 }
  0x99   :  { %3872 = vmatprep.mubr.bf16.mxu1 %v381_v44  ;;  %v252_v44 = vld [vmem:[#allocation6 + $0x168] sm:$0xff] }
  0x9a   :  { %v357_v50 = vpack.c.bf16 %v252_v44, %v251_v43 }
  0x9e   :  { %3801 = vmatmul.mubr.bf16.gmra.mxu0 %v346_v51  ;;  %v392_v51 = vpack.c.bf16 %v322_v46, %v321_v45 }
  0x9f   :  { %3804 = vmatprep.mubr.bf16.mxu0 %v347_v54  ;;  %v254_v54 = vld [vmem:[#allocation6 + $0x178] sm:$0xff] }
  0xa0   :  { %3873 = vmatmul.mubr.bf16.gmra.mxu1 %v382_v55  ;;  %v255_v55 = vld [vmem:[#allocation6 + $0x180] sm:$0xff]  ;;  %v358_v59 = vpack.c.bf16 %v254_v54, %v253_v53 }
  0xa1   :  { %3876 = vmatprep.mubr.bf16.mxu1 %v383_v56  ;;  %v256_v56 = vld [vmem:[#allocation6 + $0x188] sm:$0xff] }
  0xa2   :  { %v359_v62 = vpack.c.bf16 %v256_v56, %v255_v55 }
  0xa6   :  { %3805 = vmatmul.mubr.bf16.gmra.mxu0 %v348_v63  ;;  %v394_v63 = vpack.c.bf16 %v326_v58, %v325_v57 }
  0xa7   :  { %3808 = vmatprep.mubr.bf16.mxu0 %v349_v2  ;;  %v258_v2 = vld [vmem:[#allocation6 + $0x198] sm:$0xff] }
  0xa8   :  { %3877 = vmatmul.mubr.bf16.gmra.mxu1 %v384_v3  ;;  %v259_v3 = vld [vmem:[#allocation6 + $0x1a0] sm:$0xff]  ;;  %v360_v7 = vpack.c.bf16 %v258_v2, %v257_v1 }
  0xa9   :  { %3880 = vmatprep.mubr.bf16.mxu1 %v385_v4  ;;  %v260_v4 = vld [vmem:[#allocation6 + $0x1a8] sm:$0xff] }
  0xaa   :  { %v361_v10 = vpack.c.bf16 %v260_v4, %v259_v3 }
  0xae   :  { %3809 = vmatmul.mubr.bf16.gmra.mxu0 %v350_v11  ;;  %v396_v11 = vpack.c.bf16 %v330_v6, %v329_v5 }
  0xaf   :  { %3812 = vmatprep.mubr.bf16.mxu0 %v351_v14  ;;  %v262_v14 = vld [vmem:[#allocation6 + $0x1b8] sm:$0xff] }
  0xb0   :  { %3881 = vmatmul.mubr.bf16.gmra.mxu1 %v386_v15  ;;  %v333_v15 = vld [vmem:[#allocation6 + $0x3f0] sm:$0xff]  ;;  %v362_v17 = vpack.c.bf16 %v262_v14, %v261_v13 }
  0xb1   :  { %3884 = vmatprep.mubr.bf16.mxu1 %v387_v16  ;;  %v334_v16 = vld [vmem:[#allocation6 + $0x3f8] sm:$0xff] }
  0xb2   :  { %v398_v18 = vpack.c.bf16 %v334_v16, %v333_v15 }
  0xb6   :  { %3813 = vmatmul.mubr.bf16.gmra.mxu0 %v352_v23  ;;  %v4328_v23 = vshrl.u32 %v1013_v21, 7 }
  0xb7   :  { %3816 = vmatprep.mubr.bf16.mxu0 %v353_v26  ;;  %v3654_v26 = vld [vmem:[%s5746_s5] ss:$0 sm:$0xff] }
  0xb8   :  { %3885 = vmatmul.mubr.bf16.gmra.mxu1 %v388_v27  ;;  %v4346_v43 = vsub.s32 0, %v4328_v23 }
  0xb9   :  { %3888 = vmatprep.mubr.bf16.mxu1 %v389_v28  ;;  %v4337_v28 = vsub.s32 %v1012_v22, %v4328_v23 }
  0xba   :  { %5754 = vst [vmem:[#allocation19_spill] sm:$0xff] %v4346_v43 }
  0xbe   :  { %3817 = vmatmul.mubr.bf16.gmra.mxu0 %v354_v35 }
  0xbf   :  { %3820 = vmatprep.mubr.bf16.mxu0 %v355_v38 }
  0xc0   :  { %3889 = vmatmul.mubr.bf16.gmra.mxu1 %v390_v39 }
  0xc1   :  { %3892 = vmatprep.mubr.bf16.mxu1 %v391_v40 }
  0xc6   :  { %3821 = vmatmul.mubr.bf16.gmra.mxu0 %v356_v47 }
  0xc7   :  { %3824 = vmatprep.mubr.bf16.mxu0 %v357_v50 }
  0xc8   :  { %3893 = vmatmul.mubr.bf16.gmra.mxu1 %v392_v51 }
  0xc9   :  { %3896 = vmatprep.mubr.bf16.mxu1 %v393_v52 }
  0xce   :  { %3825 = vmatmul.mubr.bf16.gmra.mxu0 %v358_v59 }
  0xcf   :  { %3828 = vmatprep.mubr.bf16.mxu0 %v359_v62 }
  0xd0   :  { %3897 = vmatmul.mubr.bf16.gmra.mxu1 %v394_v63  ;;  %v205_v63 = vld [vmem:[%s5747_s6] sm:$0x1]  ;;  %s4226_s6 = smov [#allocation12]  }
  0xd1   :  { %3900 = vmatprep.mubr.bf16.mxu1 %v395_v0  ;;  %v206_v3 = vpack.c.bf16 %v205_v63, %v205_v63  ;;  %s3630_s29 = sshll.u32 %s4226_s6, 4  ;;  %s3631_s29 = int_to_ptr.vmem [resolvable:$true] %s3630_s29 }
  0xd2   :  { %s4165_s30 = scalar_lea.vmem %s3631_s29, 128  ;;  %p4170_p7 = scmp.lt.s32.totalorder %s3631_s29, %s3631_s29 }
  0xd3   :  { %v1355_v9 = vpack.i.b16 %v206_v3, %v206_v3  ;;  %p4166_p6 = scmp.ne.s32.totalorder %s3631_s29, %s4165_s30  ;;  %p4171_p8 = scmp.lt.s32.totalorder %s4165_s30, %s4165_s30 }
  0xd5   :  { %v4378_v16 = vrot.slane %v1355_v9, %v4346_v43  ;;  %p4172_p9 = por %p4171_p8, %p4170_p7 }
  0xd6   :  { %3829 = vmatmul.mubr.bf16.gmra.mxu0 %v360_v7 }
  0xd7   :  { %3832 = vmatprep.mubr.bf16.mxu0 %v361_v10  ;;  %p4173_p10 = pnand %p4172_p9, %p4166_p6 }
  0xd8   :  { %3901 = vmatmul.mubr.bf16.gmra.mxu1 %v396_v11 }
  0xd9   :  { %3904 = vmatprep.mubr.bf16.mxu1 %v397_v12 }
  0xde   :  { %3833 = vmatmul.mubr.bf16.gmra.mxu0 %v362_v17 }
  0xe0   :  { %3905 = vmatmul.mubr.bf16.gmra.mxu1 %v398_v18 }
 0x116   :  { %v191_v25 = vpop.f32.mrf.mxu0 }
 0x117   :  { %v192_v27 = vadd.f32 %v3645_v24, %v191_v25 }
 0x118   :  { %v3838_v29 = vpop.f32.mrf.mxu1  ;;  %v3762_v30 = vpop.f32.mrf.mxu0 }
 0x119   :  { %v204_v31 = vadd.f32 %v3654_v26, %v192_v27 }
 0x11a   :  { %v721_v32 = vpop.f32.mrf.mxu1  ;;  %v194_v33 = vpop.f32.mrf.mxu0 }
 0x11b   :  { %v1016_v34 = vrot.slane %v204_v31, %v4337_v28  ;;  %v1009_v41 = vcombine.high %v204_v31, %v204_v31 }
 0x11c   :  { %v3839_v35 = vpop.f32.mrf.mxu1  ;;  %v3763_v36 = vpop.f32.mrf.mxu0 }
 0x11d   :  { %v1024_v37 = vcombine.high %v1016_v34, %v1016_v34  ;;  %v4352_v47 = vrot.slane %v1009_v41, %v4337_v28  ;;  %v4382_v20 = vrot.slane %v1016_v34, %v4337_v28 }
 0x11e   :  { %v724_v38 = vpop.f32.mrf.mxu1 }
 0x11f   :  { %v4341_v39 = vrot.slane %v1024_v37, %v4337_v28  ;;  %v4362_v58 = vrot.slane %v4352_v47, %v4337_v28  ;;  %v4389_v33 = vrot.slane %v4382_v20, %v4346_v43 }
 0x120   :  { %v3842_v40 = vpop.f32.mrf.mxu1 }
 0x121   :  { %v1056_v42 = vcombine.high %v4341_v39, %v4341_v39  ;;  %v4371_v1 = vrot.slane %v4362_v58, %v4346_v43 }
 0x122   :  { %v737_v44 = vpop.f32.mrf.mxu1 }
 0x123   :  { %v4349_v45 = vrot.slane %v1056_v42, %v4346_v43 }
 0x124   :  { %v3843_v46 = vpop.f32.mrf.mxu1 }
 0x125   :  { %v1156_v48 = vadd.f32 %v3838_v29, %v4349_v45  ;;  %v1154_v49 = vadd.f32 %v4349_v45, %v721_v32  ;;  %v1157_v50 = vadd.f32 %v3839_v35, %v4349_v45  ;;  %v1155_v51 = vadd.f32 %v4349_v45, %v724_v38 }
 0x126   :  { %v740_v52 = vpop.f32.mrf.mxu1  ;;  %v1160_v54 = vadd.f32 %v3842_v40, %v4349_v45  ;;  %v1161_v55 = vadd.f32 %v3843_v46, %v4349_v45  ;;  %v1158_v60 = vadd.f32 %v4349_v45, %v737_v44 }
 0x127   :  { %v1255_v53 = vpack.c.bf16 %v1157_v50, %v1156_v48  ;;  %v1254_v56 = vpack.c.bf16 %v1155_v51, %v1154_v49  ;;  %v1159_v62 = vadd.f32 %v4349_v45, %v740_v52 }
 0x128   :  { %v3846_v57 = vpop.f32.mrf.mxu1  ;;  %v1257_v61 = vpack.c.bf16 %v1161_v55, %v1160_v54 }
 0x129   :  { %3953 = vtanh.bf16 %v1254_v56  ;;  %v1256_v4 = vpack.c.bf16 %v1159_v62, %v1158_v60  ;;  %v1164_v7 = vadd.f32 %v3846_v57, %v4371_v1 }
 0x12a   :  { %v753_v59 = vpop.f32.mrf.mxu1  ;;  %3955 = vtanh.bf16 %v1255_v53 }
 0x12b   :  { %3957 = vtanh.bf16 %v1257_v61  ;;  %v1162_v13 = vadd.f32 %v4371_v1, %v753_v59 }
 0x12c   :  { %v3847_v0 = vpop.f32.mrf.mxu1  ;;  %3959 = vtanh.bf16 %v1256_v4 }
 0x12d   :  { %v1165_v5 = vadd.f32 %v3847_v0, %v4371_v1 }
 0x12e   :  { %v756_v2 = vpop.f32.mrf.mxu1 }
 0x12f   :  { %v1259_v10 = vpack.c.bf16 %v1165_v5, %v1164_v7  ;;  %v1163_v11 = vadd.f32 %v4371_v1, %v756_v2 }
 0x130   :  { %v3850_v6 = vpop.f32.mrf.mxu1 }
 0x131   :  { %3961 = vtanh.bf16 %v1259_v10  ;;  %v1258_v17 = vpack.c.bf16 %v1163_v11, %v1162_v13  ;;  %v1168_v26 = vadd.f32 %v3850_v6, %v4371_v1 }
 0x132   :  { %v769_v8 = vpop.f32.mrf.mxu1 }
 0x133   :  { %3963 = vtanh.bf16 %v1258_v17  ;;  %v1166_v41 = vadd.f32 %v4371_v1, %v769_v8 }
 0x134   :  { %v3851_v12 = vpop.f32.mrf.mxu1 }
 0x135   :  { %v1169_v18 = vadd.f32 %v3851_v12, %v4371_v1 }
 0x136   :  { %v772_v14 = vpop.f32.mrf.mxu1  ;;  %v3782_v15 = vpop.f32.mrf.mxu0 }
 0x137   :  { %v3954_v19 = vpop.eup %3953  ;;  %v1261_v31 = vpack.c.bf16 %v1169_v18, %v1168_v26  ;;  %v1167_v32 = vadd.f32 %v4371_v1, %v772_v14  ;;  %v1100_v50 = vadd.f32 %v3782_v15, %v4389_v33 }
 0x138   :  { %v3854_v22 = vpop.f32.mrf.mxu1  ;;  %v497_v24 = vpop.f32.mrf.mxu0  ;;  %v1389_v30 = vmul.bf16 %v3954_v19, %v4378_v16 }
 0x139   :  { %v3956_v25 = vpop.eup %3955  ;;  %3965 = vtanh.bf16 %v1261_v31  ;;  %v1260_v48 = vpack.c.bf16 %v1167_v32, %v1166_v41  ;;  %v1172_v57 = vadd.f32 %v3854_v22, %v4371_v1  ;;  %v1098_v10 = vadd.f32 %v4389_v33, %v497_v24 }
 0x13a   :  { %v785_v27 = vpop.f32.mrf.mxu1  ;;  %v3783_v29 = vpop.f32.mrf.mxu0  ;;  %v1482_v34 = vunpack.c.h.bf16 %v1389_v30  ;;  %v1481_v36 = vunpack.c.l.bf16 %v1389_v30  ;;  %v1390_v38 = vmul.bf16 %v3956_v25, %v4378_v16 }
 0x13b   :  { %v3958_v40 = vpop.eup %3957  ;;  %v1101_v42 = vadd.f32 %v3783_v29, %v4389_v33  ;;  %3967 = vtanh.bf16 %v1260_v48  ;;  %v1170_v18 = vadd.f32 %v4371_v1, %v785_v27 }
 0x13c   :  { %v3855_v35 = vpop.f32.mrf.mxu1  ;;  %v500_v37 = vpop.f32.mrf.mxu0  ;;  %1667 = vadd.xlane.f32.xlu1 %v1482_v34  ;;  %1665 = vadd.xlane.f32.xlu0 %v1481_v36  ;;  %v1484_v52 = vunpack.c.h.bf16 %v1390_v38  ;;  %v1483_v53 = vunpack.c.l.bf16 %v1390_v38  ;;  %v1392_v55 = vmul.bf16 %v3958_v40, %v4378_v16  ;;  %v1025_v34 = vcombine.high %v4352_v47, %v4352_v47 }
 0x13d   :  { %v1173_v49 = vadd.f32 %v3855_v35, %v4371_v1  ;;  %v3960_v56 = vpop.eup %3959  ;;  %v1227_v59 = vpack.c.bf16 %v1101_v42, %v1100_v50  ;;  %v1099_v6 = vadd.f32 %v4389_v33, %v500_v37 }
 0x13e   :  { %v788_v44 = vpop.f32.mrf.mxu1  ;;  %v3786_v46 = vpop.f32.mrf.mxu0  ;;  %v1488_v0 = vunpack.c.h.bf16 %v1392_v55  ;;  %v1487_v2 = vunpack.c.l.bf16 %v1392_v55  ;;  %v1391_v4 = vmul.bf16 %v3960_v56, %v4378_v16  ;;  %v4428_v47 = vrot.slane %v1025_v34, %v4337_v28 }
 0x13f   :  { %v1263_v62 = vpack.c.bf16 %v1173_v49, %v1172_v57  ;;  %v3962_v5 = vpop.eup %3961  ;;  %3969 = vtanh.bf16 %v1227_v59  ;;  %v1171_v9 = vadd.f32 %v4371_v1, %v788_v44  ;;  %v1226_v19 = vpack.c.bf16 %v1099_v6, %v1098_v10 }
 0x140   :  { %v4396_v51 = vpop.f32.mrf.mxu1  ;;  %v513_v54 = vpop.f32.mrf.mxu0  ;;  %1671 = vadd.xlane.f32.xlu1 %v1484_v52  ;;  %1669 = vadd.xlane.f32.xlu0 %v1483_v53  ;;  %v1486_v12 = vunpack.c.h.bf16 %v1391_v4  ;;  %v1485_v13 = vunpack.c.l.bf16 %v1391_v4  ;;  %v1394_v15 = vmul.bf16 %v3962_v5, %v4378_v16  ;;  %v1104_v27 = vadd.f32 %v3786_v46, %v4389_v33 }
 0x141   :  { %3971 = vtanh.bf16 %v1263_v62  ;;  %v3964_v17 = vpop.eup %3963  ;;  %v1262_v25 = vpack.c.bf16 %v1171_v9, %v1170_v18  ;;  %v1102_v46 = vadd.f32 %v4389_v33, %v513_v54  ;;  %v4441_v54 = vrot.slane %v4428_v47, %v4346_v43 }
 0x142   :  { %v4400_v60 = vpop.f32.mrf.mxu1  ;;  %v3787_v61 = vpop.f32.mrf.mxu0  ;;  %v1492_v30 = vunpack.c.h.bf16 %v1394_v15  ;;  %v1491_v31 = vunpack.c.l.bf16 %v1394_v15  ;;  %v1393_v32 = vmul.bf16 %v3964_v17, %v4378_v16  ;;  %3973 = vtanh.bf16 %v1226_v19 }
 0x143   :  { %v1105_v26 = vadd.f32 %v3787_v61, %v4389_v33  ;;  %3975 = vtanh.bf16 %v1262_v25  ;;  %v1176_v4 = vadd.f32 %v4396_v51, %v4371_v1 }
 0x144   :  { %v4402_v63 = vpop.f32.mrf.mxu1  ;;  %v516_v3 = vpop.f32.mrf.mxu0  ;;  %1679 = vadd.xlane.f32.xlu1 %v1488_v0  ;;  %1677 = vadd.xlane.f32.xlu0 %v1487_v2  ;;  %v1490_v42 = vunpack.c.h.bf16 %v1393_v32  ;;  %v1489_v44 = vunpack.c.l.bf16 %v1393_v32 }
 0x145   :  { %v1229_v37 = vpack.c.bf16 %v1105_v26, %v1104_v27  ;;  %v1103_v38 = vadd.f32 %v4389_v33, %v516_v3  ;;  %v1177_v2 = vadd.f32 %v4402_v63, %v4371_v1 }
 0x146   :  { %v4406_v7 = vpop.f32.mrf.mxu1  ;;  %v3790_v8 = vpop.f32.mrf.mxu0 }
 0x147   :  { %v3966_v35 = vpop.eup %3965  ;;  %3977 = vtanh.bf16 %v1229_v37  ;;  %v1228_v52 = vpack.c.bf16 %v1103_v38, %v1102_v46  ;;  %v1108_v0 = vadd.f32 %v3790_v8, %v4389_v33  ;;  %v1265_v17 = vpack.c.bf16 %v1177_v2, %v1176_v4 }
 0x148   :  { %v4410_v11 = vpop.f32.mrf.mxu1  ;;  %v4412_v14 = vpop.f32.mrf.mxu0  ;;  %1675 = vadd.xlane.f32.xlu1 %v1486_v12  ;;  %1673 = vadd.xlane.f32.xlu0 %v1485_v13  ;;  %v1396_v48 = vmul.bf16 %v3966_v35, %v4378_v16 }
 0x149   :  { %v3968_v49 = vpop.eup %3967  ;;  %3979 = vtanh.bf16 %v1228_v52  ;;  %v1180_v15 = vadd.f32 %v4410_v11, %v4441_v54  ;;  %v1106_v32 = vadd.f32 %v4389_v33, %v4412_v14 }
 0x14a   :  { %v4416_v22 = vpop.f32.mrf.mxu1  ;;  %v3791_v24 = vpop.f32.mrf.mxu0  ;;  %v1496_v59 = vunpack.c.h.bf16 %v1396_v48  ;;  %v1495_v61 = vunpack.c.l.bf16 %v1396_v48  ;;  %v1395_v28 = vmul.bf16 %v3968_v49, %v4378_v16  ;;  %v1175_v49 = vadd.f32 %v4371_v1, %v4406_v7 }
 0x14b   :  { %v1109_v53 = vadd.f32 %v3791_v24, %v4389_v33  ;;  %v1178_v14 = vadd.f32 %v4441_v54, %v4416_v22 }
 0x14c   :  { %v3863_v29 = vpop.f32.mrf.mxu1  ;;  %1687 = vadd.xlane.f32.xlu1 %v1492_v30  ;;  %1685 = vadd.xlane.f32.xlu0 %v1491_v31  ;;  %v532_v40 = vpop.f32.mrf.mxu0  ;;  %v1494_v12 = vunpack.c.h.bf16 %v1395_v28  ;;  %v1493_v8 = vunpack.c.l.bf16 %v1395_v28 }
 0x14d   :  { %v3970_v55 = vpop.eup %3969  ;;  %v1231_v5 = vpack.c.bf16 %v1109_v53, %v1108_v0  ;;  %v1181_v6 = vadd.f32 %v3863_v29, %v4441_v54  ;;  %v1107_v19 = vadd.f32 %v4389_v33, %v532_v40  ;;  %v1174_v53 = vadd.f32 %v4371_v1, %v4400_v60 }
 0x14e   :  { %v820_v36 = vpop.f32.mrf.mxu1  ;;  %v4434_v56 = vpop.f32.mrf.mxu0  ;;  %v1362_v63 = vmul.bf16 %v3970_v55, %v4378_v16 }
 0x14f   :  { %v3972_v62 = vpop.eup %3971  ;;  %3981 = vtanh.bf16 %v1231_v5  ;;  %v1267_v18 = vpack.c.bf16 %v1181_v6, %v1180_v15  ;;  %v1230_v35 = vpack.c.bf16 %v1107_v19, %v1106_v32  ;;  %v1179_v34 = vadd.f32 %v4441_v54, %v820_v36 }
 0x150   :  { %v4424_v41 = vpop.f32.mrf.mxu1  ;;  %1683 = vadd.xlane.f32.xlu1 %v1490_v42  ;;  %1681 = vadd.xlane.f32.xlu0 %v1489_v44  ;;  %v4451_v9 = vpop.f32.mrf.mxu0  ;;  %v1398_v13 = vmul.bf16 %v3972_v62, %v4378_v16  ;;  %v1427_v30 = vunpack.c.l.bf16 %v1362_v63  ;;  %3983 = vtanh.bf16 %v1265_v17  ;;  %v1428_v40 = vunpack.c.h.bf16 %v1362_v63 }
 0x151   :  { %v3974_v25 = vpop.eup %3973  ;;  %3985 = vtanh.bf16 %v1267_v18  ;;  %v1266_v36 = vpack.c.bf16 %v1179_v34, %v1178_v14  ;;  %v1112_v62 = vadd.f32 %v4434_v56, %v4389_v33  ;;  %v1264_v0 = vpack.c.bf16 %v1175_v49, %v1174_v53 }
 0x152   :  { %v4431_v50 = vpop.f32.mrf.mxu1  ;;  %v3795_v26 = vpop.f32.mrf.mxu0  ;;  %v1499_v29 = vunpack.c.l.bf16 %v1398_v13  ;;  %v1500_v38 = vunpack.c.h.bf16 %v1398_v13  ;;  %v1361_v44 = vmul.bf16 %v3974_v25, %v4378_v16  ;;  %3987 = vtanh.bf16 %v1230_v35 }
 0x153   :  { %v3976_v31 = vpop.eup %3975  ;;  %v1113_v52 = vadd.f32 %v3795_v26, %v4389_v33  ;;  %3989 = vtanh.bf16 %v1266_v36  ;;  %v1184_v13 = vadd.f32 %v4424_v41, %v4441_v54 }
 0x154   :  { %v4436_v57 = vpop.f32.mrf.mxu1  ;;  %1695 = vadd.xlane.f32.xlu1 %v1496_v59  ;;  %1693 = vadd.xlane.f32.xlu0 %v1495_v61  ;;  %v548_v27 = vpop.f32.mrf.mxu0  ;;  %v1397_v42 = vmul.bf16 %v3976_v31, %v4378_v16  ;;  %v1425_v22 = vunpack.c.l.bf16 %v1361_v44  ;;  %v1426_v6 = vunpack.c.h.bf16 %v1361_v44  ;;  %3991 = vtanh.bf16 %v1264_v0 }
 0x155   :  { %v3978_v48 = vpop.eup %3977  ;;  %v1233_v4 = vpack.c.bf16 %v1113_v52, %v1112_v62  ;;  %v1185_v1 = vadd.f32 %v4436_v57, %v4441_v54  ;;  %v1111_v15 = vadd.f32 %v4389_v33, %v548_v27 }
 0x156   :  { %v4446_v3 = vpop.f32.mrf.mxu1  ;;  %v4482_v55 = vpop.f32.mrf.mxu0  ;;  %v1498_v61 = vunpack.c.h.bf16 %v1397_v42  ;;  %v1364_v28 = vmul.bf16 %v3978_v48, %v4378_v16  ;;  %v1497_v25 = vunpack.c.l.bf16 %v1397_v42  ;;  %v1182_v48 = vadd.f32 %v4441_v54, %v4431_v50 }
 0x157   :  { %v3980_v7 = vpop.eup %3979  ;;  %3993 = vtanh.bf16 %v1233_v4  ;;  %v1269_v57 = vpack.c.bf16 %v1185_v1, %v1184_v13  ;;  %v1183_v35 = vadd.f32 %v4441_v54, %v4446_v3 }
 0x158   :  { %v4453_v10 = vpop.f32.mrf.mxu1  ;;  %1691 = vadd.xlane.f32.xlu1 %v1494_v12  ;;  %1689 = vadd.xlane.f32.xlu0 %v1493_v8  ;;  %v4493_v60 = vpop.f32.mrf.mxu0  ;;  %v1432_v12 = vunpack.c.h.bf16 %v1364_v28  ;;  %v4498_v8 = vmul.bf16 %v3980_v7, %v4378_v16 }
 0x159   :  { %3995 = vtanh.bf16 %v1269_v57  ;;  %v1268_v14 = vpack.c.bf16 %v1183_v35, %v1182_v48  ;;  %v1188_v13 = vadd.f32 %v4453_v10, %v4441_v54 }
 0x15a   :  { %v4459_v51 = vpop.f32.mrf.mxu1  ;;  %v3799_v18 = vpop.f32.mrf.mxu0  ;;  %v1430_v26 = vunpack.c.h.bf16 %v4498_v8 }
 0x15c   :  { %v4462_v24 = vpop.f32.mrf.mxu1  ;;  %1701 = vadd.xlane.f32.xlu0 %v1499_v29  ;;  %1557 = vadd.xlane.f32.xlu1 %v1427_v30  ;;  %v1110_v30 = vadd.f32 %v4389_v33, %v4451_v9  ;;  %v564_v34 = vpop.f32.mrf.mxu0  ;;  %v4526_v9 = vrot.slane %v4341_v39, %v4346_v43 }
 0x15d   :  { %v3982_v56 = vpop.eup %3981  ;;  %v1189_v62 = vadd.f32 %v4462_v24, %v4441_v54  ;;  %v1055_v24 = vcombine.high %v4362_v58, %v4362_v58 }
 0x15e   :  { %v4466_v11 = vpop.f32.mrf.mxu1  ;;  %v3984_v17 = vpop.eup %3983  ;;  %v4509_v29 = vmul.bf16 %v3982_v56, %v4378_v16  ;;  %v1232_v32 = vpack.c.bf16 %v1111_v15, %v1110_v30  ;;  %v1117_v49 = vadd.f32 %v3799_v18, %v4526_v9  ;;  %v1116_v50 = vadd.f32 %v4482_v55, %v4526_v9 }
 0x15f   :  { %v3986_v41 = vpop.eup %3985  ;;  %v1400_v42 = vmul.bf16 %v3984_v17, %v4378_v16  ;;  %v4533_v36 = vpop.f32.mrf.mxu0  ;;  %v1271_v15 = vpack.c.bf16 %v1189_v62, %v1188_v13  ;;  %v4572_v58 = vrot.slane %v1055_v24, %v4346_v43  ;;  %v1115_v35 = vadd.f32 %v4526_v9, %v564_v34 }
 0x160   :  { %v4469_v37 = vpop.f32.mrf.mxu1  ;;  %1703 = vadd.xlane.f32.xlu0 %v1500_v38  ;;  %1559 = vadd.xlane.f32.xlu1 %v1428_v40  ;;  %v1431_v38 = vunpack.c.l.bf16 %v1364_v28  ;;  %v1436_v40 = vunpack.c.h.bf16 %v4509_v29  ;;  %v4522_v44 = vmul.bf16 %v3986_v41, %v4378_v16  ;;  %v3988_v33 = vpop.eup %3987  ;;  %3997 = vtanh.bf16 %v1232_v32 }
 0x161   :  { %v1503_v53 = vunpack.c.l.bf16 %v1400_v42  ;;  %v4539_v39 = vmul.bf16 %v3988_v33, %v4378_v16  ;;  %3999 = vtanh.bf16 %v1268_v14  ;;  %v1235_v7 = vpack.c.bf16 %v1117_v49, %v1116_v50  ;;  %v4547_v4 = vpop.f32.mrf.mxu0 }
 0x162   :  { %v4477_v46 = vpop.f32.mrf.mxu1  ;;  %v1114_v14 = vadd.f32 %v4526_v9, %v4493_v60 }
 0x163   :  { %4001 = vtanh.bf16 %v1235_v7  ;;  %v3803_v17 = vpop.f32.mrf.mxu0 }
 0x164   :  { %v4484_v59 = vpop.f32.mrf.mxu1  ;;  %1699 = vadd.xlane.f32.xlu1 %v1498_v61  ;;  %1553 = vadd.xlane.f32.xlu0 %v1425_v22  ;;  %v1507_v61 = vunpack.c.l.bf16 %v4522_v44  ;;  %v3990_v22 = vpop.eup %3989  ;;  %4003 = vtanh.bf16 %v1271_v15  ;;  %v1234_v34 = vpack.c.bf16 %v1115_v35, %v1114_v14  ;;  %v1435_v15 = vunpack.c.l.bf16 %v4509_v29 }
 0x165   :  { %v3992_v0 = vpop.eup %3991  ;;  %v4553_v56 = vmul.bf16 %v3990_v22, %v4378_v16 }
 0x166   :  { %v4489_v2 = vpop.f32.mrf.mxu1  ;;  %v3994_v55 = vpop.eup %3993  ;;  %v1399_v41 = vmul.bf16 %v3992_v0, %v4378_v16  ;;  %4005 = vtanh.bf16 %v1234_v34 }
 0x167   :  { %v4567_v10 = vmul.bf16 %v3994_v55, %v4378_v16  ;;  %v3996_v30 = vpop.eup %3995  ;;  %v1121_v55 = vadd.f32 %v3803_v17, %v4526_v9 }
 0x168   :  { %v4495_v5 = vpop.f32.mrf.mxu1  ;;  %1555 = vadd.xlane.f32.xlu0 %v1426_v6  ;;  %1567 = vadd.xlane.f32.xlu1 %v1432_v12  ;;  %v1504_v6 = vunpack.c.h.bf16 %v1400_v42  ;;  %v1434_v12 = vunpack.c.h.bf16 %v4539_v39  ;;  %v4577_v33 = vmul.bf16 %v3996_v30, %v4378_v16  ;;  %v1502_v7 = vunpack.c.h.bf16 %v1399_v41 }
 0x169   :  { %v1440_v42 = vunpack.c.h.bf16 %v4567_v10  ;;  %v1193_v30 = vadd.f32 %v4484_v59, %v4441_v54  ;;  %v1433_v59 = vunpack.c.l.bf16 %v4539_v39 }
 0x16a   :  { %v4502_v63 = vpop.f32.mrf.mxu1  ;;  %v1512_v62 = vunpack.c.h.bf16 %v4577_v33 }
 0x16c   :  { %v4505_v19 = vpop.f32.mrf.mxu1  ;;  %1697 = vadd.xlane.f32.xlu0 %v1497_v25  ;;  %1563 = vadd.xlane.f32.xlu1 %v1430_v26  ;;  %v1429_v25 = vunpack.c.l.bf16 %v4498_v8  ;;  %v1505_v26 = vunpack.c.l.bf16 %v4553_v56 }
 0x16e   :  { %v4513_v31 = vpop.f32.mrf.mxu1  ;;  %v3998_v48 = vpop.eup %3997 }
 0x16f   :  { %v4592_v0 = vmul.bf16 %v3998_v48, %v4378_v16  ;;  %v4000_v60 = vpop.eup %3999  ;;  %v1192_v48 = vadd.f32 %v4469_v37, %v4441_v54 }
 0x170   :  { %v4517_v27 = vpop.f32.mrf.mxu1  ;;  %1565 = vadd.xlane.f32.xlu0 %v1431_v38  ;;  %1575 = vadd.xlane.f32.xlu1 %v1436_v40  ;;  %v580_v38 = vpop.f32.mrf.mxu0  ;;  %v1501_v40 = vunpack.c.l.bf16 %v1399_v41  ;;  %v1120_v41 = vadd.f32 %v4533_v36, %v4526_v9 }
 0x171   :  { %v1273_v36 = vpack.c.bf16 %v1193_v30, %v1192_v48  ;;  %v1119_v14 = vadd.f32 %v4526_v9, %v580_v38  ;;  %v1506_v38 = vunpack.c.h.bf16 %v4553_v56 }
 0x172   :  { %v4530_v3 = vpop.f32.mrf.mxu1  ;;  %v4588_v22 = vpop.f32.mrf.mxu0  ;;  %v1237_v17 = vpack.c.bf16 %v1121_v55, %v1120_v41  ;;  %v1439_v55 = vunpack.c.l.bf16 %v4567_v10 }
 0x173   :  { %v1124_v30 = vadd.f32 %v4588_v22, %v4526_v9 }
 0x174   :  { %v4535_v52 = vpop.f32.mrf.mxu1  ;;  %1709 = vadd.xlane.f32.xlu0 %v1503_v53  ;;  %1717 = vadd.xlane.f32.xlu1 %v1507_v61  ;;  %v1187_v61 = vadd.f32 %v4441_v54, %v4466_v11  ;;  %v4602_v24 = vpop.f32.mrf.mxu0 }
 0x176   :  { %v4543_v28 = vpop.f32.mrf.mxu1  ;;  %v3807_v35 = vpop.f32.mrf.mxu0 }
 0x177   :  { %v1125_v56 = vadd.f32 %v3807_v35, %v4526_v9 }
 0x178   :  { %v4549_v1 = vpop.f32.mrf.mxu1  ;;  %1711 = vadd.xlane.f32.xlu0 %v1504_v6  ;;  %1571 = vadd.xlane.f32.xlu1 %v1434_v12  ;;  %v1186_v6 = vadd.f32 %v4441_v54, %v4459_v51  ;;  %v4607_v51 = vmul.bf16 %v4000_v60, %v4378_v16  ;;  %v596_v34 = vpop.f32.mrf.mxu0 }
 0x179   :  { %v1239_v10 = vpack.c.bf16 %v1125_v56, %v1124_v30 }
 0x17a   :  { %v4557_v57 = vpop.f32.mrf.mxu1  ;;  %v1270_v11 = vpack.c.bf16 %v1187_v61, %v1186_v6  ;;  %v1510_v29 = vunpack.c.h.bf16 %v4607_v51  ;;  %v1190_v6 = vadd.f32 %v4441_v54, %v4477_v46 }
 0x17c   :  { %v4561_v18 = vpop.f32.mrf.mxu1  ;;  %1561 = vadd.xlane.f32.xlu0 %v1429_v25  ;;  %1713 = vadd.xlane.f32.xlu1 %v1505_v26  ;;  %v1438_v25 = vunpack.c.h.bf16 %v4592_v0  ;;  %v4002_v26 = vpop.eup %4001  ;;  %4007 = vtanh.bf16 %v1270_v11 }
 0x17d   :  { %4009 = vtanh.bf16 %v1237_v17 }
 0x17e   :  { %v4569_v32 = vpop.f32.mrf.mxu1  ;;  %4011 = vtanh.bf16 %v1273_v36  ;;  %v1196_v36 = vadd.f32 %v4495_v5, %v4572_v58 }
 0x180   :  { %v3890_v8 = vpop.f32.mrf.mxu1  ;;  %1705 = vadd.xlane.f32.xlu0 %v1501_v40  ;;  %1583 = vadd.xlane.f32.xlu1 %v1440_v42  ;;  %v4616_v40 = vmul.bf16 %v4002_v26, %v4378_v16  ;;  %v4004_v42 = vpop.eup %4003 }
 0x181   :  { %v4582_v49 = vadd.f32 %v3890_v8, %v4572_v58  ;;  %v1508_v8 = vunpack.c.h.bf16 %v4522_v44  ;;  %v1406_v61 = vmul.bf16 %v4004_v42, %v4378_v16  ;;  %v4006_v39 = vpop.eup %4005  ;;  %v1437_v42 = vunpack.c.l.bf16 %v4592_v0 }
 0x182   :  { %v4584_v53 = vpop.f32.mrf.mxu1  ;;  %v1444_v44 = vunpack.c.h.bf16 %v4616_v40 }
 0x183   :  { %v1515_v60 = vunpack.c.l.bf16 %v1406_v61 }
 0x184   :  { %v3891_v50 = vpop.f32.mrf.mxu1  ;;  %1707 = vadd.xlane.f32.xlu0 %v1502_v7  ;;  %1727 = vadd.xlane.f32.xlu1 %v1512_v62  ;;  %v1191_v7 = vadd.f32 %v4441_v54, %v4489_v2  ;;  %v4628_v62 = vpop.f32.mrf.mxu0  ;;  %v1369_v2 = vmul.bf16 %v4006_v39, %v4378_v16  ;;  %v1511_v54 = vunpack.c.l.bf16 %v4577_v33  ;;  %v1194_v39 = vadd.f32 %v4572_v58, %v4502_v63 }
 0x185   :  { %v4597_v12 = vadd.f32 %v3891_v50, %v4572_v58  ;;  %v1118_v50 = vadd.f32 %v4526_v9, %v4547_v4  ;;  %v1201_v63 = vadd.f32 %v4535_v52, %v4572_v58 }
 0x186   :  { %v1272_v4 = vpack.c.bf16 %v1191_v7, %v1190_v6  ;;  %v4633_v11 = vpop.f32.mrf.mxu0  ;;  %v1442_v46 = vunpack.c.h.bf16 %v1369_v2  ;;  %v1443_v7 = vunpack.c.l.bf16 %v4616_v40  ;;  %v1128_v40 = vadd.f32 %v4628_v62, %v4526_v9 }
 0x187   :  { %v1236_v37 = vpack.c.bf16 %v1119_v14, %v1118_v50  ;;  %v1123_v14 = vadd.f32 %v4526_v9, %v596_v34  ;;  %v1122_v50 = vadd.f32 %v4526_v9, %v4602_v24 }
 0x188   :  { %1573 = vadd.xlane.f32.xlu0 %v1435_v15  ;;  %1579 = vadd.xlane.f32.xlu1 %v1438_v25  ;;  %v1516_v15 = vunpack.c.h.bf16 %v1406_v61  ;;  %v3811_v26 = vpop.f32.mrf.mxu0 }
 0x189   :  { %4013 = vtanh.bf16 %v1236_v37  ;;  %v1238_v5 = vpack.c.bf16 %v1123_v14, %v1122_v50  ;;  %v1195_v37 = vadd.f32 %v4572_v58, %v4513_v31  ;;  %v1129_v6 = vadd.f32 %v3811_v26, %v4526_v9 }
 0x18a   :  { %v4008_v25 = vpop.eup %4007  ;;  %4015 = vtanh.bf16 %v1272_v4  ;;  %v1441_v31 = vunpack.c.l.bf16 %v1369_v2  ;;  %v1200_v2 = vadd.f32 %v4517_v27, %v4572_v58 }
 0x18b   :  { %v1405_v41 = vmul.bf16 %v4008_v25, %v4378_v16  ;;  %v4010_v17 = vpop.eup %4009  ;;  %4017 = vtanh.bf16 %v1239_v10  ;;  %v1274_v24 = vpack.c.bf16 %v1195_v37, %v1194_v39  ;;  %v1241_v25 = vpack.c.bf16 %v1129_v6, %v1128_v40 }
 0x18c   :  { %1719 = vadd.xlane.f32.xlu0 %v1508_v8  ;;  %1723 = vadd.xlane.f32.xlu1 %v1510_v29  ;;  %v1197_v8 = vadd.f32 %v4505_v19, %v4572_v58  ;;  %v612_v29 = vpop.f32.mrf.mxu0  ;;  %v1372_v48 = vmul.bf16 %v4010_v17, %v4378_v16  ;;  %v4012_v33 = vpop.eup %4011  ;;  %v1509_v19 = vunpack.c.l.bf16 %v4607_v51  ;;  %v1277_v26 = vpack.c.bf16 %v1201_v63, %v1200_v2 }
 0x18d   :  { %v1514_v35 = vunpack.c.h.bf16 %v1405_v41  ;;  %v4653_v0 = vmul.bf16 %v4012_v33, %v4378_v16  ;;  %v1127_v62 = vadd.f32 %v4526_v9, %v612_v29  ;;  %v1199_v29 = vadd.f32 %v4572_v58, %v4543_v28 }
 0x18e   :  { %v1275_v22 = vpack.c.bf16 %v1197_v8, %v1196_v36  ;;  %v1447_v10 = vunpack.c.l.bf16 %v1372_v48  ;;  %v1204_v6 = vadd.f32 %v4549_v1, %v4572_v58 }
 0x18f   :  { %v1519_v51 = vunpack.c.l.bf16 %v4653_v0 }
 0x190   :  { %1569 = vadd.xlane.f32.xlu0 %v1433_v59  ;;  %1591 = vadd.xlane.f32.xlu1 %v1444_v44  ;;  %v4649_v59 = vpop.f32.mrf.mxu0  ;;  %v1448_v44 = vunpack.c.h.bf16 %v1372_v48  ;;  %4019 = vtanh.bf16 %v1275_v22 }
 0x191   :  { %4021 = vtanh.bf16 %v1238_v5 }
 0x192   :  { %v4659_v34 = vpop.f32.mrf.mxu0  ;;  %4023 = vtanh.bf16 %v1274_v24 }
 0x193   :  { %4025 = vtanh.bf16 %v1241_v25 }
 0x194   :  { %1715 = vadd.xlane.f32.xlu0 %v1506_v38  ;;  %1733 = vadd.xlane.f32.xlu1 %v1515_v60  ;;  %v3815_v4 = vpop.f32.mrf.mxu0  ;;  %4027 = vtanh.bf16 %v1277_v26 }
 0x196   :  { %v628_v56 = vpop.f32.mrf.mxu0 }
 0x197   :  { %v4014_v61 = vpop.eup %4013 }
 0x198   :  { %1581 = vadd.xlane.f32.xlu0 %v1439_v55  ;;  %1735 = vadd.xlane.f32.xlu1 %v1516_v15  ;;  %v1371_v38 = vmul.bf16 %v4014_v61, %v4378_v16  ;;  %v4016_v60 = vpop.eup %4015  ;;  %v4675_v30 = vpop.f32.mrf.mxu0 }
 0x199   :  { %v1407_v15 = vmul.bf16 %v4016_v60, %v4378_v16  ;;  %v4018_v17 = vpop.eup %4017 }
 0x19a   :  { %v1446_v55 = vunpack.c.h.bf16 %v1371_v38  ;;  %v4684_v33 = vpop.f32.mrf.mxu0  ;;  %v1445_v48 = vunpack.c.l.bf16 %v1371_v38 }
 0x19b   :  { %v1518_v8 = vunpack.c.h.bf16 %v1407_v15 }
 0x19c   :  { %1725 = vadd.xlane.f32.xlu0 %v1511_v54  ;;  %1587 = vadd.xlane.f32.xlu1 %v1442_v46  ;;  %v1513_v54 = vunpack.c.l.bf16 %v1405_v41  ;;  %v1517_v46 = vunpack.c.l.bf16 %v1407_v15  ;;  %v1054_v41 = vcombine.high %v4382_v20, %v4382_v20  ;;  %v1198_v20 = vadd.f32 %v4572_v58, %v4530_v3  ;;  %v3819_v28 = vpop.f32.mrf.mxu0 }
 0x19d   :  { %v1205_v3 = vadd.f32 %v4561_v18, %v4572_v58 }
 0x19e   :  { %v4020_v52 = vpop.eup %4019 }
 0x19f   :  { %v1410_v22 = vmul.bf16 %v4020_v52, %v4378_v16  ;;  %v4022_v14 = vpop.eup %4021 }
 0x1a0   :  { %1577 = vadd.xlane.f32.xlu0 %v1437_v42  ;;  %1731 = vadd.xlane.f32.xlu1 %v1514_v35  ;;  %v1374_v42 = vmul.bf16 %v4018_v17, %v4378_v16  ;;  %v1126_v35 = vadd.f32 %v4526_v9, %v4633_v11  ;;  %v1276_v9 = vpack.c.bf16 %v1199_v29, %v1198_v20  ;;  %v4024_v5 = vpop.eup %4023 }
 0x1a1   :  { %v1373_v50 = vmul.bf16 %v4022_v14, %v4378_v16  ;;  %v1524_v38 = vunpack.c.h.bf16 %v1410_v22  ;;  %v1409_v39 = vmul.bf16 %v4024_v5, %v4378_v16  ;;  %v4026_v24 = vpop.eup %4025  ;;  %v1202_v29 = vadd.f32 %v4572_v58, %v4557_v57 }
 0x1a2   :  { %v1240_v27 = vpack.c.bf16 %v1127_v62, %v1126_v35  ;;  %v1452_v36 = vunpack.c.h.bf16 %v1374_v42  ;;  %v1451_v61 = vunpack.c.l.bf16 %v1374_v42  ;;  %v1376_v40 = vmul.bf16 %v4026_v24, %v4378_v16  ;;  %v4028_v25 = vpop.eup %4027 }
 0x1a3   :  { %v1449_v60 = vunpack.c.l.bf16 %v1373_v50  ;;  %v1450_v15 = vunpack.c.h.bf16 %v1373_v50  ;;  %v1521_v18 = vunpack.c.l.bf16 %v1409_v39  ;;  %v1522_v26 = vunpack.c.h.bf16 %v1409_v39 }
 0x1a4   :  { %1721 = vadd.xlane.f32.xlu0 %v1509_v19  ;;  %1599 = vadd.xlane.f32.xlu1 %v1448_v44  ;;  %v4688_v19 = vrot.slane %v1054_v41, %v4346_v43  ;;  %4029 = vtanh.bf16 %v1240_v27  ;;  %v1523_v44 = vunpack.c.l.bf16 %v1410_v22  ;;  %v1455_v62 = vunpack.c.l.bf16 %v1376_v40 }
 0x1a5   :  { %4031 = vtanh.bf16 %v1276_v9  ;;  %v1203_v42 = vadd.f32 %v4572_v58, %v4569_v32  ;;  %v1057_v20 = vcombine.high %v4428_v47, %v4428_v47 }
 0x1a6   :  { %v1133_v11 = vadd.f32 %v3815_v4, %v4688_v19  ;;  %v1132_v37 = vadd.f32 %v4649_v59, %v4688_v19  ;;  %v1279_v59 = vpack.c.bf16 %v1205_v3, %v1204_v6  ;;  %v1131_v4 = vadd.f32 %v4688_v19, %v628_v56 }
 0x1a7   :  { %v1130_v63 = vadd.f32 %v4688_v19, %v4659_v34  ;;  %v1136_v34 = vadd.f32 %v4675_v30, %v4688_v19  ;;  %v1456_v30 = vunpack.c.h.bf16 %v1376_v40  ;;  %v1134_v9 = vadd.f32 %v4688_v19, %v4684_v33 }
 0x1a8   :  { %1589 = vadd.xlane.f32.xlu0 %v1443_v7  ;;  %1741 = vadd.xlane.f32.xlu1 %v1519_v51  ;;  %v1243_v7 = vpack.c.bf16 %v1133_v11, %v1132_v37  ;;  %v644_v51 = vpop.f32.mrf.mxu0  ;;  %v1278_v11 = vpack.c.bf16 %v1203_v42, %v1202_v29  ;;  %v4739_v37 = vand.u32 127, %v1013_v21 }
 0x1a9   :  { %v1242_v1 = vpack.c.bf16 %v1131_v4, %v1130_v63  ;;  %v1135_v41 = vadd.f32 %v4688_v19, %v644_v51  ;;  %v4743_v51 = vrot.slane %v1057_v20, %v4346_v43 }
 0x1aa   :  { %4033 = vtanh.bf16 %v1243_v7  ;;  %v1950_v39 = vadd.s32 4294967280, %v4739_v37  ;;  %v1943_v4 = vadd.s32 4294967288, %v4739_v37  ;;  %v1971_v20 = vadd.s32 4294967256, %v4739_v37 }
 0x1ab   :  { %4035 = vtanh.bf16 %v1279_v59 }
 0x1ac   :  { %1585 = vadd.xlane.f32.xlu0 %v1441_v31  ;;  %1595 = vadd.xlane.f32.xlu1 %v1446_v55  ;;  %v4702_v31 = vpop.f32.mrf.mxu1  ;;  %v3822_v55 = vpop.f32.mrf.mxu0  ;;  %4037 = vtanh.bf16 %v1242_v1 }
 0x1ae   :  { %v3894_v17 = vpop.f32.mrf.mxu1  ;;  %v4712_v2 = vpop.f32.mrf.mxu0 }
 0x1af   :  { %v1212_v1 = vadd.f32 %v3894_v17, %v4743_v51  ;;  %v4770_v17 = vsub.s32 %v1943_v4, %v4328_v23 }
 0x1b0   :  { %1729 = vadd.xlane.f32.xlu0 %v1513_v54  ;;  %1737 = vadd.xlane.f32.xlu1 %v1517_v46  ;;  %v1137_v54 = vadd.f32 %v3819_v28, %v4688_v19  ;;  %v1244_v28 = vpack.c.bf16 %v1135_v41, %v1134_v9  ;;  %v1206_v9 = vadd.f32 %v4572_v58, %v4584_v53 }
 0x1b2   :  { %v1245_v52 = vpack.c.bf16 %v1137_v54, %v1136_v34 }
 0x1b4   :  { %1597 = vadd.xlane.f32.xlu0 %v1447_v10  ;;  %1739 = vadd.xlane.f32.xlu1 %v1518_v8  ;;  %v1412_v10 = vmul.bf16 %v4028_v25, %v4378_v16  ;;  %v4030_v8 = vpop.eup %4029  ;;  %4039 = vtanh.bf16 %v1245_v52 }
 0x1b5   :  { %v1375_v32 = vmul.bf16 %v4030_v8, %v4378_v16  ;;  %v4032_v14 = vpop.eup %4031  ;;  %4041 = vtanh.bf16 %v1278_v11 }
 0x1b6   :  { %v1527_v22 = vunpack.c.l.bf16 %v1412_v10  ;;  %v1528_v47 = vunpack.c.h.bf16 %v1412_v10  ;;  %v1411_v33 = vmul.bf16 %v4032_v14, %v4378_v16  ;;  %4043 = vtanh.bf16 %v1244_v28 }
 0x1b7   :  { %v1453_v7 = vunpack.c.l.bf16 %v1375_v32  ;;  %v1138_v14 = vadd.f32 %v4688_v19, %v4712_v2  ;;  %v1985_v28 = vadd.s32 4294967240, %v4739_v37 }
 0x1b8   :  { %1593 = vadd.xlane.f32.xlu0 %v1445_v48  ;;  %1607 = vadd.xlane.f32.xlu1 %v1452_v36  ;;  %v4726_v48 = vpop.f32.mrf.mxu1  ;;  %v3823_v36 = vpop.f32.mrf.mxu0  ;;  %v1525_v40 = vunpack.c.l.bf16 %v1411_v33  ;;  %v1526_v29 = vunpack.c.h.bf16 %v1411_v33 }
 0x1b9   :  { %v1141_v57 = vadd.f32 %v3823_v36, %v4688_v19  ;;  %v4034_v3 = vpop.eup %4033 }
 0x1ba   :  { %v3895_v50 = vpop.f32.mrf.mxu1  ;;  %v660_v5 = vpop.f32.mrf.mxu0  ;;  %v1378_v25 = vmul.bf16 %v4034_v3, %v4378_v16 }
 0x1bb   :  { %v1213_v24 = vadd.f32 %v3895_v50, %v4743_v51  ;;  %v4036_v63 = vpop.eup %4035  ;;  %v1139_v8 = vadd.f32 %v4688_v19, %v660_v5 }
 0x1bc   :  { %1749 = vadd.xlane.f32.xlu1 %v1523_v44  ;;  %1605 = vadd.xlane.f32.xlu0 %v1451_v61  ;;  %v1459_v36 = vunpack.c.l.bf16 %v1378_v25 }
 0x1bd   :  { %v1283_v10 = vpack.c.bf16 %v1213_v24, %v1212_v1  ;;  %v1246_v50 = vpack.c.bf16 %v1139_v8, %v1138_v14 }
 0x1c0   :  { %1751 = vadd.xlane.f32.xlu1 %v1524_v38  ;;  %1601 = vadd.xlane.f32.xlu0 %v1449_v60  ;;  %v1140_v38 = vadd.f32 %v3822_v55, %v4688_v19  ;;  %v1957_v60 = vadd.s32 4294967272, %v4739_v37  ;;  %v1454_v55 = vunpack.c.h.bf16 %v1375_v32  ;;  %v1207_v32 = vadd.f32 %v4572_v58, %v4702_v31 }
 0x1c1   :  { %v1210_v31 = vadd.f32 %v4743_v51, %v4726_v48  ;;  %v4796_v48 = vsub.s32 %v1971_v20, %v4328_v23 }
 0x1c2   :  { %v1247_v21 = vpack.c.bf16 %v1141_v57, %v1140_v38  ;;  %v4759_v54 = vsub.s32 %v1957_v60, %v4328_v23  ;;  %v1964_v57 = vadd.s32 4294967264, %v4739_v37 }
 0x1c4   :  { %1603 = vadd.xlane.f32.xlu1 %v1450_v15  ;;  %1745 = vadd.xlane.f32.xlu0 %v1521_v18  ;;  %v948_v15 = vpop.f32.mrf.mxu1  ;;  %v4754_v18 = vpop.f32.mrf.mxu0  ;;  %4045 = vtanh.bf16 %v1247_v21 }
 0x1c5   :  { %v4708_v46 = vpop.xlane.xlu1 %1667  ;;  %v4710_v56 = vpop.xlane.xlu0 %1665  ;;  %v1211_v11 = vadd.f32 %v4743_v51, %v948_v15  ;;  %4047 = vtanh.bf16 %v1283_v10  ;;  %v4804_v10 = vsub.s32 %v1964_v57, %v4328_v23  ;;  %v1144_v20 = vadd.f32 %v4754_v18, %v4688_v19 }
 0x1c6   :  { %v4772_v52 = vpop.f32.mrf.mxu1  ;;  %v4774_v41 = vpop.f32.mrf.mxu0  ;;  %4049 = vtanh.bf16 %v1246_v50 }
 0x1c7   :  { %v1282_v24 = vpack.c.bf16 %v1211_v11, %v1210_v31 }
 0x1c8   :  { %1747 = vadd.xlane.f32.xlu1 %v1522_v26  ;;  %1613 = vadd.xlane.f32.xlu0 %v1455_v62  ;;  %v4762_v26 = vsub.s32 %v1950_v39, %v4328_v23  ;;  %v4766_v62 = vsub.s32 %v4739_v37, %v4328_v23  ;;  %v3827_v33 = vpop.f32.mrf.mxu0  ;;  %v1280_v39 = vpack.c.bf16 %v1207_v32, %v1206_v9 }
 0x1c9   :  { %v4720_v35 = vpop.xlane.xlu1 %1671  ;;  %v4722_v27 = vpop.xlane.xlu0 %1669  ;;  %v4813_v9 = vsub.s32 %v1985_v28, %v4328_v23 }
 0x1ca   :  { %4051 = vtanh.bf16 %v1280_v39 }
 0x1cb   :  { %4053 = vtanh.bf16 %v1282_v24 }
 0x1cc   :  { %1615 = vadd.xlane.f32.xlu1 %v1456_v30  ;;  %1757 = vadd.xlane.f32.xlu0 %v1527_v22  ;;  %v1414_v30 = vmul.bf16 %v4036_v63, %v4378_v16  ;;  %v4038_v22 = vpop.eup %4037 }
 0x1cd   :  { %v4734_v44 = vpop.xlane.xlu1 %1679  ;;  %v4736_v61 = vpop.xlane.xlu0 %1677  ;;  %v1377_v38 = vmul.bf16 %v4038_v22, %v4378_v16 }
 0x1ce   :  { %v1531_v3 = vunpack.c.l.bf16 %v1414_v30  ;;  %v4040_v60 = vpop.eup %4039 }
 0x1cf   :  { %v4042_v8 = vpop.eup %4041  ;;  %v4808_v32 = vmul.bf16 %v4040_v60, %v4378_v16  ;;  %v1216_v60 = vadd.f32 %v4772_v52, %v4743_v51 }
 0x1d0   :  { %1759 = vadd.xlane.f32.xlu1 %v1528_v47  ;;  %1609 = vadd.xlane.f32.xlu0 %v1453_v7  ;;  %v1460_v47 = vunpack.c.h.bf16 %v1378_v25  ;;  %v4789_v7 = vpop.f32.mrf.mxu1  ;;  %v4044_v14 = vpop.eup %4043 }
 0x1d1   :  { %v4749_v6 = vpop.xlane.xlu1 %1675  ;;  %v4751_v59 = vpop.xlane.xlu0 %1673 }
 0x1d2   :  { %5755 = vst [vmem:[#allocation20_spill] sm:$0xff] %v4749_v6  ;;  %5756 = vst [vmem:[#allocation21_spill] sm:$0xff] %v4751_v59 }
 0x1d4   :  { %1611 = vadd.xlane.f32.xlu1 %v1454_v55  ;;  %1753 = vadd.xlane.f32.xlu0 %v1525_v40  ;;  %v1978_v55 = vadd.s32 4294967248, %v4739_v37  ;;  %v1145_v40 = vadd.f32 %v3827_v33, %v4688_v19 }
 0x1d5   :  { %v1688_v34 = vpop.xlane.xlu1 %1687  ;;  %v1686_v42 = vpop.xlane.xlu0 %1685 }
 0x1d6   :  { %v2297_v21 = vrot.slane %v1686_v42, %v4762_v26  ;;  %v2302_v4 = vrot.slane %v1688_v34, %v4759_v54  ;;  %v3899_v42 = vpop.f32.mrf.mxu1  ;;  %v1532_v34 = vunpack.c.h.bf16 %v1414_v30  ;;  %v4816_v11 = vsub.s32 %v1978_v55, %v4328_v23 }
 0x1d7   :  { %v1249_v30 = vpack.c.bf16 %v1145_v40, %v1144_v20  ;;  %v1217_v57 = vadd.f32 %v3899_v42, %v4743_v51 }
 0x1d8   :  { %1755 = vadd.xlane.f32.xlu1 %v1526_v29  ;;  %1621 = vadd.xlane.f32.xlu0 %v1459_v36  ;;  %v676_v29 = vpop.f32.mrf.mxu0  ;;  %v1458_v36 = vunpack.c.h.bf16 %v1377_v38  ;;  %v964_v18 = vpop.f32.mrf.mxu1 }
 0x1d9   :  { %v1684_v2 = vpop.xlane.xlu1 %1683  ;;  %v1682_v5 = vpop.xlane.xlu0 %1681  ;;  %4055 = vtanh.bf16 %v1249_v30  ;;  %v1285_v24 = vpack.c.bf16 %v1217_v57, %v1216_v60 }
 0x1da   :  { %v2292_v58 = vrot.slane %v1684_v2, %v4770_v17  ;;  %v2288_v53 = vrot.slane %v1682_v5, %v4766_v62  ;;  %v1457_v2 = vunpack.c.l.bf16 %v1377_v38  ;;  %v1413_v5 = vmul.bf16 %v4042_v8, %v4378_v16  ;;  %v3902_v52 = vpop.f32.mrf.mxu1 }
 0x1db   :  { %v1143_v38 = vadd.f32 %v4688_v19, %v676_v29  ;;  %4057 = vtanh.bf16 %v1285_v24  ;;  %v1463_v24 = vunpack.c.l.bf16 %v4808_v32 }
 0x1dc   :  { %v2293_v15 = vsel %vm1948_vm1, %v2292_v58, %v2288_v53  ;;  %1623 = vadd.xlane.f32.xlu1 %v1460_v47  ;;  %1765 = vadd.xlane.f32.xlu0 %v1531_v3  ;;  %v3830_v47 = vpop.f32.mrf.mxu0  ;;  %v1464_v58 = vunpack.c.h.bf16 %v4808_v32  ;;  %v4824_v53 = vmul.bf16 %v4044_v14, %v4378_v16  ;;  %v4046_v3 = vpop.eup %4045  ;;  %v1529_v8 = vunpack.c.l.bf16 %v1413_v5 }
 0x1dd   :  { %v2298_v25 = vsel %vm1955_vm2, %v2297_v21, %v2293_v15  ;;  %v1696_v63 = vpop.xlane.xlu1 %1695  ;;  %v1694_v1 = vpop.xlane.xlu0 %1693  ;;  %v4841_v42 = vmul.bf16 %v4046_v3, %v4378_v16  ;;  %v1215_v14 = vadd.f32 %v4743_v51, %v964_v18  ;;  %v1992_v18 = vadd.s32 4294967232, %v4739_v37 }
 0x1de   :  { %v2303_v22 = vsel %vm1962_vm3, %v2302_v4, %v2298_v25  ;;  %v2317_v39 = vrot.slane %v1694_v1, %v4816_v11  ;;  %v2322_v4 = vrot.slane %v1696_v63, %v4813_v9  ;;  %v4837_v25 = vpop.f32.mrf.mxu0  ;;  %v1462_v1 = vunpack.c.h.bf16 %v4824_v53  ;;  %v4854_v57 = vpop.f32.mrf.mxu1 }
 0x1df   :  { %v1142_v63 = vadd.f32 %v4688_v19, %v4774_v41 }
 0x1e0   :  { %1767 = vadd.xlane.f32.xlu0 %v1532_v34  ;;  %1619 = vadd.xlane.f32.xlu1 %v1458_v36  ;;  %v4048_v34 = vpop.eup %4047 }
 0x1e1   :  { %v1692_v31 = vpop.xlane.xlu1 %1691  ;;  %v1690_v50 = vpop.xlane.xlu0 %1689  ;;  %v4858_v19 = vmul.bf16 %v4048_v34, %v4378_v16 }
 0x1e2   :  { %v2312_v28 = vrot.slane %v1692_v31, %v4796_v48  ;;  %v2307_v33 = vrot.slane %v1690_v50, %v4804_v10  ;;  %v3831_v31 = vpop.f32.mrf.mxu0  ;;  %v1530_v50 = vunpack.c.h.bf16 %v1413_v5  ;;  %v4050_v41 = vpop.eup %4049 }
 0x1e3   :  { %v1149_v5 = vadd.f32 %v3831_v31, %v4349_v45 }
 0x1e4   :  { %v2308_v21 = vsel %vm1969_vm4, %v2307_v33, %v2303_v22  ;;  %1617 = vadd.xlane.f32.xlu0 %v1457_v2  ;;  %1631 = vadd.xlane.f32.xlu1 %v1464_v58  ;;  %v1248_v22 = vpack.c.bf16 %v1143_v38, %v1142_v63  ;;  %v1468_v2 = vunpack.c.h.bf16 %v4841_v42  ;;  %v1999_v33 = vadd.s32 4294967224, %v4739_v37  ;;  %v4052_v58 = vpop.eup %4051 }
 0x1e5   :  { %v2313_v15 = vsel %vm1976_vm5, %v2312_v28, %v2308_v21  ;;  %v4833_v55 = vpop.xlane.xlu0 %1701  ;;  %v4835_v40 = vpop.xlane.xlu1 %1557  ;;  %v1214_v28 = vadd.f32 %v4743_v51, %v4789_v7  ;;  %v4868_v7 = vmul.bf16 %v4050_v41, %v4378_v16  ;;  %v4879_v34 = vmul.bf16 %v4052_v58, %v4378_v16 }
 0x1e6   :  { %v2318_v29 = vsel %vm1983_vm6, %v2317_v39, %v2313_v15  ;;  %4059 = vtanh.bf16 %v1248_v22  ;;  %v4054_v39 = vpop.eup %4053  ;;  %v3903_v21 = vpop.f32.mrf.mxu1  ;;  %v1148_v15 = vadd.f32 %v3830_v47, %v4349_v45  ;;  %v1461_v47 = vunpack.c.l.bf16 %v4824_v53 }
 0x1e7   :  { %v4847_v36 = vsel %vm1990_vm7, %v2322_v4, %v2318_v29  ;;  %v1284_v3 = vpack.c.bf16 %v1215_v14, %v1214_v28  ;;  %v1540_v4 = vunpack.c.h.bf16 %v4858_v19  ;;  %v4876_v29 = vsub.s32 %v1992_v18, %v4328_v23  ;;  %v4056_v28 = vpop.eup %4055 }
 0x1e8   :  { %1761 = vadd.xlane.f32.xlu0 %v1529_v8  ;;  %1627 = vadd.xlane.f32.xlu1 %v1462_v1  ;;  %v2006_v8 = vadd.s32 4294967216, %v4739_v37  ;;  %v4873_v1 = vsub.s32 %v1999_v33, %v4328_v23  ;;  %v1251_v32 = vpack.c.bf16 %v1149_v5, %v1148_v15  ;;  %v1221_v63 = vadd.f32 %v3903_v21, %v4743_v51 }
 0x1e9   :  { %v4850_v20 = vpop.xlane.xlu0 %1703  ;;  %v4852_v30 = vpop.xlane.xlu1 %1559  ;;  %4061 = vtanh.bf16 %v1284_v3  ;;  %v4889_v41 = vmul.bf16 %v4054_v39, %v4378_v16  ;;  %v1220_v33 = vadd.f32 %v3902_v52, %v4743_v51  ;;  %v2013_v18 = vadd.s32 4294967208, %v4739_v37 }
 0x1ea   :  { %v4894_v58 = vsub.s32 %v2006_v8, %v4328_v23  ;;  %v1954_v53 = vrot.slane %v4835_v40, %v4762_v26  ;;  %v1961_v3 = vrot.slane %v4852_v30, %v4759_v54  ;;  %4063 = vtanh.bf16 %v1251_v32  ;;  %v4058_v32 = vpop.eup %4057 }
 0x1eb   :  { %v1538_v30 = vunpack.c.h.bf16 %v4889_v41  ;;  %v4908_v15 = vmul.bf16 %v4056_v28, %v4378_v16 }
 0x1ec   :  { %1763 = vadd.xlane.f32.xlu0 %v1530_v50  ;;  %1639 = vadd.xlane.f32.xlu1 %v1468_v2  ;;  %v1466_v2 = vunpack.c.h.bf16 %v4868_v7 }
 0x1ed   :  { %v1700_v60 = vpop.xlane.xlu1 %1699  ;;  %v1554_v38 = vpop.xlane.xlu0 %1553  ;;  %v1471_v6 = vunpack.c.l.bf16 %v4908_v15 }
 0x1ee   :  { %v1942_v31 = vrot.slane %v1554_v38, %v4766_v62  ;;  %v1287_v38 = vpack.c.bf16 %v1221_v63, %v1220_v33  ;;  %v4914_v63 = vsub.s32 %v2013_v18, %v4328_v23  ;;  %v980_v18 = vpop.f32.mrf.mxu1 }
 0x1f0   :  { %1629 = vadd.xlane.f32.xlu0 %v1463_v24  ;;  %1783 = vadd.xlane.f32.xlu1 %v1540_v4  ;;  %v1533_v24 = vunpack.c.l.bf16 %v4879_v34  ;;  %v692_v4 = vpop.f32.mrf.mxu0  ;;  %4065 = vtanh.bf16 %v1287_v38 }
 0x1f1   :  { %v1556_v22 = vpop.xlane.xlu0 %1555  ;;  %v4882_v14 = vpop.xlane.xlu1 %1567 }
 0x1f2   :  { %v1947_v50 = vrot.slane %v1556_v22, %v4770_v17  ;;  %v2332_v22 = vrot.slane %v1700_v60, %v4873_v1  ;;  %v1989_v43 = vrot.slane %v4882_v14, %v4813_v9 }
 0x1f4   :  { %v1949_v5 = vsel %vm1948_vm1, %v1947_v50, %v1942_v31  ;;  %1625 = vadd.xlane.f32.xlu0 %v1461_v47  ;;  %1635 = vadd.xlane.f32.xlu1 %v1466_v2  ;;  %v2337_v47 = vrot.slane %v4833_v55, %v4894_v58  ;;  %v1147_v50 = vadd.f32 %v4349_v45, %v692_v4  ;;  %v3834_v55 = vpop.f32.mrf.mxu0  ;;  %v4060_v38 = vpop.eup %4059 }
 0x1f5   :  { %v1956_v52 = vsel %vm1955_vm2, %v1954_v53, %v1949_v5  ;;  %v1698_v39 = vpop.xlane.xlu0 %1697  ;;  %v4902_v21 = vpop.xlane.xlu1 %1563  ;;  %v2342_v2 = vrot.slane %v4850_v20, %v4914_v63  ;;  %v1467_v53 = vunpack.c.l.bf16 %v4841_v42  ;;  %v1146_v20 = vadd.f32 %v4349_v45, %v4837_v25 }
 0x1f6   :  { %v2327_v40 = vrot.slane %v1698_v39, %v4876_v29  ;;  %v4911_v8 = vsel %vm1962_vm3, %v1961_v3, %v1956_v52  ;;  %v4932_v3 = vmul.bf16 %v4058_v32, %v4378_v16 }
 0x1f7   :  { %v1250_v39 = vpack.c.bf16 %v1147_v50, %v1146_v20  ;;  %v4062_v25 = vpop.eup %4061 }
 0x1f8   :  { %v2328_v31 = vsel %vm1997_vm8, %v2327_v40, %v4847_v36  ;;  %1769 = vadd.xlane.f32.xlu0 %v1533_v24  ;;  %1779 = vadd.xlane.f32.xlu1 %v1538_v30  ;;  %v1472_v36 = vunpack.c.h.bf16 %v4908_v15  ;;  %v1219_v24 = vadd.f32 %v4743_v51, %v980_v18  ;;  %v705_v40 = vpop.f32.mrf.mxu0  ;;  %v1539_v30 = vunpack.c.l.bf16 %v4858_v19 }
 0x1f9   :  { %v2333_v28 = vsel %vm2004_vm9, %v2332_v22, %v2328_v31  ;;  %v4925_v33 = vpop.xlane.xlu0 %1565  ;;  %v4927_v60 = vpop.xlane.xlu1 %1575  ;;  %v1544_v32 = vunpack.c.h.bf16 %v4932_v3  ;;  %v4948_v22 = vmul.bf16 %v4060_v38, %v4378_v16  ;;  %4067 = vtanh.bf16 %v1250_v39 }
 0x1fa   :  { %v2338_v5 = vsel %vm2011_vm10, %v2337_v47, %v2333_v28  ;;  %v1218_v47 = vadd.f32 %v4743_v51, %v4854_v57  ;;  %v3835_v28 = vpop.f32.mrf.mxu0  ;;  %v1465_v19 = vunpack.c.l.bf16 %v4868_v7  ;;  %v4965_v39 = vpop.f32.mrf.mxu1 }
 0x1fb   :  { %v4938_v52 = vsel %vm2018_vm11, %v2342_v2, %v2338_v5  ;;  %v1470_v18 = vunpack.c.h.bf16 %v4948_v22  ;;  %v2020_v5 = vadd.s32 4294967200, %v4739_v37  ;;  %v1153_v57 = vadd.f32 %v3835_v28, %v4349_v45 }
 0x1fc   :  { %1637 = vadd.xlane.f32.xlu0 %v1467_v53  ;;  %1647 = vadd.xlane.f32.xlu1 %v1472_v36  ;;  %v1286_v31 = vpack.c.bf16 %v1219_v24, %v1218_v47  ;;  %v4959_v53 = vmul.bf16 %v4062_v25, %v4378_v16  ;;  %v4064_v36 = vpop.eup %4063  ;;  %v708_v24 = vpop.f32.mrf.mxu0  ;;  %v2034_v28 = vadd.s32 4294967184, %v4739_v37 }
 0x1fd   :  { %v4941_v42 = vpop.xlane.xlu0 %1709  ;;  %v4943_v4 = vpop.xlane.xlu1 %1717  ;;  %v4971_v25 = vmul.bf16 %v4064_v36, %v4378_v16  ;;  %v4979_v13 = vsub.s32 %v2020_v5, %v4328_v23 }
 0x1fe   :  { %4069 = vtanh.bf16 %v1286_v31  ;;  %v4066_v47 = vpop.eup %4065  ;;  %v1152_v31 = vadd.f32 %v3834_v55, %v4349_v45  ;;  %v1151_v55 = vadd.f32 %v4349_v45, %v708_v24  ;;  %v993_v5 = vpop.f32.mrf.mxu1 }
 0x200   :  { %1781 = vadd.xlane.f32.xlu0 %v1539_v30  ;;  %1791 = vadd.xlane.f32.xlu1 %v1544_v32  ;;  %v1537_v30 = vunpack.c.l.bf16 %v4889_v41  ;;  %v1542_v32 = vunpack.c.h.bf16 %v4959_v53  ;;  %v1982_v41 = vrot.slane %v4925_v33, %v4816_v11  ;;  %v1476_v33 = vunpack.c.h.bf16 %v4971_v25 }
 0x201   :  { %v4952_v50 = vpop.xlane.xlu0 %1711  ;;  %v4954_v2 = vpop.xlane.xlu1 %1571 }
 0x202   :  { %5757 = vst [vmem:[#allocation22_spill] sm:$0xff] %v4952_v50 }
 0x204   :  { %1633 = vadd.xlane.f32.xlu0 %v1465_v19  ;;  %1643 = vadd.xlane.f32.xlu1 %v1470_v18  ;;  %v1975_v19 = vrot.slane %v4902_v21, %v4796_v48  ;;  %v2027_v18 = vadd.s32 4294967192, %v4739_v37 }
 0x205   :  { %v1562_v38 = vpop.xlane.xlu0 %1561  ;;  %v4963_v20 = vpop.xlane.xlu1 %1713 }
 0x206   :  { %v1968_v7 = vrot.slane %v1562_v38, %v4804_v10  ;;  %v1253_v38 = vpack.c.bf16 %v1153_v57, %v1152_v31  ;;  %v1150_v57 = vadd.f32 %v4349_v45, %v705_v40  ;;  %v3907_v45 = vpop.f32.mrf.mxu1 }
 0x208   :  { %v1970_v36 = vsel %vm1969_vm4, %v1968_v7, %v4911_v8  ;;  %1777 = vadd.xlane.f32.xlu0 %v1537_v30  ;;  %1787 = vadd.xlane.f32.xlu1 %v1542_v32  ;;  %v1422_v8 = vmul.bf16 %v4066_v47, %v4378_v16  ;;  %v4999_v30 = vsub.s32 %v2027_v18, %v4328_v23  ;;  %4071 = vtanh.bf16 %v1253_v38 }
 0x209   :  { %v1977_v21 = vsel %vm1976_vm5, %v1975_v19, %v1970_v36  ;;  %v1706_v50 = vpop.xlane.xlu0 %1705  ;;  %v4989_v59 = vpop.xlane.xlu1 %1583  ;;  %v1252_v15 = vpack.c.bf16 %v1151_v55, %v1150_v57  ;;  %v5002_v32 = vsub.s32 %v2034_v28, %v4328_v23  ;;  %v5758_v28 = vpack.c.bf16 %v4597_v12, %v4582_v49 }
 0x20a   :  { %v1984_v7 = vsel %vm1983_vm6, %v1982_v41, %v1977_v21  ;;  %v2347_v24 = vrot.slane %v1706_v50, %v4979_v13  ;;  %v1547_v50 = vunpack.c.l.bf16 %v1422_v8  ;;  %v4068_v19 = vpop.eup %4067  ;;  %v996_v55 = vpop.f32.mrf.mxu1  ;;  %v1548_v21 = vunpack.c.h.bf16 %v1422_v8 }
 0x20b   :  { %v1991_v14 = vsel %vm1990_vm7, %v1989_v43, %v1984_v7  ;;  %v1543_v43 = vunpack.c.l.bf16 %v4932_v3  ;;  %4073 = vtanh.bf16 %v5758_v28  ;;  %v1223_v49 = vadd.f32 %v4743_v51, %v996_v55 }
 0x20c   :  { %1645 = vadd.xlane.f32.xlu0 %v1471_v6  ;;  %1655 = vadd.xlane.f32.xlu1 %v1476_v33  ;;  %v2357_v6 = vrot.slane %v4941_v42, %v5002_v32  ;;  %v2348_v18 = vsel %vm2025_vm12, %v2347_v24, %v4938_v52  ;;  %4075 = vtanh.bf16 %v1252_v15  ;;  %v1469_v42 = vunpack.c.l.bf16 %v4948_v22  ;;  %v4070_v33 = vpop.eup %4069 }
 0x20d   :  { %v1708_v47 = vpop.xlane.xlu0 %1707  ;;  %v5004_v31 = vpop.xlane.xlu1 %1727  ;;  %v1385_v52 = vmul.bf16 %v4068_v19, %v4378_v16  ;;  %v1541_v57 = vunpack.c.l.bf16 %v4959_v53  ;;  %v1421_v15 = vmul.bf16 %v4070_v33, %v4378_v16  ;;  %v1225_v22 = vadd.f32 %v3907_v45, %v4743_v51 }
 0x20e   :  { %v2352_v40 = vrot.slane %v1708_v47, %v4999_v30  ;;  %v1222_v47 = vadd.f32 %v4743_v51, %v993_v5  ;;  %v1475_v19 = vunpack.c.l.bf16 %v4971_v25  ;;  %v1224_v53 = vadd.f32 %v4965_v39, %v4743_v51 }
 0x20f   :  { %v1474_v24 = vunpack.c.h.bf16 %v1385_v52  ;;  %v2003_v5 = vrot.slane %v4954_v2, %v4873_v1  ;;  %v2017_v55 = vrot.slane %v4927_v60, %v4914_v63  ;;  %v1546_v39 = vunpack.c.h.bf16 %v1421_v15 }
 0x210   :  { %v2353_v41 = vsel %vm2032_vm13, %v2352_v40, %v2348_v18  ;;  %1789 = vadd.xlane.f32.xlu0 %v1543_v43  ;;  %1797 = vadd.xlane.f32.xlu1 %v1547_v50  ;;  %v1288_v8 = vpack.c.bf16 %v1223_v49, %v1222_v47  ;;  %v1473_v2 = vunpack.c.l.bf16 %v1385_v52 }
 0x211   :  { %v5017_v36 = vsel %vm2039_vm14, %v2357_v6, %v2353_v41  ;;  %v1574_v3 = vpop.xlane.xlu0 %1573  ;;  %v5019_v38 = vpop.xlane.xlu1 %1579  ;;  %v1545_v6 = vunpack.c.l.bf16 %v1421_v15  ;;  %v1289_v41 = vpack.c.bf16 %v1225_v22, %v1224_v53  ;;  %v1534_v53 = vunpack.c.h.bf16 %v4879_v34 }
 0x212   :  { %5759 = vst [vmem:[#allocation23_spill] sm:$0xff] %v5017_v36  ;;  %v2010_v28 = vrot.slane %v1574_v3, %v4894_v58  ;;  %4077 = vtanh.bf16 %v1288_v8 }
 0x213   :  { %4079 = vtanh.bf16 %v1289_v41 }
 0x214   :  { %1641 = vadd.xlane.f32.xlu0 %v1469_v42  ;;  %1799 = vadd.xlane.f32.xlu1 %v1548_v21 }
 0x215   :  { %v5024_v12 = vpop.xlane.xlu0 %1719  ;;  %v5026_v7 = vpop.xlane.xlu1 %1723 }
 0x216   :  { %v4072_v18 = vpop.eup %4071 }
 0x217   :  { %v1388_v3 = vmul.bf16 %v4072_v18, %v4378_v16 }
 0x218   :  { %1785 = vadd.xlane.f32.xlu0 %v1541_v57  ;;  %1651 = vadd.xlane.f32.xlu1 %v1474_v24 }
 0x219   :  { %v1570_v40 = vpop.xlane.xlu0 %1569  ;;  %v5032_v43 = vpop.xlane.xlu1 %1591  ;;  %v1480_v24 = vunpack.c.h.bf16 %v1388_v3  ;;  %v1479_v47 = vunpack.c.l.bf16 %v1388_v3 }
 0x21a   :  { %v1996_v50 = vrot.slane %v1570_v40, %v4876_v29  ;;  %v4074_v51 = vpop.eup %4073 }
 0x21b   :  { %v4076_v33 = vpop.eup %4075  ;;  %v1416_v15 = vmul.bf16 %v4074_v51, %v4378_v16 }
 0x21c   :  { %v1998_v45 = vsel %vm1997_vm8, %v1996_v50, %v1991_v14  ;;  %1653 = vadd.xlane.f32.xlu0 %v1475_v19  ;;  %1793 = vadd.xlane.f32.xlu1 %v1545_v6  ;;  %v1387_v52 = vmul.bf16 %v4076_v33, %v4378_v16 }
 0x21d   :  { %v2005_v25 = vsel %vm2004_vm9, %v2003_v5, %v1998_v45  ;;  %v5045_v42 = vpop.xlane.xlu0 %1715  ;;  %v5047_v21 = vpop.xlane.xlu1 %1733  ;;  %v1535_v40 = vunpack.c.l.bf16 %v1416_v15  ;;  %v1536_v18 = vunpack.c.h.bf16 %v1416_v15 }
 0x21e   :  { %v2012_v14 = vsel %vm2011_vm10, %v2010_v28, %v2005_v25  ;;  %v1477_v50 = vunpack.c.l.bf16 %v1387_v52  ;;  %v1478_v41 = vunpack.c.h.bf16 %v1387_v52 }
 0x21f   :  { %v5052_v49 = vsel %vm2018_vm11, %v2017_v55, %v2012_v14  ;;  %v1520_v55 = vunpack.c.h.bf16 %v4653_v0 }
 0x220   :  { %1795 = vadd.xlane.f32.xlu1 %v1546_v39  ;;  %1649 = vadd.xlane.f32.xlu0 %v1473_v2  ;;  %v4078_v5 = vpop.eup %4077 }
 0x221   :  { %v5054_v60 = vpop.xlane.xlu0 %1581  ;;  %v5056_v57 = vpop.xlane.xlu1 %1735  ;;  %v1423_v25 = vmul.bf16 %v4078_v5, %v4378_v16 }
 0x222   :  { %v4080_v51 = vpop.eup %4079 }
 0x223   :  { %v1549_v34 = vunpack.c.l.bf16 %v1423_v25  ;;  %v1550_v3 = vunpack.c.h.bf16 %v1423_v25  ;;  %v1424_v14 = vmul.bf16 %v4080_v51, %v4378_v16 }
 0x224   :  { %1663 = vadd.xlane.f32.xlu1 %v1480_v24  ;;  %1661 = vadd.xlane.f32.xlu0 %v1479_v47 }
 0x225   :  { %v5060_v22 = vpop.xlane.xlu0 %1725  ;;  %v5062_v8 = vpop.xlane.xlu1 %1587  ;;  %v1552_v0 = vunpack.c.h.bf16 %v1424_v14  ;;  %v1551_v47 = vunpack.c.l.bf16 %v1424_v14 }
 0x228   :  { %1773 = vadd.xlane.f32.xlu1 %v1535_v40  ;;  %1657 = vadd.xlane.f32.xlu0 %v1477_v50 }
 0x229   :  { %v5064_v19 = vpop.xlane.xlu0 %1577  ;;  %v5066_v6 = vpop.xlane.xlu1 %1731 }
 0x22c   :  { %1775 = vadd.xlane.f32.xlu1 %v1536_v18  ;;  %1771 = vadd.xlane.f32.xlu0 %v1534_v53 }
 0x22d   :  { %v5069_v28 = vpop.xlane.xlu0 %1721  ;;  %v5071_v45 = vpop.xlane.xlu1 %1599 }
 0x22e   :  { %5760 = vst [vmem:[#allocation24_spill] sm:$0xff] %v5071_v45 }
 0x230   :  { %1659 = vadd.xlane.f32.xlu1 %v1478_v41  ;;  %1743 = vadd.xlane.f32.xlu0 %v1520_v55 }
 0x231   :  { %v5075_v39 = vpop.xlane.xlu0 %1589  ;;  %v5077_v2 = vpop.xlane.xlu1 %1741 }
 0x232   :  { %5761 = vst [vmem:[#allocation25_spill] sm:$0xff] %v5077_v2 }
 0x234   :  { %1801 = vadd.xlane.f32.xlu1 %v1549_v34  ;;  %1803 = vadd.xlane.f32.xlu0 %v1550_v3 }
 0x235   :  { %v5080_v33 = vpop.xlane.xlu0 %1585  ;;  %v5082_v24 = vpop.xlane.xlu1 %1595 }
 0x238   :  { %1807 = vadd.xlane.f32.xlu1 %v1552_v0  ;;  %1805 = vadd.xlane.f32.xlu0 %v1551_v47 }
 0x239   :  { %v5084_v15 = vpop.xlane.xlu0 %1729  ;;  %v5086_v52 = vpop.xlane.xlu1 %1737 }
 0x23a   :  { %5762 = vst [vmem:[#allocation26_spill] sm:$0xff] %v5086_v52 }
 0x23d   :  { %v5088_v40 = vpop.xlane.xlu0 %1597  ;;  %v5090_v50 = vpop.xlane.xlu1 %1739 }
 0x23e   :  { %5763 = vst [vmem:[#allocation27_spill] sm:$0xff] %v5090_v50 }
 0x241   :  { %v5092_v18 = vpop.xlane.xlu0 %1593  ;;  %v5094_v16 = vpop.xlane.xlu1 %1607 }
 0x242   :  { %5764 = vst [vmem:[#allocation28_spill] sm:$0xff] %v5094_v16 }
 0x245   :  { %v5096_v53 = vpop.xlane.xlu1 %1749  ;;  %v5098_v5 = vpop.xlane.xlu0 %1605 }
 0x246   :  { %5765 = vst [vmem:[#allocation29_spill] sm:$0xff] %v5096_v53  ;;  %5766 = vst [vmem:[#allocation30_spill] sm:$0xff] %v5098_v5 }
 0x249   :  { %v5100_v41 = vpop.xlane.xlu1 %1751  ;;  %v5102_v55 = vpop.xlane.xlu0 %1601 }
 0x24a   :  { %5767 = vst [vmem:[#allocation31_spill] sm:$0xff] %v5100_v41  ;;  %5768 = vst [vmem:[#allocation32_spill] sm:$0xff] %v5102_v55 }
 0x24d   :  { %v5104_v25 = vpop.xlane.xlu1 %1603  ;;  %v5106_v51 = vpop.xlane.xlu0 %1745 }
 0x24e   :  { %5769 = vst [vmem:[#allocation33_spill] sm:$0xff] %v5104_v25 }
 0x251   :  { %v5108_v34 = vpop.xlane.xlu1 %1747  ;;  %v5110_v3 = vpop.xlane.xlu0 %1613 }
 0x252   :  { %5770 = vst [vmem:[#allocation34_spill] sm:$0xff] %v5110_v3 }
 0x255   :  { %v5112_v14 = vpop.xlane.xlu1 %1615  ;;  %v5114_v0 = vpop.xlane.xlu0 %1757 }
 0x256   :  { %5771 = vst [vmem:[#allocation35_spill] sm:$0xff] %v5112_v14  ;;  %5772 = vst [vmem:[#allocation36_spill] sm:$0xff] %v5114_v0 }
 0x259   :  { %v5116_v47 = vpop.xlane.xlu1 %1759  ;;  %v5118_v16 = vpop.xlane.xlu0 %1609 }
 0x25a   :  { %5773 = vst [vmem:[#allocation37_spill] sm:$0xff] %v5116_v47  ;;  %5774 = vst [vmem:[#allocation38_spill] sm:$0xff] %v5118_v16 }
 0x25d   :  { %v5120_v5 = vpop.xlane.xlu1 %1611  ;;  %v5122_v2 = vpop.xlane.xlu0 %1753 }
 0x25e   :  { %5775 = vst [vmem:[#allocation39_spill] sm:$0xff] %v5120_v5  ;;  %5776 = vst [vmem:[#allocation40_spill] sm:$0xff] %v5122_v2 }
 0x261   :  { %v5124_v41 = vpop.xlane.xlu1 %1755  ;;  %v5126_v25 = vpop.xlane.xlu0 %1621 }
 0x262   :  { %5777 = vst [vmem:[#allocation41_spill] sm:$0xff] %v5124_v41 }
 0x265   :  { %v5128_v50 = vpop.xlane.xlu1 %1623  ;;  %v5130_v55 = vpop.xlane.xlu0 %1765 }
 0x266   :  { %5778 = vst [vmem:[#allocation42_spill] sm:$0xff] %v5130_v55 }
 0x269   :  { %v5132_v3 = vpop.xlane.xlu0 %1767  ;;  %v1620_v14 = vpop.xlane.xlu1 %1619 }
 0x26a   :  { %5779 = vst [vmem:[#allocation43_spill] sm:$0xff] %v5132_v3 }
 0x26d   :  { %v1618_v0 = vpop.xlane.xlu0 %1617  ;;  %v5134_v53 = vpop.xlane.xlu1 %1631 }
 0x26e   :  { %5780 = vst [vmem:[#allocation44_spill] sm:$0xff] %v5134_v53 }
 0x271   :  { %v5136_v47 = vpop.xlane.xlu0 %1761  ;;  %v5138_v16 = vpop.xlane.xlu1 %1627 }
 0x272   :  { %5781 = vst [vmem:[#allocation45_spill] sm:$0xff] %v5136_v47 }
 0x275   :  { %v5140_v5 = vpop.xlane.xlu0 %1763  ;;  %v5142_v2 = vpop.xlane.xlu1 %1639 }
 0x276   :  { %5782 = vst [vmem:[#allocation46_spill] sm:$0xff] %v5140_v5  ;;  %5783 = vst [vmem:[#allocation47_spill] sm:$0xff] %v5142_v2  ;;  %v2371_v5 = vrot.slane %v5045_v42, %v4770_v17  ;;  %v2386_v42 = vrot.slane %v5069_v28, %v4804_v10  ;;  %v2041_v28 = vadd.s32 4294967176, %v4739_v37  ;;  %v2130_v37 = vrot.slane %v1618_v0, %v4766_v62 }
 0x277   :  { %v2060_v0 = vrot.slane %v5075_v39, %v4762_v26  ;;  %v2070_v39 = vrot.slane %v5092_v18, %v4804_v10 }
 0x279   :  { %v5144_v41 = vpop.xlane.xlu0 %1629  ;;  %v5146_v52 = vpop.xlane.xlu1 %1783 }
 0x27a   :  { %5784 = vst [vmem:[#allocation48_spill] sm:$0xff] %v5144_v41  ;;  %5785 = vst [vmem:[#allocation49_spill] sm:$0xff] %v5146_v52  ;;  %v2367_v52 = vrot.slane %v4963_v20, %v4766_v62 }
 0x27d   :  { %v5148_v45 = vpop.xlane.xlu0 %1625  ;;  %v5150_v55 = vpop.xlane.xlu1 %1635 }
 0x27e   :  { %5786 = vst [vmem:[#allocation50_spill] sm:$0xff] %v5150_v55  ;;  %v2372_v55 = vsel %vm1948_vm1, %v2371_v5, %v2367_v52  ;;  %v2391_v5 = vrot.slane %v5026_v7, %v4796_v48  ;;  %v2024_v7 = vrot.slane %v5064_v19, %v4979_v13 }
 0x281   :  { %v5152_v3 = vpop.xlane.xlu0 %1769  ;;  %v5154_v36 = vpop.xlane.xlu1 %1779 }
 0x282   :  { %5787 = vst [vmem:[#allocation51_spill] sm:$0xff] %v5152_v3  ;;  %5788 = vst [vmem:[#allocation52_spill] sm:$0xff] %v5154_v36  ;;  %v2376_v3 = vrot.slane %v4943_v4, %v4762_v26 }
 0x285   :  { %v5156_v53 = vpop.xlane.xlu0 %1637  ;;  %v5158_v47 = vpop.xlane.xlu1 %1647 }
 0x286   :  { %5789 = vst [vmem:[#allocation53_spill] sm:$0xff] %v5156_v53  ;;  %5790 = vst [vmem:[#allocation54_spill] sm:$0xff] %v5158_v47  ;;  %v2377_v47 = vsel %vm1955_vm2, %v2376_v3, %v2372_v55 }
 0x289   :  { %v5162_v2 = vpop.xlane.xlu0 %1781  ;;  %v5164_v41 = vpop.xlane.xlu1 %1791 }
 0x28a   :  { %5791 = vst [vmem:[#allocation55_spill] sm:$0xff] %v5162_v2  ;;  %5792 = vst [vmem:[#allocation56_spill] sm:$0xff] %v5164_v41  ;;  %v2381_v41 = vrot.slane %v5024_v12, %v4759_v54  ;;  %v2051_v12 = vrot.slane %v5080_v33, %v4766_v62  ;;  %v5211_v33 = vsub.s32 %v2041_v28, %v4328_v23 }
 0x28b   :  { %v2026_v28 = vsel %vm2025_vm12, %v2024_v7, %v5052_v49  ;;  %v2065_v49 = vrot.slane %v5032_v43, %v4759_v54  ;;  %v2411_v7 = vrot.slane %v5066_v6, %v4873_v1 }
 0x28c   :  { %v2382_v52 = vsel %vm1962_vm3, %v2381_v41, %v2377_v47  ;;  %v2055_v41 = vrot.slane %v5062_v8, %v4770_v17 }
 0x28d   :  { %v5171_v36 = vpop.xlane.xlu0 %1633  ;;  %v5173_v53 = vpop.xlane.xlu1 %1643  ;;  %v2387_v4 = vsel %vm1969_vm4, %v2386_v42, %v2382_v52  ;;  %v2406_v42 = vrot.slane %v5084_v15, %v4876_v29 }
 0x28e   :  { %5793 = vst [vmem:[#allocation57_spill] sm:$0xff] %v5173_v53  ;;  %v2392_v3 = vsel %vm1976_vm5, %v2391_v5, %v2387_v4  ;;  %v2056_v8 = vsel %vm1948_vm1, %v2055_v41, %v2051_v12 }
 0x28f   :  { %v2061_v12 = vsel %vm1955_vm2, %v2060_v0, %v2056_v8 }
 0x290   :  { %v2066_v43 = vsel %vm1962_vm3, %v2065_v49, %v2061_v12  ;;  %v5796_v12 = vld [vmem:[#allocation21_spill] sm:$0xff] }
 0x291   :  { %v5180_v2 = vpop.xlane.xlu0 %1777  ;;  %v5182_v20 = vpop.xlane.xlu1 %1787  ;;  %v2071_v18 = vsel %vm1969_vm4, %v2070_v39, %v2066_v43  ;;  %v2421_v43 = vrot.slane %v5056_v57, %v4914_v63  ;;  %v5798_v57 = vld [vmem:[#allocation23_spill] sm:$0xff] }
 0x292   :  { %5794 = vst [vmem:[#allocation58_spill] sm:$0xff] %v5182_v20  ;;  %v2396_v20 = vrot.slane %v5060_v22, %v4816_v11  ;;  %v2401_v22 = vrot.slane %v5004_v31, %v4813_v9  ;;  %v2031_v31 = vrot.slane %v5019_v38, %v4999_v30 }
 0x294   :  { %v2397_v47 = vsel %vm1983_vm6, %v2396_v20, %v2392_v3  ;;  %v2134_v20 = vrot.slane %v1620_v14, %v4770_v17  ;;  %v2033_v8 = vsel %vm2032_vm13, %v2031_v31, %v2026_v28  ;;  %v2144_v31 = vrot.slane %v5128_v50, %v4759_v54 }
 0x295   :  { %v5188_v53 = vpop.xlane.xlu0 %1645  ;;  %v5190_v55 = vpop.xlane.xlu1 %1655  ;;  %v2402_v3 = vsel %vm1990_vm7, %v2401_v22, %v2397_v47  ;;  %v2139_v47 = vrot.slane %v5126_v25, %v4762_v26  ;;  %v2149_v25 = vrot.slane %v5148_v45, %v4804_v10  ;;  %v5797_v45 = vld [vmem:[#allocation22_spill] sm:$0xff] }
 0x296   :  { %v2407_v41 = vsel %vm1997_vm8, %v2406_v42, %v2402_v3  ;;  %v2135_v14 = vsel %vm1948_vm1, %v2134_v20, %v2130_v37  ;;  %v5795_v37 = vld [vmem:[#allocation20_spill] sm:$0xff]  ;;  %v2416_v20 = vrot.slane %v5047_v21, %v4894_v58  ;;  %v2038_v3 = vrot.slane %v5054_v60, %v5002_v32 }
 0x297   :  { %v2412_v0 = vsel %vm2004_vm9, %v2411_v7, %v2407_v41  ;;  %v2140_v6 = vsel %vm1955_vm2, %v2139_v47, %v2135_v14  ;;  %v2362_v49 = vrot.slane %v5797_v45, %v5211_v33  ;;  %v2045_v21 = vrot.slane %v4989_v59, %v5211_v33 }
 0x298   :  { %v2075_v60 = vrot.slane %v5082_v24, %v4796_v48  ;;  %v2040_v39 = vsel %vm2039_vm14, %v2038_v3, %v2033_v8  ;;  %v2417_v50 = vsel %vm2011_vm10, %v2416_v20, %v2412_v0  ;;  %v2450_v7 = vrot.slane %v5108_v34, %v4770_v17 }
 0x299   :  { %v5206_v52 = vpop.xlane.xlu0 %1789  ;;  %v5208_v4 = vpop.xlane.xlu1 %1797  ;;  %v2145_v47 = vsel %vm1962_vm3, %v2144_v31, %v2140_v6  ;;  %v2525_v59 = vrot.slane %v5180_v2, %v4766_v62  ;;  %v2080_v24 = vrot.slane %v5088_v40, %v4816_v11  ;;  %v2446_v8 = vrot.slane %v5106_v51, %v4766_v62  ;;  %v5799_v2 = vld [vmem:[#allocation24_spill] sm:$0xff] }
 0x29a   :  { %v2076_v45 = vsel %vm1976_vm5, %v2075_v60, %v2071_v18  ;;  %v2150_v42 = vsel %vm1969_vm4, %v2149_v25, %v2145_v47  ;;  %v2154_v34 = vrot.slane %v5138_v16, %v4796_v48  ;;  %v5301_v18 = vsel %vm2046_vm15, %v2362_v49, %v5798_v57  ;;  %v5800_v51 = vld [vmem:[#allocation52_spill] sm:$0xff]  ;;  %v5801_v16 = vld [vmem:[#allocation26_spill] sm:$0xff] }
 0x29b   :  { %v5304_v25 = vsel %vm2046_vm15, %v2045_v21, %v2040_v39  ;;  %v2085_v40 = vrot.slane %v5799_v2, %v4813_v9  ;;  %v2422_v20 = vsel %vm2018_vm11, %v2421_v43, %v2417_v50  ;;  %v2529_v3 = vrot.slane %v5800_v51, %v4770_v17  ;;  %v5802_v21 = vld [vmem:[#allocation29_spill] sm:$0xff]  ;;  %v5803_v57 = vld [vmem:[#allocation32_spill] sm:$0xff] }
 0x29c   :  { %v2426_v31 = vrot.slane %v5801_v16, %v4979_v13  ;;  %v2081_v60 = vsel %vm1983_vm6, %v2080_v24, %v2076_v45  ;;  %v2451_v47 = vsel %vm1948_vm1, %v2450_v7, %v2446_v8  ;;  %v2155_v49 = vsel %vm1976_vm5, %v2154_v34, %v2150_v42  ;;  %v5804_v50 = vld [vmem:[#allocation48_spill] sm:$0xff]  ;;  %v5805_v16 = vld [vmem:[#allocation27_spill] sm:$0xff]  ;;  %v5806_v7 = vld [vmem:[#allocation33_spill] sm:$0xff] }
 0x29d   :  { %v5235_v19 = vpop.xlane.xlu0 %1641  ;;  %v5237_v5 = vpop.xlane.xlu1 %1799  ;;  %v2455_v39 = vrot.slane %v5802_v21, %v4762_v26  ;;  %v2090_v2 = vrot.slane %v5803_v57, %v4876_v29  ;;  %v2159_v43 = vrot.slane %v5804_v50, %v4816_v11  ;;  %v2530_v51 = vsel %vm1948_vm1, %v2529_v3, %v2525_v59  ;;  %v5807_v42 = vld [vmem:[#allocation55_spill] sm:$0xff]  ;;  %v5808_v3 = vld [vmem:[#allocation40_spill] sm:$0xff] }
 0x29e   :  { %v2427_v22 = vsel %vm2025_vm12, %v2426_v31, %v2422_v20  ;;  %v2431_v45 = vrot.slane %v5805_v16, %v4999_v30  ;;  %v2095_v24 = vrot.slane %v5806_v7, %v4873_v1  ;;  %v2534_v8 = vrot.slane %v5807_v42, %v4762_v26  ;;  %v5809_v16 = vld [vmem:[#allocation44_spill] sm:$0xff] }
 0x29f   :  { %v2086_v57 = vsel %vm1990_vm7, %v2085_v40, %v2081_v60  ;;  %v2456_v50 = vsel %vm1955_vm2, %v2455_v39, %v2451_v47  ;;  %v2160_v59 = vsel %vm1983_vm6, %v2159_v43, %v2155_v49  ;;  %v2169_v20 = vrot.slane %v5171_v36, %v4876_v29  ;;  %v5810_v40 = vld [vmem:[#allocation31_spill] sm:$0xff]  ;;  %v5811_v49 = vld [vmem:[#allocation41_spill] sm:$0xff] }
 0x2a0   :  { %v2465_v31 = vrot.slane %v5808_v3, %v4804_v10  ;;  %v2164_v7 = vrot.slane %v5809_v16, %v4813_v9  ;;  %v2535_v42 = vsel %vm1955_vm2, %v2534_v8, %v2530_v51  ;;  %v2460_v60 = vrot.slane %v5810_v40, %v4759_v54  ;;  %v5812_v36 = vld [vmem:[#allocation49_spill] sm:$0xff] }
 0x2a1   :  { %v5266_v28 = vpop.xlane.xlu0 %1785  ;;  %v5268_v41 = vpop.xlane.xlu1 %1651  ;;  %v2091_v47 = vsel %vm1997_vm8, %v2090_v2, %v2086_v57  ;;  %v2470_v39 = vrot.slane %v5811_v49, %v4796_v48  ;;  %v2539_v43 = vrot.slane %v5812_v36, %v4759_v54  ;;  %v5813_v3 = vld [vmem:[#allocation25_spill] sm:$0xff]  ;;  %v2432_v16 = vsel %vm2032_vm13, %v2431_v45, %v2427_v22  ;;  %v5814_v2 = vld [vmem:[#allocation30_spill] sm:$0xff] }
 0x2a2   :  { %v2544_v14 = vrot.slane %v5266_v28, %v4804_v10  ;;  %v2436_v38 = vrot.slane %v5813_v3, %v5002_v32  ;;  %v2096_v51 = vsel %vm2004_vm9, %v2095_v24, %v2091_v47  ;;  %v2165_v28 = vsel %vm1990_vm7, %v2164_v7, %v2160_v59  ;;  %v5815_v3 = vld [vmem:[#allocation28_spill] sm:$0xff]  ;;  %v5816_v24 = vld [vmem:[#allocation50_spill] sm:$0xff] }
 0x2a3   :  { %v2100_v57 = vrot.slane %v5814_v2, %v4894_v58  ;;  %v2461_v49 = vsel %vm1962_vm3, %v2460_v60, %v2456_v50  ;;  %v2170_v36 = vsel %vm1997_vm8, %v2169_v20, %v2165_v28  ;;  %v2540_v15 = vsel %vm1962_vm3, %v2539_v43, %v2535_v42  ;;  %v5817_v50 = vld [vmem:[#allocation58_spill] sm:$0xff]  ;;  %v5819_v28 = vld [vmem:[#allocation36_spill] sm:$0xff] }
 0x2a4   :  { %v2105_v22 = vrot.slane %v5815_v3, %v4914_v63  ;;  %v2466_v45 = vsel %vm1969_vm4, %v2465_v31, %v2461_v49  ;;  %v2174_v59 = vrot.slane %v5816_v24, %v4873_v1  ;;  %v2545_v7 = vsel %vm1969_vm4, %v2544_v14, %v2540_v15  ;;  %v5818_v42 = vld [vmem:[#allocation34_spill] sm:$0xff]  ;;  %v5822_v24 = vld [vmem:[#allocation37_spill] sm:$0xff] }
 0x2a5   :  { %v5295_v0 = vpop.xlane.xlu0 %1653  ;;  %v5297_v6 = vpop.xlane.xlu1 %1793  ;;  %v2101_v47 = vsel %vm2011_vm10, %v2100_v57, %v2096_v51  ;;  %v2471_v2 = vsel %vm1976_vm5, %v2470_v39, %v2466_v45  ;;  %v2549_v60 = vrot.slane %v5817_v50, %v4796_v48  ;;  %v2120_v43 = vrot.slane %v5818_v42, %v5002_v32  ;;  %v5820_v39 = vld [vmem:[#allocation38_spill] sm:$0xff]  ;;  %v5821_v57 = vld [vmem:[#allocation53_spill] sm:$0xff] }
 0x2a6   :  { %v2475_v31 = vrot.slane %v5819_v28, %v4816_v11  ;;  %v2175_v49 = vsel %vm2004_vm9, %v2174_v59, %v2170_v36  ;;  %v5384_v14 = vsel %vm2039_vm14, %v2436_v38, %v2432_v16  ;;  %v2110_v51 = vrot.slane %v5820_v39, %v4979_v13  ;;  %v5823_v16 = vld [vmem:[#allocation39_spill] sm:$0xff] }
 0x2a7   :  { %v2213_v45 = vrot.slane %v5268_v41, %v4770_v17  ;;  %v2480_v36 = vrot.slane %v5822_v24, %v4813_v9  ;;  %v2106_v59 = vsel %vm2018_vm11, %v2105_v22, %v2101_v47  ;;  %v2554_v38 = vrot.slane %v5206_v52, %v4816_v11  ;;  %v5824_v41 = vld [vmem:[#allocation45_spill] sm:$0xff]  ;;  %v5825_v22 = vld [vmem:[#allocation47_spill] sm:$0xff] }
 0x2a8   :  { %v2476_v50 = vsel %vm1983_vm6, %v2475_v31, %v2471_v2  ;;  %v2115_v28 = vrot.slane %v5823_v16, %v4999_v30  ;;  %v2184_v47 = vrot.slane %v5825_v22, %v4914_v63  ;;  %v2218_v2 = vrot.slane %v5295_v0, %v4762_v26 }
 0x2a9   :  { %v5330_v34 = vpop.xlane.xlu1 %1795  ;;  %v1650_v21 = vpop.xlane.xlu0 %1649  ;;  %v2564_v26 = vrot.slane %v5297_v6, %v4876_v29 }
 0x2aa   :  { %v2209_v20 = vrot.slane %v1650_v21, %v4766_v62  ;;  %v2179_v62 = vrot.slane %v5821_v57, %v4894_v58  ;;  %v2550_v21 = vsel %vm1976_vm5, %v2549_v60, %v2545_v7  ;;  %v2189_v7 = vrot.slane %v5235_v19, %v4979_v13 }
 0x2ab   :  { %v2485_v60 = vrot.slane %v5824_v41, %v4876_v29  ;;  %v2555_v52 = vsel %vm1983_vm6, %v2554_v38, %v2550_v21  ;;  %v2481_v19 = vsel %vm1990_vm7, %v2480_v36, %v2476_v50  ;;  %v2569_v50 = vrot.slane %v5330_v34, %v4873_v1  ;;  %v5828_v38 = vld [vmem:[#allocation35_spill] sm:$0xff] }
 0x2ac   :  { %v2180_v39 = vsel %vm2011_vm10, %v2179_v62, %v2175_v49  ;;  %v2214_v17 = vsel %vm1948_vm1, %v2213_v45, %v2209_v20  ;;  %v2111_v49 = vsel %vm2025_vm12, %v2110_v51, %v2106_v59  ;;  %v5826_v20 = vld [vmem:[#allocation46_spill] sm:$0xff]  ;;  %v5827_v45 = vld [vmem:[#allocation56_spill] sm:$0xff]  ;;  %v2223_v51 = vrot.slane %v5190_v55, %v4759_v54 }
 0x2ad   :  { %v5356_v8 = vpop.xlane.xlu1 %1663  ;;  %v5358_v40 = vpop.xlane.xlu0 %1661  ;;  %v2490_v62 = vrot.slane %v5826_v20, %v4873_v1  ;;  %v2559_v24 = vrot.slane %v5827_v45, %v4813_v9  ;;  %v2185_v16 = vsel %vm2018_vm11, %v2184_v47, %v2180_v39  ;;  %v2219_v0 = vsel %vm1955_vm2, %v2218_v2, %v2214_v17  ;;  %v5830_v55 = vld [vmem:[#allocation42_spill] sm:$0xff]  ;;  %v5831_v45 = vld [vmem:[#allocation51_spill] sm:$0xff] }
 0x2ae   :  { %v2190_v36 = vsel %vm2025_vm12, %v2189_v7, %v2185_v16  ;;  %v2125_v39 = vrot.slane %v5828_v38, %v5211_v33  ;;  %v2116_v6 = vsel %vm2032_vm13, %v2115_v28, %v2111_v49  ;;  %v2486_v17 = vsel %vm1997_vm8, %v2485_v60, %v2481_v19 }
 0x2af   :  { %v2560_v59 = vsel %vm1990_vm7, %v2559_v24, %v2555_v52  ;;  %v2495_v7 = vrot.slane %v5830_v55, %v4894_v58  ;;  %v2491_v22 = vsel %vm2004_vm9, %v2490_v62, %v2486_v17  ;;  %v2224_v34 = vsel %vm1962_vm3, %v2223_v51, %v2219_v0 }
 0x2b0   :  { %vm2603_vm1 = vcmask 1042434   ;;  %v2565_v60 = vsel %vm1997_vm8, %v2564_v26, %v2560_v59  ;;  %v2238_v2 = vrot.slane %v5358_v40, %v4816_v11  ;;  %v2199_v49 = vrot.slane %v5188_v53, %v5002_v32 }
 0x2b1   :  { %v5381_v3 = vpop.xlane.xlu1 %1773  ;;  %v1658_v15 = vpop.xlane.xlu0 %1657  ;;  %v2570_v19 = vsel %vm2004_vm9, %v2569_v50, %v2565_v60  ;;  %v2243_v20 = vrot.slane %v5356_v8, %v4813_v9  ;;  %v2496_v62 = vsel %vm2011_vm10, %v2495_v7, %v2491_v22  ;;  %v2505_v24 = vrot.slane %v5831_v45, %v4979_v13  ;;  %v5832_v9 = vld [vmem:[#allocation43_spill] sm:$0xff]  ;;  %v5834_v50 = vld [vmem:[#allocation54_spill] sm:$0xff] }
 0x2b2   :  { %v2228_v21 = vrot.slane %v1658_v15, %v4804_v10  ;;  %v5829_v10 = vld [vmem:[#allocation57_spill] sm:$0xff]  ;;  %v2574_v11 = vrot.slane %v5208_v4, %v4894_v58  ;;  %v2121_v53 = vsel %vm2039_vm14, %v2120_v43, %v2116_v6  ;;  %v2500_v8 = vrot.slane %v5832_v9, %v4914_v63 }
 0x2b3   :  { %v2194_v15 = vrot.slane %v5829_v10, %v4999_v30  ;;  %v2204_v38 = vrot.slane %v5834_v50, %v5211_v33  ;;  %v2579_v6 = vrot.slane %v5237_v5, %v4914_v63  ;;  %v5835_v17 = vrot.slane %v4708_v46, %v4873_v1 }
 0x2b4   :  { %v2229_v52 = vsel %vm1969_vm4, %v2228_v21, %v2224_v34  ;;  %v2575_v51 = vsel %vm2011_vm10, %v2574_v11, %v2570_v19  ;;  %v2501_v43 = vsel %vm2018_vm11, %v2500_v8, %v2496_v62  ;;  %v2126_v10 = vsel %vm2046_vm15, %v2125_v39, %v2121_v53 }
 0x2b5   :  { %v5412_v31 = vpop.xlane.xlu1 %1775  ;;  %v1772_v57 = vpop.xlane.xlu0 %1771  ;;  %v2195_v28 = vsel %vm2032_vm13, %v2194_v15, %v2190_v36  ;;  %v5833_v36 = vrot.slane %v4710_v56, %v4876_v29  ;;  %v2506_v56 = vsel %vm2025_vm12, %v2505_v24, %v2501_v43  ;;  %v5836_v29 = vrot.slane %v4722_v27, %v4894_v58 }
 0x2b6   :  { %v2200_v0 = vsel %vm2039_vm14, %v2199_v49, %v2195_v28  ;;  %v2510_v4 = vrot.slane %v1772_v57, %v4999_v30  ;;  %vm2605_vm2 = vcmask 1043459   ;;  %v5837_v5 = vrot.slane %v4720_v35, %v4914_v63 }
 0x2b7   :  { %v2205_v55 = vsel %vm2046_vm15, %v2204_v38, %v2200_v0  ;;  %v2580_v1 = vsel %vm2018_vm11, %v2579_v6, %v2575_v51  ;;  %v5838_v34 = vrot.slane %v5796_v12, %v4979_v13  ;;  %v2602_v35 = vsel %vm2601_vm0, %v2126_v10, %v5304_v25 }
 0x2b8   :  { %v2511_v7 = vsel %vm2032_vm13, %v2510_v4, %v2506_v56  ;;  %v2515_v63 = vrot.slane %v5381_v3, %v5002_v32  ;;  %v5839_v60 = vrot.slane %v5795_v37, %v4999_v30  ;;  %v2604_v12 = vsel %vm2603_vm1, %v2205_v55, %v2602_v35 }
 0x2b9   :  { %v1660_v41 = vpop.xlane.xlu1 %1659  ;;  %v5437_v54 = vpop.xlane.xlu0 %1743  ;;  %vm2607_vm3 = vcmask 1044484   ;;  %vm2609_vm4 = vcmask 1045509   ;;  %v2826_v9 = vsub.s32 1, %v4328_v23  ;;  %v2893_v0 = vsub.s32 2, %v4328_v23 }
 0x2ba   :  { %v2233_v47 = vrot.slane %v1660_v41, %v4796_v48  ;;  %v2441_v28 = vrot.slane %v5437_v54, %v5211_v33  ;;  %v5841_v54 = vrot.slane %v4734_v44, %v5211_v33  ;;  %v2516_v37 = vsel %vm2039_vm14, %v2515_v63, %v2511_v7 }
 0x2bb   :  { %v2960_v51 = vsub.s32 3, %v4328_v23  ;;  %v3161_v35 = vsub.s32 6, %v4328_v23 }
 0x2bc   :  { %v2234_v48 = vsel %vm1976_vm5, %v2233_v47, %v2229_v52  ;;  %v5840_v52 = vrot.slane %v4736_v61, %v5002_v32  ;;  %v2520_v61 = vrot.slane %v5412_v31, %v5211_v33  ;;  %vm2611_vm5 = vcmask 1046534  }
 0x2bd   :  { %v2239_v40 = vsel %vm1983_vm6, %v2238_v2, %v2234_v48  ;;  %v1802_v16 = vpop.xlane.xlu1 %1801  ;;  %v1804_v26 = vpop.xlane.xlu0 %1803  ;;  %v2442_v19 = vsel %vm2046_vm15, %v2441_v28, %v5384_v14  ;;  %vm2613_vm6 = vcmask 1047559  }
 0x2be   :  { %v2244_v21 = vsel %vm1990_vm7, %v2243_v20, %v2239_v40  ;;  %v2584_v42 = vrot.slane %v1802_v16, %v4979_v13  ;;  %v2589_v39 = vrot.slane %v1804_v26, %v4999_v30  ;;  %v2521_v44 = vsel %vm2046_vm15, %v2520_v61, %v2516_v37  ;;  %v5842_v26 = vld [vmem:[#allocation19_spill] sm:$0xff] }
 0x2bf   :  { %v2249_v59 = vsel %vm1997_vm8, %v5833_v36, %v2244_v21  ;;  %v2647_v37 = vld [vmem:[#allocation6 + $0x90] sm:$0xff] }
 0x2c0   :  { %v2254_v57 = vsel %vm2004_vm9, %v5835_v17, %v2249_v59  ;;  %v2585_v22 = vsel %vm2025_vm12, %v2584_v42, %v2580_v1  ;;  %v3027_v42 = vsub.s32 4, %v4328_v23  ;;  %v2629_v1 = vld [vmem:[#allocation6] sm:$0xff] }
 0x2c1   :  { %v2259_v15 = vsel %vm2011_vm10, %v5836_v29, %v2254_v57  ;;  %v1806_v41 = vpop.xlane.xlu0 %1805  ;;  %v1808_v27 = vpop.xlane.xlu1 %1807  ;;  %v2590_v25 = vsel %vm2032_vm13, %v2589_v39, %v2585_v22  ;;  %v3094_v39 = vsub.s32 5, %v4328_v23 }
 0x2c2   :  { %v2264_v46 = vsel %vm2018_vm11, %v5837_v5, %v2259_v15  ;;  %v2594_v58 = vrot.slane %v1806_v41, %v5002_v32  ;;  %v2599_v3 = vrot.slane %v1808_v27, %v5211_v33  ;;  %v2631_v27 = vld [vmem:[#allocation6 + $0x10] sm:$0xff] }
 0x2c3   :  { %v2269_v47 = vsel %vm2025_vm12, %v5838_v34, %v2264_v46  ;;  %v2630_v46 = vld [vmem:[#allocation6 + $0x8] sm:$0xff] }
 0x2c4   :  { %v2274_v2 = vsel %vm2032_vm13, %v5839_v60, %v2269_v47  ;;  %v2595_v32 = vsel %vm2039_vm14, %v2594_v58, %v2590_v25  ;;  %v2632_v47 = vld [vmem:[#allocation6 + $0x18] sm:$0xff]  ;;  %v2646_v25 = vld [vmem:[#allocation6 + $0x88] sm:$0xff] }
 0x2c5   :  { %v2279_v13 = vsel %vm2039_vm14, %v5840_v52, %v2274_v2  ;;  %v2600_v62 = vsel %vm2046_vm15, %v2599_v3, %v2595_v32  ;;  %v3228_v3 = vsub.s32 7, %v4328_v23 }
 0x2c6   :  { %v2284_v30 = vsel %vm2046_vm15, %v5841_v54, %v2279_v13 }
 0x2c7   :  { %v2606_v49 = vsel %vm2605_vm2, %v2284_v30, %v2604_v12  ;;  %v2645_v12 = vld [vmem:[#allocation6 + $0x80] sm:$0xff] }
 0x2c8   :  { %v2608_v20 = vsel %vm2607_vm3, %v5301_v18, %v2606_v49  ;;  %v2633_v49 = vld [vmem:[#allocation6 + $0x20] sm:$0xff] }
 0x2c9   :  { %v2610_v48 = vsel %vm2609_vm4, %v2442_v19, %v2608_v20 }
 0x2ca   :  { %v2612_v33 = vsel %vm2611_vm5, %v2521_v44, %v2610_v48  ;;  %v2648_v48 = vld [vmem:[#allocation6 + $0x98] sm:$0xff] }
 0x2cb   :  { %v2614_v31 = vsel %vm2613_vm6, %v2600_v62, %v2612_v33  ;;  %v2634_v62 = vld [vmem:[#allocation6 + $0x28] sm:$0xff] }
 0x2cc   :  { %2618 = vmax.xlane.f32.xlu0 %v2614_v31 }
 0x355   :  { %v2619_v45 = vpop.xlane.xlu0 %2618 }
 0x356   :  { %v2620_v24 = vsub.f32 %v2614_v31, %v2619_v45 }
 0x358   :  { %v2621_v11 = vmul.f32 1.442695, %v2620_v24  ;;  %v2649_v24 = vld [vmem:[#allocation6 + $0xa0] sm:$0xff] }
 0x35a   :  { %4081 = vpow2.f32 %v2621_v11 }
 0x367   :  { %v4082_v14 = vpop.eup %4081 }
 0x368   :  { %2623 = vadd.xlane.f32.xlu1 %v4082_v14 }
 0x3f1   :  { %v2624_v40 = vpop.xlane.xlu1 %2623 }
 0x3f2   :  { %4083 = vrcp.f32 %v2624_v40 }
 0x3ff   :  { %v4084_v18 = vpop.eup %4083 }
 0x400   :  { %v5540_v16 = vmul.f32 %v4084_v18, %v4082_v14 }
 0x402   :  { %v2760_v53 = vrot.slane %v5540_v16, %v5842_v26  ;;  %2628 = vst [vmem:[#allocation12] sm:$0xff] %v5540_v16  ;;  %v2827_v8 = vrot.slane %v5540_v16, %v2826_v9  ;;  %v2894_v21 = vrot.slane %v5540_v16, %v2893_v0  ;;  %v2961_v4 = vrot.slane %v5540_v16, %v2960_v51  ;;  %v2650_v9 = vld [vmem:[#allocation6 + $0xa8] sm:$0xff] }
 0x403   :  { %v5555_v38 = vrot.slane %v5540_v16, %v3027_v42  ;;  %v5588_v63 = vrot.slane %v5540_v16, %v3094_v39  ;;  %v5596_v54 = vrot.slane %v5540_v16, %v3161_v35  ;;  %v5601_v23 = vrot.slane %v5540_v16, %v3228_v3  ;;  %v2654_v35 = vld [vmem:[#allocation6 + $0xc8] sm:$0xff] }
 0x404   :  { %2766 = vbcast.lane.b32.xlu1 %v2760_v53, 264  ;;  %2762 = vbcast.lane.b32.xlu0 %v2760_v53, 256 }
 0x408   :  { %2770 = vbcast.lane.b32.xlu1 %v2760_v53, 272  ;;  %2778 = vbcast.lane.b32.xlu0 %v2760_v53, 288 }
 0x40c   :  { %2774 = vbcast.lane.b32.xlu1 %v2760_v53, 280  ;;  %2786 = vbcast.lane.b32.xlu0 %v2760_v53, 304 }
 0x410   :  { %2782 = vbcast.lane.b32.xlu1 %v2760_v53, 296  ;;  %2794 = vbcast.lane.b32.xlu0 %v2760_v53, 320 }
 0x414   :  { %2790 = vbcast.lane.b32.xlu1 %v2760_v53, 312  ;;  %2802 = vbcast.lane.b32.xlu0 %v2760_v53, 336 }
 0x418   :  { %2798 = vbcast.lane.b32.xlu1 %v2760_v53, 328  ;;  %2810 = vbcast.lane.b32.xlu0 %v2760_v53, 352 }
 0x41c   :  { %2806 = vbcast.lane.b32.xlu1 %v2760_v53, 344  ;;  %2818 = vbcast.lane.b32.xlu0 %v2760_v53, 368 }
 0x420   :  { %2814 = vbcast.lane.b32.xlu1 %v2760_v53, 360  ;;  %2829 = vbcast.lane.b32.xlu0 %v2827_v8, 256 }
 0x424   :  { %2822 = vbcast.lane.b32.xlu1 %v2760_v53, 376  ;;  %2837 = vbcast.lane.b32.xlu0 %v2827_v8, 272 }
 0x428   :  { %2833 = vbcast.lane.b32.xlu1 %v2827_v8, 264  ;;  %2845 = vbcast.lane.b32.xlu0 %v2827_v8, 288 }
 0x42c   :  { %2841 = vbcast.lane.b32.xlu1 %v2827_v8, 280  ;;  %2853 = vbcast.lane.b32.xlu0 %v2827_v8, 304 }
 0x430   :  { %2849 = vbcast.lane.b32.xlu1 %v2827_v8, 296  ;;  %2861 = vbcast.lane.b32.xlu0 %v2827_v8, 320 }
 0x434   :  { %2857 = vbcast.lane.b32.xlu1 %v2827_v8, 312  ;;  %2869 = vbcast.lane.b32.xlu0 %v2827_v8, 336 }
 0x438   :  { %2865 = vbcast.lane.b32.xlu1 %v2827_v8, 328  ;;  %2877 = vbcast.lane.b32.xlu0 %v2827_v8, 352 }
 0x43c   :  { %2873 = vbcast.lane.b32.xlu1 %v2827_v8, 344  ;;  %2885 = vbcast.lane.b32.xlu0 %v2827_v8, 368 }
 0x440   :  { %2881 = vbcast.lane.b32.xlu1 %v2827_v8, 360  ;;  %2896 = vbcast.lane.b32.xlu0 %v2894_v21, 256 }
 0x444   :  { %2889 = vbcast.lane.b32.xlu1 %v2827_v8, 376  ;;  %2904 = vbcast.lane.b32.xlu0 %v2894_v21, 272 }
 0x448   :  { %2900 = vbcast.lane.b32.xlu1 %v2894_v21, 264  ;;  %2912 = vbcast.lane.b32.xlu0 %v2894_v21, 288 }
 0x44c   :  { %2908 = vbcast.lane.b32.xlu1 %v2894_v21, 280  ;;  %2920 = vbcast.lane.b32.xlu0 %v2894_v21, 304 }
 0x450   :  { %2916 = vbcast.lane.b32.xlu1 %v2894_v21, 296  ;;  %2928 = vbcast.lane.b32.xlu0 %v2894_v21, 320 }
 0x454   :  { %2924 = vbcast.lane.b32.xlu1 %v2894_v21, 312  ;;  %2936 = vbcast.lane.b32.xlu0 %v2894_v21, 336 }
 0x458   :  { %2932 = vbcast.lane.b32.xlu1 %v2894_v21, 328  ;;  %2944 = vbcast.lane.b32.xlu0 %v2894_v21, 352 }
 0x45c   :  { %2940 = vbcast.lane.b32.xlu1 %v2894_v21, 344  ;;  %2952 = vbcast.lane.b32.xlu0 %v2894_v21, 368 }
 0x460   :  { %2948 = vbcast.lane.b32.xlu1 %v2894_v21, 360  ;;  %2963 = vbcast.lane.b32.xlu0 %v2961_v4, 256 }
 0x464   :  { %2956 = vbcast.lane.b32.xlu1 %v2894_v21, 376  ;;  %2971 = vbcast.lane.b32.xlu0 %v2961_v4, 272  ;;  %v2651_v21 = vld [vmem:[#allocation6 + $0xb0] sm:$0xff] }
 0x468   :  { %2967 = vbcast.lane.b32.xlu1 %v2961_v4, 264  ;;  %2979 = vbcast.lane.b32.xlu0 %v2961_v4, 288 }
 0x46c   :  { %2975 = vbcast.lane.b32.xlu1 %v2961_v4, 280  ;;  %2987 = vbcast.lane.b32.xlu0 %v2961_v4, 304 }
 0x470   :  { %2983 = vbcast.lane.b32.xlu1 %v2961_v4, 296  ;;  %2995 = vbcast.lane.b32.xlu0 %v2961_v4, 320 }
 0x474   :  { %2991 = vbcast.lane.b32.xlu1 %v2961_v4, 312  ;;  %3003 = vbcast.lane.b32.xlu0 %v2961_v4, 336 }
 0x476   :  { %v2767_v36 = vpop.permute.xlu1 %2766  ;;  %v2763_v59 = vpop.permute.xlu0 %2762 }
 0x477   :  { %v3294_v58 = vmul.f32 %v2767_v36, %v2630_v46  ;;  %v3293_v34 = vmul.f32 %v2763_v59, %v2629_v1  ;;  %v2653_v1 = vld [vmem:[#allocation6 + $0xc0] sm:$0xff] }
 0x478   :  { %2999 = vbcast.lane.b32.xlu1 %v2961_v4, 328  ;;  %3011 = vbcast.lane.b32.xlu0 %v2961_v4, 352 }
 0x479   :  { %v3421_v52 = vadd.f32 %v3294_v58, %v3293_v34 }
 0x47a   :  { %v2771_v43 = vpop.permute.xlu1 %2770  ;;  %v5552_v50 = vpop.permute.xlu0 %2778 }
 0x47b   :  { %v3295_v28 = vmul.f32 %v2771_v43, %v2631_v27  ;;  %v3297_v45 = vmul.f32 %v5552_v50, %v2633_v49  ;;  %v2652_v43 = vld [vmem:[#allocation6 + $0xb8] sm:$0xff] }
 0x47c   :  { %3007 = vbcast.lane.b32.xlu1 %v2961_v4, 344  ;;  %3019 = vbcast.lane.b32.xlu0 %v2961_v4, 368  ;;  %v2636_v50 = vld [vmem:[#allocation6 + $0x38] sm:$0xff] }
 0x47d   :  { %v3422_v30 = vadd.f32 %v3421_v52, %v3295_v28  ;;  %v2655_v52 = vld [vmem:[#allocation6 + $0xd0] sm:$0xff] }
 0x47e   :  { %v2775_v6 = vpop.permute.xlu1 %2774  ;;  %v5557_v17 = vpop.permute.xlu0 %2786 }
 0x47f   :  { %v3296_v13 = vmul.f32 %v2775_v6, %v2632_v47 }
 0x480   :  { %3015 = vbcast.lane.b32.xlu1 %v2961_v4, 360  ;;  %3030 = vbcast.lane.b32.xlu0 %v5555_v38, 256 }
 0x481   :  { %v3423_v44 = vadd.f32 %v3422_v30, %v3296_v13 }
 0x482   :  { %v2783_v57 = vpop.permute.xlu1 %2782  ;;  %v5560_v10 = vpop.permute.xlu0 %2794 }
 0x483   :  { %v3298_v26 = vmul.f32 %v2783_v57, %v2634_v62  ;;  %v3424_v53 = vadd.f32 %v3423_v44, %v3297_v45  ;;  %v2658_v45 = vld [vmem:[#allocation6 + $0xe8] sm:$0xff] }
 0x484   :  { %3023 = vbcast.lane.b32.xlu1 %v2961_v4, 376  ;;  %3038 = vbcast.lane.b32.xlu0 %v5555_v38, 272  ;;  %v2635_v4 = vld [vmem:[#allocation6 + $0x30] sm:$0xff] }
 0x485   :  { %v3425_v42 = vadd.f32 %v3424_v53, %v3298_v26  ;;  %v3299_v46 = vmul.f32 %v5557_v17, %v2635_v4  ;;  %v2639_v26 = vld [vmem:[#allocation6 + $0x50] sm:$0xff] }
 0x486   :  { %v5563_v56 = vpop.permute.xlu1 %2790  ;;  %v5565_v29 = vpop.permute.xlu0 %2802 }
 0x487   :  { %v3300_v34 = vmul.f32 %v5563_v56, %v2636_v50  ;;  %v3426_v47 = vadd.f32 %v3425_v42, %v3299_v46  ;;  %v2656_v56 = vld [vmem:[#allocation6 + $0xd8] sm:$0xff]  ;;  %v2661_v50 = vld [vmem:[#allocation6 + $0x100] sm:$0xff]  ;;  %v2663_v46 = vld [vmem:[#allocation6 + $0x110] sm:$0xff] }
 0x488   :  { %3034 = vbcast.lane.b32.xlu1 %v5555_v38, 264  ;;  %3046 = vbcast.lane.b32.xlu0 %v5555_v38, 288 }
 0x489   :  { %v3427_v30 = vadd.f32 %v3426_v47, %v3300_v34  ;;  %v2642_v34 = vld [vmem:[#allocation6 + $0x68] sm:$0xff] }
 0x48a   :  { %v5569_v15 = vpop.permute.xlu1 %2798  ;;  %v5571_v41 = vpop.permute.xlu0 %2810 }
 0x48c   :  { %3042 = vbcast.lane.b32.xlu1 %v5555_v38, 280  ;;  %3054 = vbcast.lane.b32.xlu0 %v5555_v38, 304 }
 0x48e   :  { %v5575_v55 = vpop.permute.xlu1 %2806  ;;  %v5577_v5 = vpop.permute.xlu0 %2818 }
 0x490   :  { %3050 = vbcast.lane.b32.xlu1 %v5555_v38, 296  ;;  %3062 = vbcast.lane.b32.xlu0 %v5555_v38, 320 }
 0x492   :  { %v5582_v7 = vpop.permute.xlu1 %2814  ;;  %v2830_v22 = vpop.permute.xlu0 %2829 }
 0x493   :  { %v3309_v19 = vmul.f32 %v2830_v22, %v2645_v12 }
 0x494   :  { %3058 = vbcast.lane.b32.xlu1 %v5555_v38, 312  ;;  %3070 = vbcast.lane.b32.xlu0 %v5555_v38, 336 }
 0x496   :  { %v5590_v60 = vpop.permute.xlu1 %2822  ;;  %v2838_v2 = vpop.permute.xlu0 %2837 }
 0x497   :  { %v3311_v33 = vmul.f32 %v2838_v2, %v2647_v37  ;;  %v2638_v37 = vld [vmem:[#allocation6 + $0x48] sm:$0xff] }
 0x498   :  { %3066 = vbcast.lane.b32.xlu1 %v5555_v38, 328  ;;  %3101 = vbcast.lane.b32.xlu0 %v5588_v63, 264 }
 0x49a   :  { %v2834_v61 = vpop.permute.xlu1 %2833  ;;  %v2846_v32 = vpop.permute.xlu0 %2845 }
 0x49b   :  { %v3310_v20 = vmul.f32 %v2834_v61, %v2646_v25  ;;  %v3313_v8 = vmul.f32 %v2846_v32, %v2649_v24  ;;  %v2637_v25 = vld [vmem:[#allocation6 + $0x40] sm:$0xff] }
 0x49c   :  { %3097 = vbcast.lane.b32.xlu1 %v5588_v63, 256  ;;  %3168 = vbcast.lane.b32.xlu0 %v5596_v54, 264  ;;  %v3301_v49 = vmul.f32 %v5560_v10, %v2637_v25 }
 0x49d   :  { %v3442_v31 = vadd.f32 %v3310_v20, %v3309_v19  ;;  %v2657_v19 = vld [vmem:[#allocation6 + $0xe0] sm:$0xff] }
 0x49e   :  { %v2842_v11 = vpop.permute.xlu1 %2841  ;;  %v2854_v14 = vpop.permute.xlu0 %2853 }
 0x49f   :  { %v3312_v40 = vmul.f32 %v2842_v11, %v2648_v48  ;;  %v3443_v18 = vadd.f32 %v3442_v31, %v3311_v33  ;;  %v3315_v6 = vmul.f32 %v2854_v14, %v2651_v21  ;;  %v3302_v33 = vmul.f32 %v5569_v15, %v2638_v37  ;;  %v2659_v14 = vld [vmem:[#allocation6 + $0xf0] sm:$0xff]  ;;  %v2660_v15 = vld [vmem:[#allocation6 + $0xf8] sm:$0xff] }
 0x4a0   :  { %3164 = vbcast.lane.b32.xlu1 %v5596_v54, 256  ;;  %3231 = vbcast.lane.b32.xlu0 %v5601_v23, 256  ;;  %v3428_v31 = vadd.f32 %v3427_v30, %v3301_v49  ;;  %v2666_v30 = vld [vmem:[#allocation6 + $0x128] sm:$0xff] }
 0x4a1   :  { %v3444_v0 = vadd.f32 %v3443_v18, %v3312_v40 }
 0x4a2   :  { %v2850_v51 = vpop.permute.xlu1 %2849  ;;  %v2862_v16 = vpop.permute.xlu0 %2861 }
 0x4a3   :  { %v3314_v36 = vmul.f32 %v2850_v51, %v2650_v9  ;;  %v3445_v59 = vadd.f32 %v3444_v0, %v3313_v8  ;;  %v3317_v28 = vmul.f32 %v2862_v16, %v2653_v1  ;;  %v3429_v9 = vadd.f32 %v3428_v31, %v3302_v33  ;;  %v2640_v8 = vld [vmem:[#allocation6 + $0x58] sm:$0xff] }
 0x4a4   :  { %3105 = vbcast.lane.b32.xlu1 %v5588_v63, 272  ;;  %3172 = vbcast.lane.b32.xlu0 %v5596_v54, 272  ;;  %v3303_v51 = vmul.f32 %v5565_v29, %v2639_v26  ;;  %v3304_v42 = vmul.f32 %v5575_v55, %v2640_v8  ;;  %v2664_v55 = vld [vmem:[#allocation6 + $0x118] sm:$0xff] }
 0x4a5   :  { %v3446_v57 = vadd.f32 %v3445_v59, %v3314_v36 }
 0x4a6   :  { %v2858_v39 = vpop.permute.xlu1 %2857  ;;  %v2870_v22 = vpop.permute.xlu0 %2869 }
 0x4a7   :  { %v3316_v27 = vmul.f32 %v2858_v39, %v2652_v43  ;;  %v3447_v58 = vadd.f32 %v3446_v57, %v3315_v6  ;;  %v3319_v61 = vmul.f32 %v2870_v22, %v2655_v52  ;;  %v3430_v43 = vadd.f32 %v3429_v9, %v3303_v51  ;;  %v2662_v6 = vld [vmem:[#allocation6 + $0x108] sm:$0xff]  ;;  %v2641_v22 = vld [vmem:[#allocation6 + $0x60] sm:$0xff] }
 0x4a8   :  { %3235 = vbcast.lane.b32.xlu1 %v5601_v23, 264  ;;  %3239 = vbcast.lane.b32.xlu0 %v5601_v23, 272 }
 0x4a9   :  { %v3448_v2 = vadd.f32 %v3447_v58, %v3316_v27  ;;  %v3431_v58 = vadd.f32 %v3430_v43, %v3304_v42 }
 0x4aa   :  { %v2866_v13 = vpop.permute.xlu1 %2865  ;;  %v2878_v12 = vpop.permute.xlu0 %2877 }
 0x4ab   :  { %v3318_v17 = vmul.f32 %v2866_v13, %v2654_v35  ;;  %v3449_v3 = vadd.f32 %v3448_v2, %v3317_v28  ;;  %v3321_v24 = vmul.f32 %v2878_v12, %v2657_v19  ;;  %v3305_v28 = vmul.f32 %v5571_v41, %v2641_v22  ;;  %v2665_v2 = vld [vmem:[#allocation6 + $0x120] sm:$0xff]  ;;  %v2643_v19 = vld [vmem:[#allocation6 + $0x70] sm:$0xff] }
 0x4ac   :  { %3109 = vbcast.lane.b32.xlu1 %v5588_v63, 280  ;;  %3113 = vbcast.lane.b32.xlu0 %v5588_v63, 288  ;;  %v3307_v31 = vmul.f32 %v5577_v5, %v2643_v19 }
 0x4ad   :  { %v3450_v32 = vadd.f32 %v3449_v3, %v3318_v17  ;;  %v3306_v17 = vmul.f32 %v5582_v7, %v2642_v34  ;;  %v3432_v3 = vadd.f32 %v3431_v58, %v3305_v28  ;;  %v2668_v7 = vld [vmem:[#allocation6 + $0x138] sm:$0xff] }
 0x4ae   :  { %v2874_v20 = vpop.permute.xlu1 %2873  ;;  %v2886_v44 = vpop.permute.xlu0 %2885  ;;  %v2676_v28 = vld [vmem:[#allocation6 + $0x178] sm:$0xff] }
 0x4af   :  { %v3320_v48 = vmul.f32 %v2874_v20, %v2656_v56  ;;  %v3451_v62 = vadd.f32 %v3450_v32, %v3319_v61  ;;  %v3323_v0 = vmul.f32 %v2886_v44, %v2659_v14  ;;  %v2667_v61 = vld [vmem:[#allocation6 + $0x130] sm:$0xff]  ;;  %v3433_v44 = vadd.f32 %v3432_v3, %v3306_v17 }
 0x4b0   :  { %3176 = vbcast.lane.b32.xlu1 %v5596_v54, 280  ;;  %3180 = vbcast.lane.b32.xlu0 %v5596_v54, 288 }
 0x4b1   :  { %v3452_v11 = vadd.f32 %v3451_v62, %v3320_v48  ;;  %v2644_v48 = vld [vmem:[#allocation6 + $0x78] sm:$0xff]  ;;  %v3434_v26 = vadd.f32 %v3433_v44, %v3307_v31 }
 0x4b2   :  { %v2882_v40 = vpop.permute.xlu1 %2881  ;;  %v2897_v18 = vpop.permute.xlu0 %2896 }
 0x4b3   :  { %v3322_v10 = vmul.f32 %v2882_v40, %v2658_v45  ;;  %v3453_v53 = vadd.f32 %v3452_v11, %v3321_v24  ;;  %v3325_v29 = vmul.f32 %v2897_v18, %v2661_v50  ;;  %v2669_v45 = vld [vmem:[#allocation6 + $0x140] sm:$0xff]  ;;  %v3308_v18 = vmul.f32 %v5590_v60, %v2644_v48  ;;  %v2680_v48 = vld [vmem:[#allocation6 + $0x198] sm:$0xff] }
 0x4b4   :  { %3243 = vbcast.lane.b32.xlu1 %v5601_v23, 280  ;;  %3247 = vbcast.lane.b32.xlu0 %v5601_v23, 288 }
 0x4b5   :  { %v3454_v21 = vadd.f32 %v3453_v53, %v3322_v10  ;;  %v2670_v10 = vld [vmem:[#allocation6 + $0x148] sm:$0xff]  ;;  %v3435_v51 = vadd.f32 %v3434_v26, %v3308_v18 }
 0x4b6   :  { %v2890_v16 = vpop.permute.xlu1 %2889  ;;  %v2905_v4 = vpop.permute.xlu0 %2904 }
 0x4b7   :  { %v3324_v36 = vmul.f32 %v2890_v16, %v2660_v15  ;;  %v3455_v59 = vadd.f32 %v3454_v21, %v3323_v0  ;;  %v3327_v47 = vmul.f32 %v2905_v4, %v2663_v46  ;;  %v2671_v15 = vld [vmem:[#allocation6 + $0x150] sm:$0xff]  ;;  %v2672_v16 = vld [vmem:[#allocation6 + $0x158] sm:$0xff]  ;;  %v3436_v46 = vrot.slane %v3435_v51, 4 }
 0x4b8   :  { %3117 = vbcast.lane.b32.xlu1 %v5588_v63, 296  ;;  %3121 = vbcast.lane.b32.xlu0 %v5588_v63, 304 }
 0x4b9   :  { %v5624_v57 = vadd.f32 %v3455_v59, %v3324_v36  ;;  %v2673_v59 = vld [vmem:[#allocation6 + $0x160] sm:$0xff] }
 0x4ba   :  { %v2901_v1 = vpop.permute.xlu1 %2900  ;;  %v2913_v39 = vpop.permute.xlu0 %2912 }
 0x4bb   :  { %v3326_v27 = vmul.f32 %v2901_v1, %v2662_v6  ;;  %v3329_v56 = vmul.f32 %v2913_v39, %v2665_v2  ;;  %v3457_v36 = vrot.slane %v5624_v57, 4  ;;  %v2674_v1 = vld [vmem:[#allocation6 + $0x168] sm:$0xff] }
 0x4bc   :  { %3184 = vbcast.lane.b32.xlu1 %v5596_v54, 296  ;;  %3188 = vbcast.lane.b32.xlu0 %v5596_v54, 304 }
 0x4bd   :  { %v3463_v35 = vadd.f32 %v3326_v27, %v3325_v29  ;;  %v3458_v29 = vadd.f32 %v3457_v36, %v5624_v57  ;;  %v2675_v27 = vld [vmem:[#allocation6 + $0x170] sm:$0xff]  ;;  %v2677_v57 = vld [vmem:[#allocation6 + $0x180] sm:$0xff] }
 0x4be   :  { %v2909_v52 = vpop.permute.xlu1 %2908  ;;  %v2921_v13 = vpop.permute.xlu0 %2920 }
 0x4bf   :  { %v3328_v12 = vmul.f32 %v2909_v52, %v2664_v55  ;;  %v3464_v25 = vadd.f32 %v3463_v35, %v3327_v47  ;;  %v3331_v62 = vmul.f32 %v2921_v13, %v2667_v61  ;;  %v3437_v35 = vadd.f32 %v3436_v46, %v3435_v51  ;;  %v2685_v46 = vld [vmem:[#allocation6 + $0x1c0] sm:$0xff] }
 0x4c0   :  { %3251 = vbcast.lane.b32.xlu1 %v5601_v23, 296  ;;  %3255 = vbcast.lane.b32.xlu0 %v5601_v23, 304  ;;  %v3459_v13 = vrot.slane %v3458_v29, 2 }
 0x4c1   :  { %v3465_v37 = vadd.f32 %v3464_v25, %v3328_v12 }
 0x4c2   :  { %v2917_v32 = vpop.permute.xlu1 %2916  ;;  %v2929_v49 = vpop.permute.xlu0 %2928  ;;  %v3460_v61 = vadd.f32 %v3459_v13, %v3458_v29  ;;  %v2688_v13 = vld [vmem:[#allocation6 + $0x1d8] sm:$0xff] }
 0x4c3   :  { %v3330_v41 = vmul.f32 %v2917_v32, %v2666_v30  ;;  %v3466_v20 = vadd.f32 %v3465_v37, %v3329_v56  ;;  %v3333_v53 = vmul.f32 %v2929_v49, %v2669_v45  ;;  %v3438_v30 = vrot.slane %v3437_v35, 2  ;;  %v2678_v56 = vld [vmem:[#allocation6 + $0x188] sm:$0xff]  ;;  %v2679_v32 = vld [vmem:[#allocation6 + $0x190] sm:$0xff] }
 0x4c4   :  { %3125 = vbcast.lane.b32.xlu1 %v5588_v63, 312  ;;  %3129 = vbcast.lane.b32.xlu0 %v5588_v63, 320  ;;  %v3461_v45 = vrot.slane %v3460_v61, 1 }
 0x4c5   :  { %v3467_v33 = vadd.f32 %v3466_v20, %v3330_v41 }
 0x4c6   :  { %v2925_v24 = vpop.permute.xlu1 %2924  ;;  %v2937_v11 = vpop.permute.xlu0 %2936 }
 0x4c7   :  { %v3332_v14 = vmul.f32 %v2925_v24, %v2668_v7  ;;  %v3468_v40 = vadd.f32 %v3467_v33, %v3331_v62  ;;  %v3335_v60 = vmul.f32 %v2937_v11, %v2671_v15  ;;  %v3439_v7 = vadd.f32 %v3438_v30, %v3437_v35  ;;  %v2681_v24 = vld [vmem:[#allocation6 + $0x1a0] sm:$0xff] }
 0x4c8   :  { %3192 = vbcast.lane.b32.xlu1 %v5596_v54, 312  ;;  %3196 = vbcast.lane.b32.xlu0 %v5596_v54, 320 }
 0x4c9   :  { %v3469_v9 = vadd.f32 %v3468_v40, %v3332_v14 }
 0x4ca   :  { %v2933_v8 = vpop.permute.xlu1 %2932  ;;  %v2945_v0 = vpop.permute.xlu0 %2944 }
 0x4cb   :  { %v3334_v21 = vmul.f32 %v2933_v8, %v2670_v10  ;;  %v3470_v5 = vadd.f32 %v3469_v9, %v3333_v53  ;;  %v3337_v39 = vmul.f32 %v2945_v0, %v2673_v59  ;;  %v3440_v10 = vrot.slane %v3439_v7, 1  ;;  %v2682_v53 = vld [vmem:[#allocation6 + $0x1a8] sm:$0xff]  ;;  %v2684_v59 = vld [vmem:[#allocation6 + $0x1b8] sm:$0xff] }
 0x4cc   :  { %3259 = vbcast.lane.b32.xlu1 %v5601_v23, 312  ;;  %3263 = vbcast.lane.b32.xlu0 %v5601_v23, 320  ;;  %v3462_v0 = vadd.f32 %v3461_v45, %v3460_v61 }
 0x4cd   :  { %v3471_v4 = vadd.f32 %v3470_v5, %v3334_v21  ;;  %v2683_v21 = vld [vmem:[#allocation6 + $0x1b0] sm:$0xff]  ;;  %v3441_v36 = vadd.f32 %v3440_v10, %v3439_v7  ;;  %v2692_v7 = vld [vmem:[#allocation6 + $0x1f8] sm:$0xff] }
 0x4ce   :  { %v2941_v42 = vpop.permute.xlu1 %2940  ;;  %v2953_v43 = vpop.permute.xlu0 %2952 }
 0x4cf   :  { %v3336_v50 = vmul.f32 %v2941_v42, %v2672_v16  ;;  %v3472_v6 = vadd.f32 %v3471_v4, %v3335_v60  ;;  %v3339_v2 = vmul.f32 %v2953_v43, %v2675_v27 }
 0x4d0   :  { %3133 = vbcast.lane.b32.xlu1 %v5588_v63, 328  ;;  %3137 = vbcast.lane.b32.xlu0 %v5588_v63, 336 }
 0x4d1   :  { %v3473_v22 = vadd.f32 %v3472_v6, %v3336_v50  ;;  %v3605_v6 = vsel %vm2601_vm0, %v3462_v0, %v3441_v36  ;;  %v2698_v36 = vld [vmem:[#allocation6 + $0x228] sm:$0xff] }
 0x4d2   :  { %v2949_v58 = vpop.permute.xlu1 %2948  ;;  %v2964_v55 = vpop.permute.xlu0 %2963 }
 0x4d3   :  { %v3338_v34 = vmul.f32 %v2949_v58, %v2674_v1  ;;  %v3474_v47 = vadd.f32 %v3473_v22, %v3337_v39  ;;  %v3341_v41 = vmul.f32 %v2964_v55, %v2677_v57  ;;  %v2686_v58 = vld [vmem:[#allocation6 + $0x1c8] sm:$0xff] }
 0x4d4   :  { %3200 = vbcast.lane.b32.xlu1 %v5596_v54, 328  ;;  %3074 = vbcast.lane.b32.xlu0 %v5555_v38, 344 }
 0x4d5   :  { %v3475_v52 = vadd.f32 %v3474_v47, %v3338_v34  ;;  %v2687_v47 = vld [vmem:[#allocation6 + $0x1d0] sm:$0xff] }
 0x4d6   :  { %v2957_v12 = vpop.permute.xlu1 %2956  ;;  %v2972_v25 = vpop.permute.xlu0 %2971 }
 0x4d7   :  { %v3340_v17 = vmul.f32 %v2957_v12, %v2676_v28  ;;  %v3476_v3 = vadd.f32 %v3475_v52, %v3339_v2  ;;  %v3343_v33 = vmul.f32 %v2972_v25, %v2679_v32 }
 0x4d8   :  { %3267 = vbcast.lane.b32.xlu1 %v5601_v23, 328  ;;  %3141 = vbcast.lane.b32.xlu0 %v5588_v63, 344 }
 0x4d9   :  { %v3477_v37 = vadd.f32 %v3476_v3, %v3340_v17  ;;  %v2689_v17 = vld [vmem:[#allocation6 + $0x1e0] sm:$0xff] }
 0x4da   :  { %v2968_v49 = vpop.permute.xlu1 %2967  ;;  %v2980_v19 = vpop.permute.xlu0 %2979 }
 0x4db   :  { %v3478_v20 = vrot.slane %v3477_v37, 4  ;;  %v3342_v44 = vmul.f32 %v2968_v49, %v2678_v56  ;;  %v3345_v15 = vmul.f32 %v2980_v19, %v2681_v24  ;;  %v2691_v49 = vld [vmem:[#allocation6 + $0x1f0] sm:$0xff] }
 0x4dc   :  { %3204 = vbcast.lane.b32.xlu1 %v5596_v54, 336  ;;  %3078 = vbcast.lane.b32.xlu0 %v5555_v38, 352 }
 0x4dd   :  { %v3479_v62 = vadd.f32 %v3478_v20, %v3477_v37  ;;  %v3484_v31 = vadd.f32 %v3342_v44, %v3341_v41  ;;  %v2690_v37 = vld [vmem:[#allocation6 + $0x1e8] sm:$0xff] }
 0x4de   :  { %v2976_v11 = vpop.permute.xlu1 %2975  ;;  %v2988_v14 = vpop.permute.xlu0 %2987 }
 0x4df   :  { %v3480_v40 = vrot.slane %v3479_v62, 2  ;;  %v3344_v18 = vmul.f32 %v2976_v11, %v2680_v48  ;;  %v3485_v26 = vadd.f32 %v3484_v31, %v3343_v33  ;;  %v3347_v43 = vmul.f32 %v2988_v14, %v2683_v21  ;;  %v2693_v11 = vld [vmem:[#allocation6 + $0x200] sm:$0xff]  ;;  %v2694_v14 = vld [vmem:[#allocation6 + $0x208] sm:$0xff] }
 0x4e0   :  { %3271 = vbcast.lane.b32.xlu1 %v5601_v23, 336  ;;  %3145 = vbcast.lane.b32.xlu0 %v5588_v63, 352 }
 0x4e1   :  { %v3481_v9 = vadd.f32 %v3480_v40, %v3479_v62  ;;  %v3486_v8 = vadd.f32 %v3485_v26, %v3344_v18  ;;  %v2695_v18 = vld [vmem:[#allocation6 + $0x210] sm:$0xff] }
 0x4e2   :  { %v2984_v5 = vpop.permute.xlu1 %2983  ;;  %v2996_v51 = vpop.permute.xlu0 %2995 }
 0x4e3   :  { %v3482_v16 = vrot.slane %v3481_v9, 1  ;;  %v3346_v60 = vmul.f32 %v2984_v5, %v2682_v53  ;;  %v3487_v4 = vadd.f32 %v3486_v8, %v3345_v15  ;;  %v3349_v55 = vmul.f32 %v2996_v51, %v2685_v46  ;;  %v2696_v15 = vld [vmem:[#allocation6 + $0x218] sm:$0xff]  ;;  %v2697_v5 = vld [vmem:[#allocation6 + $0x220] sm:$0xff] }
 0x4e4   :  { %3208 = vbcast.lane.b32.xlu1 %v5596_v54, 344  ;;  %3082 = vbcast.lane.b32.xlu0 %v5555_v38, 360 }
 0x4e5   :  { %v3483_v42 = vadd.f32 %v3482_v16, %v3481_v9  ;;  %v3488_v50 = vadd.f32 %v3487_v4, %v3346_v60 }
 0x4e6   :  { %v2992_v1 = vpop.permute.xlu1 %2991  ;;  %v3004_v39 = vpop.permute.xlu0 %3003 }
 0x4e7   :  { %v5656_v22 = vsel %vm2603_vm1, %v3483_v42, %v3605_v6  ;;  %v3348_v29 = vmul.f32 %v2992_v1, %v2684_v59  ;;  %v3489_v27 = vadd.f32 %v3488_v50, %v3347_v43  ;;  %v3351_v12 = vmul.f32 %v3004_v39, %v2687_v47  ;;  %v2699_v50 = vld [vmem:[#allocation6 + $0x230] sm:$0xff] }
 0x4e8   :  { %3275 = vbcast.lane.b32.xlu1 %v5601_v23, 344  ;;  %3149 = vbcast.lane.b32.xlu0 %v5588_v63, 360 }
 0x4e9   :  { %v3490_v34 = vadd.f32 %v3489_v27, %v3348_v29  ;;  %v2700_v29 = vld [vmem:[#allocation6 + $0x238] sm:$0xff] }
 0x4ea   :  { %v3000_v35 = vpop.permute.xlu1 %2999  ;;  %v3012_v28 = vpop.permute.xlu0 %3011 }
 0x4eb   :  { %v3350_v2 = vmul.f32 %v3000_v35, %v2686_v58  ;;  %v3491_v52 = vadd.f32 %v3490_v34, %v3349_v55  ;;  %v3353_v61 = vmul.f32 %v3012_v28, %v2689_v17  ;;  %v2701_v34 = vld [vmem:[#allocation6 + $0x240] sm:$0xff]  ;;  %v2703_v17 = vld [vmem:[#allocation6 + $0x250] sm:$0xff] }
 0x4ec   :  { %3212 = vbcast.lane.b32.xlu1 %v5596_v54, 352  ;;  %3086 = vbcast.lane.b32.xlu0 %v5555_v38, 368 }
 0x4ed   :  { %v3492_v25 = vadd.f32 %v3491_v52, %v3350_v2 }
 0x4ee   :  { %v3008_v3 = vpop.permute.xlu1 %3007  ;;  %v3020_v30 = vpop.permute.xlu0 %3019 }
 0x4ef   :  { %v3352_v57 = vmul.f32 %v3008_v3, %v2688_v13  ;;  %v3493_v56 = vadd.f32 %v3492_v25, %v3351_v12  ;;  %v3355_v48 = vmul.f32 %v3020_v30, %v2691_v49  ;;  %v2702_v13 = vld [vmem:[#allocation6 + $0x248] sm:$0xff] }
 0x4f0   :  { %3279 = vbcast.lane.b32.xlu1 %v5601_v23, 352  ;;  %3153 = vbcast.lane.b32.xlu0 %v5588_v63, 368 }
 0x4f1   :  { %v3494_v32 = vadd.f32 %v3493_v56, %v3352_v57  ;;  %v2710_v56 = vld [vmem:[#allocation6 + $0x288] sm:$0xff] }
 0x4f2   :  { %v3016_v19 = vpop.permute.xlu1 %3015  ;;  %v3031_v41 = vpop.permute.xlu0 %3030 }
 0x4f3   :  { %v3354_v20 = vmul.f32 %v3016_v19, %v2690_v37  ;;  %v3495_v44 = vadd.f32 %v3494_v32, %v3353_v61  ;;  %v3357_v53 = vmul.f32 %v3031_v41, %v2693_v11  ;;  %v2709_v37 = vld [vmem:[#allocation6 + $0x280] sm:$0xff] }
 0x4f4   :  { %3216 = vbcast.lane.b32.xlu1 %v5596_v54, 360  ;;  %3090 = vbcast.lane.b32.xlu0 %v5555_v38, 376 }
 0x4f5   :  { %v3496_v62 = vadd.f32 %v3495_v44, %v3354_v20 }
 0x4f6   :  { %v3024_v33 = vpop.permute.xlu1 %3023  ;;  %v3039_v31 = vpop.permute.xlu0 %3038 }
 0x4f7   :  { %v3356_v45 = vmul.f32 %v3024_v33, %v2692_v7  ;;  %v3497_v24 = vadd.f32 %v3496_v62, %v3355_v48  ;;  %v3359_v0 = vmul.f32 %v3039_v31, %v2695_v18 }
 0x4f8   :  { %3283 = vbcast.lane.b32.xlu1 %v5601_v23, 360  ;;  %3157 = vbcast.lane.b32.xlu0 %v5588_v63, 376 }
 0x4f9   :  { %v3498_v40 = vadd.f32 %v3497_v24, %v3356_v45 }
 0x4fa   :  { %v3035_v26 = vpop.permute.xlu1 %3034  ;;  %v3047_v10 = vpop.permute.xlu0 %3046 }
 0x4fb   :  { %v3499_v9 = vrot.slane %v3498_v40, 4  ;;  %v3358_v38 = vmul.f32 %v3035_v26, %v2694_v14  ;;  %v3361_v42 = vmul.f32 %v3047_v10, %v2697_v5 }
 0x4fc   :  { %3220 = vbcast.lane.b32.xlu1 %v5596_v54, 368  ;;  %3224 = vbcast.lane.b32.xlu0 %v5596_v54, 376 }
 0x4fd   :  { %v3500_v8 = vadd.f32 %v3499_v9, %v3498_v40  ;;  %v3505_v21 = vadd.f32 %v3358_v38, %v3357_v53 }
 0x4fe   :  { %v3043_v51 = vpop.permute.xlu1 %3042  ;;  %v3055_v16 = vpop.permute.xlu0 %3054 }
 0x4ff   :  { %v3501_v63 = vrot.slane %v3500_v8, 2  ;;  %v3360_v60 = vmul.f32 %v3043_v51, %v2696_v15  ;;  %v3506_v4 = vadd.f32 %v3505_v21, %v3359_v0  ;;  %v3363_v58 = vmul.f32 %v3055_v16, %v2699_v50 }
 0x500   :  { %3287 = vbcast.lane.b32.xlu1 %v5601_v23, 368 }
 0x501   :  { %v3502_v59 = vadd.f32 %v3501_v63, %v3500_v8  ;;  %v3507_v43 = vadd.f32 %v3506_v4, %v3360_v60 }
 0x502   :  { %v3051_v6 = vpop.permute.xlu1 %3050  ;;  %v3063_v46 = vpop.permute.xlu0 %3062 }
 0x503   :  { %v3503_v54 = vrot.slane %v3502_v59, 1  ;;  %v3362_v1 = vmul.f32 %v3051_v6, %v2698_v36  ;;  %v3508_v39 = vadd.f32 %v3507_v43, %v3361_v42  ;;  %v3365_v12 = vmul.f32 %v3063_v46, %v2701_v34 }
 0x504   :  { %3291 = vbcast.lane.b32.xlu1 %v5601_v23, 376 }
 0x505   :  { %v3504_v27 = vadd.f32 %v3503_v54, %v3502_v59  ;;  %v3509_v55 = vadd.f32 %v3508_v39, %v3362_v1 }
 0x506   :  { %v3059_v47 = vpop.permute.xlu1 %3058  ;;  %v3071_v35 = vpop.permute.xlu0 %3070 }
 0x507   :  { %v3364_v28 = vmul.f32 %v3059_v47, %v2700_v29  ;;  %v3510_v2 = vadd.f32 %v3509_v55, %v3363_v58  ;;  %v5674_v52 = vsel %vm2605_vm2, %v3504_v27, %v5656_v22 }
 0x509   :  { %v3511_v25 = vadd.f32 %v3510_v2, %v3364_v28 }
 0x50a   :  { %v3067_v3 = vpop.permute.xlu1 %3066  ;;  %v3102_v30 = vpop.permute.xlu0 %3101 }
 0x50b   :  { %v3366_v23 = vmul.f32 %v3067_v3, %v2702_v13  ;;  %v3512_v57 = vadd.f32 %v3511_v25, %v3365_v12 }
 0x50c   :  { %4176 = shalt.err (!%p4173_p10)
}
 0x50d   :  { %3633 = dma.vmem_to_hbm [thread:$0]  %s3631_s29, 128, %s5749_s8, [#allocation13]   ;;  %v3367_v22 = vmul.f32 %v3071_v35, %v2703_v17  ;;  %v3513_v61 = vadd.f32 %v3512_v57, %v3366_v23  ;;  %v3374_v19 = vmul.f32 %v3102_v30, %v2710_v56  ;;  %v2726_v44 = vld [vmem:[#allocation6 + $0x308] sm:$0xff]  ;;  %v2725_v7 = vld [vmem:[#allocation6 + $0x300] sm:$0xff]  ;;  %v2711_v24 = vld [vmem:[#allocation6 + $0x290] sm:$0xff] }
 0x50e   :  { %v3098_v32 = vpop.permute.xlu1 %3097  ;;  %v3169_v49 = vpop.permute.xlu0 %3168  ;;  %v2741_v26 = vld [vmem:[#allocation6 + $0x380] sm:$0xff]  ;;  %v2742_v10 = vld [vmem:[#allocation6 + $0x388] sm:$0xff]  ;;  %v2712_v55 = vld [vmem:[#allocation6 + $0x298] sm:$0xff]  ;;  %s4227_s8 = smov [#allocation11]  }
 0x50f   :  { %v3373_v41 = vmul.f32 %v3098_v32, %v2709_v37  ;;  %v5679_v20 = vadd.f32 %v3513_v61, %v3367_v22  ;;  %v3390_v31 = vmul.f32 %v3169_v49, %v2726_v44  ;;  %v2727_v13 = vld [vmem:[#allocation6 + $0x310] sm:$0xff]  ;;  %v2713_v12 = vld [vmem:[#allocation6 + $0x2a0] sm:$0xff]  ;;  %v2714_v25 = vld [vmem:[#allocation6 + $0x2a8] sm:$0xff]  ;;  %s3620_s11 = sshll.u32 %s4227_s8, 4  ;;  %s3621_s11 = int_to_ptr.vmem [resolvable:$true] %s3620_s11 }
 0x510   :  { %v2728_v3 = vld [vmem:[#allocation6 + $0x318] sm:$0xff]  ;;  %v2743_v49 = vld [vmem:[#allocation6 + $0x390] sm:$0xff]  ;;  %s4185_s12 = scalar_lea.vmem %s3621_s11, 128  ;;  %p4190_p12 = scmp.lt.s32.totalorder %s3621_s11, %s3621_s11 }
 0x511   :  { %v3526_v48 = vadd.f32 %v3374_v19, %v3373_v41  ;;  %v2715_v19 = vld [vmem:[#allocation6 + $0x2b0] sm:$0xff]  ;;  %v2716_v41 = vld [vmem:[#allocation6 + $0x2b8] sm:$0xff]  ;;  %p4186_p11 = scmp.ne.s32.totalorder %s3621_s11, %s4185_s12  ;;  %p4191_p13 = scmp.lt.s32.totalorder %s4185_s12, %s4185_s12 }
 0x512   :  { %v3165_v62 = vpop.permute.xlu1 %3164  ;;  %v3232_v33 = vpop.permute.xlu0 %3231 }
 0x513   :  { %v3389_v45 = vmul.f32 %v3165_v62, %v2725_v7  ;;  %v3405_v15 = vmul.f32 %v3232_v33, %v2741_v26  ;;  %v2744_v62 = vld [vmem:[#allocation6 + $0x398] sm:$0xff]  ;;  %p4192_p0 = por %p4191_p13, %p4190_p12 }
 0x515   :  { %v3547_v11 = vadd.f32 %v3390_v31, %v3389_v45  ;;  %v2730_v31 = vld [vmem:[#allocation6 + $0x328] sm:$0xff]  ;;  %p4193_p1 = pnand %p4192_p0, %p4186_p11 }
 0x516   :  { %v3106_v14 = vpop.permute.xlu1 %3105  ;;  %v3173_v40 = vpop.permute.xlu0 %3172 }
 0x517   :  { %v3375_v18 = vmul.f32 %v3106_v14, %v2711_v24  ;;  %v3391_v30 = vmul.f32 %v3173_v40, %v2727_v13  ;;  %v2732_v13 = vld [vmem:[#allocation6 + $0x338] sm:$0xff] }
 0x519   :  { %v3527_v53 = vadd.f32 %v3526_v48, %v3375_v18  ;;  %v3548_v32 = vadd.f32 %v3547_v11, %v3391_v30  ;;  %v2729_v48 = vld [vmem:[#allocation6 + $0x320] sm:$0xff] }
 0x51a   :  { %v3236_v9 = vpop.permute.xlu1 %3235  ;;  %v3240_v38 = vpop.permute.xlu0 %3239  ;;  %v2705_v30 = vld [vmem:[#allocation6 + $0x260] sm:$0xff] }
 0x51b   :  { %v3406_v8 = vmul.f32 %v3236_v9, %v2742_v10  ;;  %v3407_v40 = vmul.f32 %v3240_v38, %v2743_v49  ;;  %v2719_v49 = vld [vmem:[#allocation6 + $0x2d0] sm:$0xff] }
 0x51d   :  { %v3568_v0 = vadd.f32 %v3406_v8, %v3405_v15 }
 0x51e   :  { %v3110_v21 = vpop.permute.xlu1 %3109  ;;  %v3114_v5 = vpop.permute.xlu0 %3113 }
 0x51f   :  { %v3376_v35 = vmul.f32 %v3110_v21, %v2712_v55  ;;  %v3377_v56 = vmul.f32 %v3114_v5, %v2713_v12  ;;  %v3569_v15 = vadd.f32 %v3568_v0, %v3407_v40  ;;  %v2745_v21 = vld [vmem:[#allocation6 + $0x3a0] sm:$0xff]  ;;  %v2746_v55 = vld [vmem:[#allocation6 + $0x3a8] sm:$0xff]  ;;  %v2735_v40 = vld [vmem:[#allocation6 + $0x350] sm:$0xff] }
 0x520   :  { %v2717_v5 = vld [vmem:[#allocation6 + $0x2c0] sm:$0xff] }
 0x521   :  { %v3528_v17 = vadd.f32 %v3527_v53, %v3376_v35 }
 0x522   :  { %v3177_v51 = vpop.permute.xlu1 %3176  ;;  %v3181_v16 = vpop.permute.xlu0 %3180 }
 0x523   :  { %v3392_v22 = vmul.f32 %v3177_v51, %v2728_v3  ;;  %v3529_v61 = vadd.f32 %v3528_v17, %v3377_v56  ;;  %v3393_v18 = vmul.f32 %v3181_v16, %v2729_v48  ;;  %v2718_v51 = vld [vmem:[#allocation6 + $0x2c8] sm:$0xff]  ;;  %v2747_v56 = vld [vmem:[#allocation6 + $0x3b0] sm:$0xff] }
 0x525   :  { %v3549_v45 = vadd.f32 %v3548_v32, %v3392_v22 }
 0x526   :  { %v3244_v63 = vpop.permute.xlu1 %3243  ;;  %v5681_v60 = vpop.permute.xlu0 %3247 }
 0x527   :  { %v3408_v26 = vmul.f32 %v3244_v63, %v2744_v62  ;;  %v3550_v8 = vadd.f32 %v3549_v45, %v3393_v18  ;;  %v2748_v62 = vld [vmem:[#allocation6 + $0x3b8] sm:$0xff]  ;;  %v2721_v45 = vld [vmem:[#allocation6 + $0x2e0] sm:$0xff] }
 0x529   :  { %v3570_v12 = vadd.f32 %v3569_v15, %v3408_v26  ;;  %v2722_v15 = vld [vmem:[#allocation6 + $0x2e8] sm:$0xff] }
 0x52a   :  { %v3118_v4 = vpop.permute.xlu1 %3117  ;;  %v3122_v36 = vpop.permute.xlu0 %3121 }
 0x52b   :  { %v3378_v37 = vmul.f32 %v3118_v4, %v2714_v25  ;;  %v3379_v24 = vmul.f32 %v3122_v36, %v2715_v19  ;;  %v2731_v4 = vld [vmem:[#allocation6 + $0x330] sm:$0xff]  ;;  %v3409_v25 = vmul.f32 %v5681_v60, %v2745_v21  ;;  %v2720_v19 = vld [vmem:[#allocation6 + $0x2d8] sm:$0xff] }
 0x52d   :  { %v3530_v33 = vadd.f32 %v3529_v61, %v3378_v37  ;;  %v3571_v61 = vadd.f32 %v3570_v12, %v3409_v25 }
 0x52e   :  { %v3185_v59 = vpop.permute.xlu1 %3184  ;;  %v5683_v42 = vpop.permute.xlu0 %3188 }
 0x52f   :  { %v3394_v10 = vmul.f32 %v3185_v59, %v2730_v31  ;;  %v3531_v9 = vadd.f32 %v3530_v33, %v3379_v24  ;;  %v3395_v0 = vmul.f32 %v5683_v42, %v2731_v4  ;;  %v2734_v33 = vld [vmem:[#allocation6 + $0x348] sm:$0xff] }
 0x531   :  { %v3551_v36 = vadd.f32 %v3550_v8, %v3394_v10 }
 0x532   :  { %v5685_v43 = vpop.permute.xlu1 %3251  ;;  %v5687_v50 = vpop.permute.xlu0 %3255 }
 0x533   :  { %v3410_v17 = vmul.f32 %v5685_v43, %v2746_v55  ;;  %v3552_v32 = vadd.f32 %v3551_v36, %v3395_v0  ;;  %v3411_v26 = vmul.f32 %v5687_v50, %v2747_v56  ;;  %v2723_v50 = vld [vmem:[#allocation6 + $0x2f0] sm:$0xff] }
 0x534   :  { %v2751_v0 = vld [vmem:[#allocation6 + $0x3d0] sm:$0xff] }
 0x535   :  { %v3572_v31 = vadd.f32 %v3571_v61, %v3410_v17  ;;  %v2738_v61 = vld [vmem:[#allocation6 + $0x368] sm:$0xff] }
 0x536   :  { %v3126_v6 = vpop.permute.xlu1 %3125  ;;  %v3130_v46 = vpop.permute.xlu0 %3129 }
 0x537   :  { %v3380_v14 = vmul.f32 %v3126_v6, %v2716_v41  ;;  %v2704_v6 = vld [vmem:[#allocation6 + $0x258] sm:$0xff]  ;;  %v3381_v63 = vmul.f32 %v3130_v46, %v2717_v5  ;;  %v2706_v41 = vld [vmem:[#allocation6 + $0x268] sm:$0xff] }
 0x539   :  { %v3532_v35 = vadd.f32 %v3531_v9, %v3380_v14 }
 0x53a   :  { %v5689_v54 = vpop.permute.xlu1 %3192  ;;  %v5691_v1 = vpop.permute.xlu0 %3196 }
 0x53b   :  { %v3396_v3 = vmul.f32 %v5689_v54, %v2732_v13  ;;  %v3533_v37 = vadd.f32 %v3532_v35, %v3381_v63  ;;  %v2707_v54 = vld [vmem:[#allocation6 + $0x270] sm:$0xff]  ;;  %v2708_v35 = vld [vmem:[#allocation6 + $0x278] sm:$0xff]  ;;  %v2750_v13 = vld [vmem:[#allocation6 + $0x3c8] sm:$0xff] }
 0x53d   :  { %v3553_v43 = vadd.f32 %v3552_v32, %v3396_v3  ;;  %v2724_v32 = vld [vmem:[#allocation6 + $0x2f8] sm:$0xff] }
 0x53e   :  { %v5693_v39 = vpop.permute.xlu1 %3259  ;;  %v5695_v29 = vpop.permute.xlu0 %3263 }
 0x53f   :  { %v3412_v9 = vmul.f32 %v5693_v39, %v2748_v62 }
 0x542   :  { %v3134_v27 = vpop.permute.xlu1 %3133  ;;  %v5697_v58 = vpop.permute.xlu0 %3137 }
 0x543   :  { %v3382_v59 = vmul.f32 %v3134_v27, %v2718_v51  ;;  %v2733_v27 = vld [vmem:[#allocation6 + $0x340] sm:$0xff]  ;;  %v3383_v24 = vmul.f32 %v5697_v58, %v2719_v49 }
 0x544   :  { %v3397_v10 = vmul.f32 %v5691_v1, %v2733_v27  ;;  %v2749_v1 = vld [vmem:[#allocation6 + $0x3c0] sm:$0xff] }
 0x545   :  { %v3534_v60 = vadd.f32 %v3533_v37, %v3382_v59  ;;  %v2737_v59 = vld [vmem:[#allocation6 + $0x360] sm:$0xff] }
 0x546   :  { %v5699_v34 = vpop.permute.xlu1 %3200  ;;  %v3075_v47 = vpop.permute.xlu0 %3074  ;;  %v3554_v55 = vadd.f32 %v3553_v43, %v3397_v10 }
 0x547   :  { %v3368_v22 = vmul.f32 %v3075_v47, %v2704_v6  ;;  %v3535_v5 = vadd.f32 %v3534_v60, %v3383_v24 }
 0x549   :  { %v3515_v47 = vadd.f32 %v5679_v20, %v3368_v22  ;;  %v2736_v20 = vld [vmem:[#allocation6 + $0x358] sm:$0xff] }
 0x54a   :  { %v5701_v28 = vpop.permute.xlu1 %3267  ;;  %v5703_v2 = vpop.permute.xlu0 %3141 }
 0x54b   :  { %v3384_v14 = vmul.f32 %v5703_v2, %v2720_v19  ;;  %v3573_v2 = vadd.f32 %v3572_v31, %v3411_v26  ;;  %v3414_v37 = vmul.f32 %v5701_v28, %v2750_v13 }
 0x54d   :  { %v3536_v39 = vadd.f32 %v3535_v5, %v3384_v14  ;;  %v3574_v36 = vadd.f32 %v3573_v2, %v3412_v9  ;;  %v2754_v14 = vld [vmem:[#allocation6 + $0x3e8] sm:$0xff] }
 0x54e   :  { %v5705_v23 = vpop.permute.xlu1 %3204  ;;  %v3079_v57 = vpop.permute.xlu0 %3078 }
 0x54f   :  { %v3369_v42 = vmul.f32 %v3079_v57, %v2705_v30  ;;  %v3398_v57 = vmul.f32 %v5699_v34, %v2734_v33  ;;  %v2753_v33 = vld [vmem:[#allocation6 + $0x3e0] sm:$0xff] }
 0x551   :  { %v3516_v51 = vadd.f32 %v3515_v47, %v3369_v42  ;;  %v3555_v6 = vadd.f32 %v3554_v55, %v3398_v57 }
 0x552   :  { %v5707_v44 = vpop.permute.xlu1 %3271  ;;  %v5709_v7 = vpop.permute.xlu0 %3145 }
 0x553   :  { %v3385_v58 = vmul.f32 %v5709_v7, %v2721_v45 }
 0x555   :  { %v3537_v17 = vadd.f32 %v3536_v39, %v3385_v58  ;;  %v2755_v58 = vld [vmem:[#allocation6 + $0x3f0] sm:$0xff]  ;;  %v2756_v39 = vld [vmem:[#allocation6 + $0x3f8] sm:$0xff] }
 0x556   :  { %v5711_v53 = vpop.permute.xlu1 %3208  ;;  %v3083_v11 = vpop.permute.xlu0 %3082 }
 0x557   :  { %v3370_v18 = vmul.f32 %v3083_v11, %v2706_v41  ;;  %v3399_v11 = vmul.f32 %v5705_v23, %v2735_v40  ;;  %v3400_v63 = vmul.f32 %v5711_v53, %v2736_v20  ;;  %v3413_v23 = vmul.f32 %v5695_v29, %v2749_v1 }
 0x559   :  { %v3517_v12 = vadd.f32 %v3516_v51, %v3370_v18  ;;  %v3556_v22 = vadd.f32 %v3555_v6, %v3399_v11  ;;  %v3575_v53 = vadd.f32 %v3574_v36, %v3413_v23 }
 0x55a   :  { %v5713_v38 = vpop.permute.xlu1 %3275  ;;  %v3150_v16 = vpop.permute.xlu0 %3149 }
 0x55b   :  { %v3386_v34 = vmul.f32 %v3150_v16, %v2722_v15  ;;  %v2752_v16 = vld [vmem:[#allocation6 + $0x3d8] sm:$0xff]  ;;  %v3557_v27 = vadd.f32 %v3556_v22, %v3400_v63  ;;  %v3576_v45 = vadd.f32 %v3575_v53, %v3414_v37 }
 0x55c   :  { %v3416_v28 = vmul.f32 %v5713_v38, %v2752_v16 }
 0x55d   :  { %v3538_v49 = vadd.f32 %v3537_v17, %v3386_v34 }
 0x55e   :  { %v3213_v48 = vpop.permute.xlu1 %3212  ;;  %v3087_v46 = vpop.permute.xlu0 %3086 }
 0x55f   :  { %v3371_v4 = vmul.f32 %v3087_v46, %v2707_v54  ;;  %v3401_v19 = vmul.f32 %v3213_v48, %v2737_v59  ;;  %v3415_v46 = vmul.f32 %v5707_v44, %v2751_v0  ;;  %v2739_v54 = vld [vmem:[#allocation6 + $0x370] sm:$0xff]  ;;  %v2740_v44 = vld [vmem:[#allocation6 + $0x378] sm:$0xff] }
 0x561   :  { %v3518_v3 = vadd.f32 %v3517_v12, %v3371_v4  ;;  %v3558_v24 = vadd.f32 %v3557_v27, %v3401_v19  ;;  %v3577_v40 = vadd.f32 %v3576_v45, %v3415_v46 }
 0x562   :  { %v3280_v8 = vpop.permute.xlu1 %3279  ;;  %v3154_v21 = vpop.permute.xlu0 %3153 }
 0x563   :  { %v3387_v30 = vmul.f32 %v3154_v21, %v2723_v50  ;;  %v3417_v18 = vmul.f32 %v3280_v8, %v2753_v33  ;;  %v3578_v5 = vadd.f32 %v3577_v40, %v3416_v28 }
 0x565   :  { %v3539_v42 = vadd.f32 %v3538_v49, %v3387_v30  ;;  %v3579_v55 = vadd.f32 %v3578_v5, %v3417_v18 }
 0x566   :  { %v3217_v25 = vpop.permute.xlu1 %3216  ;;  %v3091_v7 = vpop.permute.xlu0 %3090 }
 0x567   :  { %v3372_v56 = vmul.f32 %v3091_v7, %v2708_v35  ;;  %v3402_v31 = vmul.f32 %v3217_v25, %v2738_v61 }
 0x569   :  { %v3519_v41 = vadd.f32 %v3518_v3, %v3372_v56  ;;  %v3559_v9 = vadd.f32 %v3558_v24, %v3402_v31 }
 0x56a   :  { %v3284_v62 = vpop.permute.xlu1 %3283  ;;  %v3158_v60 = vpop.permute.xlu0 %3157 }
 0x56b   :  { %v3520_v43 = vrot.slane %v3519_v41, 4  ;;  %v3388_v29 = vmul.f32 %v3158_v60, %v2724_v32  ;;  %v3418_v51 = vmul.f32 %v3284_v62, %v2754_v14 }
 0x56d   :  { %v3521_v47 = vadd.f32 %v3520_v43, %v3519_v41  ;;  %v3540_v48 = vadd.f32 %v3539_v42, %v3388_v29  ;;  %v3580_v13 = vadd.f32 %v3579_v55, %v3418_v51 }
 0x56e   :  { %v3221_v26 = vpop.permute.xlu1 %3220  ;;  %v3225_v10 = vpop.permute.xlu0 %3224 }
 0x56f   :  { %v3522_v57 = vrot.slane %v3521_v47, 2  ;;  %v3541_v15 = vrot.slane %v3540_v48, 4  ;;  %v3403_v21 = vmul.f32 %v3221_v26, %v2739_v54  ;;  %v3404_v2 = vmul.f32 %v3225_v10, %v2740_v44 }
 0x571   :  { %v3523_v20 = vadd.f32 %v3522_v57, %v3521_v47  ;;  %v3542_v4 = vadd.f32 %v3541_v15, %v3540_v48  ;;  %v3560_v38 = vadd.f32 %v3559_v9, %v3403_v21 }
 0x572   :  { %v3288_v11 = vpop.permute.xlu1 %3287 }
 0x573   :  { %v3524_v50 = vrot.slane %v3523_v20, 1  ;;  %v3543_v35 = vrot.slane %v3542_v4, 2  ;;  %v3561_v1 = vadd.f32 %v3560_v38, %v3404_v2  ;;  %v3419_v8 = vmul.f32 %v3288_v11, %v2755_v58 }
 0x575   :  { %v3525_v12 = vadd.f32 %v3524_v50, %v3523_v20  ;;  %v3544_v34 = vadd.f32 %v3543_v35, %v3542_v4  ;;  %v3562_v36 = vrot.slane %v3561_v1, 4  ;;  %v3581_v6 = vadd.f32 %v3580_v13, %v3419_v8 }
 0x576   :  { %v3292_v63 = vpop.permute.xlu1 %3291 }
 0x577   :  { %v3545_v59 = vrot.slane %v3544_v34, 1  ;;  %v3563_v25 = vadd.f32 %v3562_v36, %v3561_v1  ;;  %v3420_v7 = vmul.f32 %v3292_v63, %v2756_v39  ;;  %v3608_v0 = vsel %vm2607_vm3, %v3525_v12, %v5674_v52 }
 0x579   :  { %v3546_v17 = vadd.f32 %v3545_v59, %v3544_v34  ;;  %v3564_v3 = vrot.slane %v3563_v25, 2  ;;  %v3582_v30 = vadd.f32 %v3581_v6, %v3420_v7 }
 0x57b   :  { %v3565_v56 = vadd.f32 %v3564_v3, %v3563_v25  ;;  %v3583_v23 = vrot.slane %v3582_v30, 4  ;;  %v3609_v37 = vsel %vm2609_vm4, %v3546_v17, %v3608_v0 }
 0x57d   :  { %v3566_v22 = vrot.slane %v3565_v56, 1  ;;  %v3584_v61 = vadd.f32 %v3583_v23, %v3582_v30 }
 0x57f   :  { %v3567_v32 = vadd.f32 %v3566_v22, %v3565_v56  ;;  %v3585_v16 = vrot.slane %v3584_v61, 2 }
 0x581   :  { %v3586_v49 = vadd.f32 %v3585_v16, %v3584_v61  ;;  %v3610_v19 = vsel %vm2611_vm5, %v3567_v32, %v3609_v37 }
 0x583   :  { %v3587_v41 = vrot.slane %v3586_v49, 1 }
 0x585   :  { %v3588_v53 = vadd.f32 %v3587_v41, %v3586_v49 }
 0x587   :  { %v3611_v52 = vsel %vm2613_vm6, %v3588_v53, %v3610_v19 }
 0x588   :  { %3613 = vst [vmem:[#allocation11] sm:$0xff] %v3611_v52 }
 0x589   :  { %4196 = shalt.err (!%p4193_p1)
}
 0x58a   :  { %3623 = dma.vmem_to_hbm [thread:$0]  %s3621_s11, 128, %s5748_s7, [#allocation5]  }
 0x58b   :  { %4211 = dma.done.wait [#allocation5], 128  }
 0x58c   :  { %4212 = vsyncadd [#allocation5], 4294967168 }
 0x58d   :  { %4213 = dma.done.wait [#allocation13], 128  }
 0x58e   :  { %4214 = vsyncadd [#allocation13], 4294967168 }
 0x58f   :  { %3640 = vsyncpa [#allocation4], 1 }
 0x590   :  { %3641 = vsyncpa [#allocation7], 1 }
 0x591   :  { %3642 = vsyncpa [#allocation10], 1 }
 0x592   :  { %3643 = vsyncpa [#allocation5], 1 }
 0x593   :  { %3644 = vsyncpa [#allocation13], 1 }

</bundles_post_ra>
